<compile_context>
chip_gen: v5e
topology: v5e:2x2
jax: 0.10.0
libtpu: 0.0.40
codegen_flags: <defaults>
</compile_context>

<pallas_src>
import jax
import jax.numpy as jnp
from jax.experimental import pallas as pl
from jax.experimental.pallas import tpu as pltpu

# ----------------------------- model dims -----------------------------------
V = 256          # vocab size (synthetic)
D = 128          # d_model
H = 4            # attention heads
DH = D // H      # head dim
FF = 256         # FFN hidden dim
S_ENC = 8        # source (encoder) sequence length
T_DEC = 8        # decoder max length
LN_EPS = 1e-5
NEG_INF = -1e9
SQRT_D = float(D) ** 0.5
SCALE = 1.0 / (float(DH) ** 0.5)

# TODO(synk): HF tokenizer / batch_decode and pretrained NLLB weights have no
# Pallas equivalent; token ids are synthesized and weights are random-init.

PARAM_NAMES = (
    "embed", "pos_enc", "pos_dec",
    # encoder layer
    "e_ln1_g", "e_ln1_b", "e_wqkv", "e_bqkv", "e_wo", "e_bo",
    "e_ln2_g", "e_ln2_b", "e_w1", "e_b1", "e_w2", "e_b2",
    "e_lnf_g", "e_lnf_b",
    # decoder layer
    "d_ln1_g", "d_ln1_b", "d_wqkv", "d_bqkv", "d_wo_s", "d_bo_s",
    "d_ln2_g", "d_ln2_b", "d_wq_x", "d_bq_x", "d_wkv_x", "d_bkv_x",
    "d_wo_x", "d_bo_x",
    "d_ln3_g", "d_ln3_b", "d_w1", "d_b1", "d_w2", "d_b2",
    "d_lnf_g", "d_lnf_b",
    # LM head
    "lm_w", "lm_b",
)


# -------------------------- in-kernel helpers --------------------------------
def _ln(x, g_ref, b_ref):
    """Pre-LN layer norm on a [rows, D] value (f32 math)."""
    mu = jnp.mean(x, axis=-1, keepdims=True)
    var = jnp.mean(jnp.square(x - mu), axis=-1, keepdims=True)
    return (x - mu) * jax.lax.rsqrt(var + LN_EPS) * g_ref[...] + b_ref[...]


def _mm(x, w_ref, b_ref):
    """y = x @ W + b; bf16 MXU operands, f32 accumulation, f32 bias."""
    w = w_ref[...]
    return jnp.dot(x.astype(w.dtype), w,
                   preferred_element_type=jnp.float32) + b_ref[...]


def _mha(q, k, v, mask):
    """Multi-head attention.  q:[Sq,D], k/v:[Sk,D] (lane-dense, heads = lane
    groups of DH), mask:[Sq,Sk] additive or None.  Returns [Sq,D]."""
    outs = []
    for h in range(H):
        sl = slice(h * DH, (h + 1) * DH)
        s = jnp.einsum("qd,kd->qk", q[:, sl], k[:, sl],
                       preferred_element_type=jnp.float32) * SCALE
        if mask is not None:
            s = s + mask
        s = s - jnp.max(s, axis=-1, keepdims=True)
        e = jnp.exp(s)
        e = e * pl.reciprocal(jnp.sum(e, axis=-1, keepdims=True), approx=True)
        outs.append(jnp.dot(e, v[:, sl], preferred_element_type=jnp.float32))
    return jnp.concatenate(outs, axis=-1)


# ----------------------------- fused kernel ----------------------------------
def _translator_kernel(src_ids_ref, dec_init_ref, *refs):
    n = len(PARAM_NAMES)
    P = dict(zip(PARAM_NAMES, refs[:n]))
    dec_ids_ref = refs[n]                                   # output (T_DEC, 1) i32
    (x_src_ref, k_cross_ref, v_cross_ref,
     k_cache_ref, v_cache_ref) = refs[n + 1:]

    # ====================== encoder (runs once) ==============================
    # source token embedding: scalar ids from SMEM, dynamic row loads from the
    # VMEM-resident embedding table.
    for i in range(S_ENC):                                  # static unroll, S_ENC=8
        tok = src_ids_ref[i]
        x_src_ref[pl.ds(i, 1), :] = (
            P["embed"][pl.ds(tok, 1), :] * SQRT_D + P["pos_enc"][pl.ds(i, 1), :])
    x = x_src_ref[...]                                      # (S_ENC, D) f32

    # pre-LN self attention (fused QKV)
    h = _ln(x, P["e_ln1_g"], P["e_ln1_b"])
    qkv = _mm(h, P["e_wqkv"], P["e_bqkv"])                  # (S_ENC, 3D)
    ctx = _mha(qkv[:, :D], qkv[:, D:2 * D], qkv[:, 2 * D:], None)
    x = x + _mm(ctx, P["e_wo"], P["e_bo"])

    # pre-LN ReLU FFN
    h = _ln(x, P["e_ln2_g"], P["e_ln2_b"])
    hid = jnp.maximum(_mm(h, P["e_w1"], P["e_b1"]), 0.0)
    x = x + _mm(hid, P["e_w2"], P["e_b2"])

    enc_out = _ln(x, P["e_lnf_g"], P["e_lnf_b"])            # (S_ENC, D)

    # cross-attention K/V computed once, kept resident in VMEM
    kv_x = _mm(enc_out, P["d_wkv_x"], P["d_bkv_x"])         # (S_ENC, 2D)
    k_cross_ref[...] = kv_x[:, :D]
    v_cross_ref[...] = kv_x[:, D:]

    # decoder state init
    k_cache_ref[...] = jnp.zeros_like(k_cache_ref)
    v_cache_ref[...] = jnp.zeros_like(v_cache_ref)
    dec_ids_ref[...] = dec_init_ref[...]    # [decoder_start, forced_bos, 0, ...]

    # ================= greedy decode loop (incremental, in-kernel) ===========
    @pl.loop(0, T_DEC - 1)
    def _step(p):
        # embed token at position p via one-hot matmul (avoids scalar reads)
        tok = dec_ids_ref[pl.ds(p, 1), :]                   # (1,1) i32
        onehot = (jax.lax.broadcasted_iota(jnp.int32, (1, V), 1) == tok)
        x = jnp.dot(onehot.astype(jnp.float32), P["embed"][...],
                    preferred_element_type=jnp.float32) * SQRT_D
        x = x + P["pos_dec"][pl.ds(p, 1), :]                # (1, D)

        # masked self attention over the KV cache (fused QKV, 1 query row)
        h = _ln(x, P["d_ln1_g"], P["d_ln1_b"])
        qkv = _mm(h, P["d_wqkv"], P["d_bqkv"])              # (1, 3D)
        k_cache_ref[pl.ds(p, 1), :] = qkv[:, D:2 * D]
        v_cache_ref[pl.ds(p, 1), :] = qkv[:, 2 * D:]
        causal = jnp.where(
            jax.lax.broadcasted_iota(jnp.int32, (1, T_DEC), 1) <= p,
            0.0, NEG_INF)
        ctx = _mha(qkv[:, :D], k_cache_ref[...], v_cache_ref[...], causal)
        x = x + _mm(ctx, P["d_wo_s"], P["d_bo_s"])

        # cross attention over the precomputed encoder K/V
        h = _ln(x, P["d_ln2_g"], P["d_ln2_b"])
        qx = _mm(h, P["d_wq_x"], P["d_bq_x"])
        ctx = _mha(qx, k_cross_ref[...], v_cross_ref[...], None)
        x = x + _mm(ctx, P["d_wo_x"], P["d_bo_x"])

        # pre-LN ReLU FFN
        h = _ln(x, P["d_ln3_g"], P["d_ln3_b"])
        hid = jnp.maximum(_mm(h, P["d_w1"], P["d_b1"]), 0.0)
        x = x + _mm(hid, P["d_w2"], P["d_b2"])

        # LM head + greedy argmax (first-max tie-break, like jnp.argmax)
        xf = _ln(x, P["d_lnf_g"], P["d_lnf_b"])
        logits = _mm(xf, P["lm_w"], P["lm_b"])              # (1, V) f32
        idx = jax.lax.broadcasted_iota(jnp.int32, (1, V), 1)
        mx = jnp.max(logits, axis=-1, keepdims=True)
        nxt = jnp.min(jnp.where(logits == mx, idx, V),
                      axis=-1, keepdims=True)               # (1,1) i32

        # p=0 is the decoder-start row: only its K/V are needed; position 1
        # holds the forced target-language BOS and is never overwritten.
        @pl.when(p >= 1)
        def _():
            dec_ids_ref[pl.ds(p + 1, 1), :] = nxt


# ----------------------------- pallas_call wrapper ---------------------------
def _vmem():
    return pl.BlockSpec(memory_space=pltpu.MemorySpace.VMEM)


_translator_call = pl.pallas_call(
    _translator_kernel,
    out_shape=jax.ShapeDtypeStruct((T_DEC, 1), jnp.int32),
    in_specs=([pl.BlockSpec(memory_space=pltpu.MemorySpace.SMEM), _vmem()]
              + [_vmem() for _ in PARAM_NAMES]),
    out_specs=_vmem(),
    scratch_shapes=[
        pltpu.VMEM((S_ENC, D), jnp.float32),   # embedded source activations
        pltpu.VMEM((S_ENC, D), jnp.float32),   # cross-attention K
        pltpu.VMEM((S_ENC, D), jnp.float32),   # cross-attention V
        pltpu.VMEM((T_DEC, D), jnp.float32),   # decoder self-attn K cache
        pltpu.VMEM((T_DEC, D), jnp.float32),   # decoder self-attn V cache
    ],
)


@jax.jit
def translate_tokens(src_ids, params, decoder_start_id, forced_bos_id):
    """model.generate(**inputs, forced_bos_token_id=...) -> greedy token ids."""
    dec_init = jnp.zeros((T_DEC, 1), jnp.int32)
    dec_init = dec_init.at[0, 0].set(decoder_start_id)     # decoder start (eos)
    dec_init = dec_init.at[1, 0].set(forced_bos_id)        # forced target-lang BOS
    flat = [params[name] for name in PARAM_NAMES]
    out = _translator_call(src_ids.astype(jnp.int32), dec_init, *flat)
    return out[:, 0]


# ----------------------------- parameter init --------------------------------
def init_params(key):
    f32 = jnp.float32
    wdt = jnp.bfloat16           # MXU weight dtype (native on v5e/v6e/v7x)
    keys = iter(jax.random.split(key, 32))

    def dense(shape, dtype=wdt, scale=0.02):
        return (scale * jax.random.normal(next(keys), shape, f32)).astype(dtype)

    def ones():
        return jnp.ones((1, D), f32)

    def zeros(n=D):
        return jnp.zeros((1, n), f32)

    p = {
        "embed": dense((V, D), f32),
        "pos_enc": dense((S_ENC, D), f32),
        "pos_dec": dense((T_DEC, D), f32),
        # encoder layer
        "e_ln1_g": ones(), "e_ln1_b": zeros(),
        "e_wqkv": dense((D, 3 * D)), "e_bqkv": zeros(3 * D),
        "e_wo": dense((D, D)), "e_bo": zeros(),
        "e_ln2_g": ones(), "e_ln2_b": zeros(),
        "e_w1": dense((D, FF)), "e_b1": zeros(FF),
        "e_w2": dense((FF, D)), "e_b2": zeros(),
        "e_lnf_g": ones(), "e_lnf_b": zeros(),
        # decoder layer
        "d_ln1_g": ones(), "d_ln1_b": zeros(),
        "d_wqkv": dense((D, 3 * D)), "d_bqkv": zeros(3 * D),
        "d_wo_s": dense((D, D)), "d_bo_s": zeros(),
        "d_ln2_g": ones(), "d_ln2_b": zeros(),
        "d_wq_x": dense((D, D)), "d_bq_x": zeros(),
        "d_wkv_x": dense((D, 2 * D)), "d_bkv_x": zeros(2 * D),
        "d_wo_x": dense((D, D)), "d_bo_x": zeros(),
        "d_ln3_g": ones(), "d_ln3_b": zeros(),
        "d_w1": dense((D, FF)), "d_b1": zeros(FF),
        "d_w2": dense((FF, D)), "d_b2": zeros(),
        "d_lnf_g": ones(), "d_lnf_b": zeros(),
        # LM head
        "lm_w": dense((D, V)), "lm_b": zeros(V),
    }
    assert set(p) == set(PARAM_NAMES)
    return p


# ----------------------------------- main ------------------------------------
if __name__ == "__main__":
    key = jax.random.PRNGKey(0)
    pk, tk = jax.random.split(key)
    params = init_params(pk)

    # "tokenized" source text (the HF tokenizer itself is untranslatable).
    src_ids = jax.random.randint(tk, (S_ENC,), 0, V, dtype=jnp.int32)

    translated_tokens = translate_tokens(src_ids, params,
                                         decoder_start_id=jnp.int32(2),
                                         forced_bos_id=jnp.int32(7))
    translated_tokens = jax.block_until_ready(translated_tokens)

    assert translated_tokens.shape == (T_DEC,)
    assert int(translated_tokens[0]) == 2      # decoder start preserved
    assert int(translated_tokens[1]) == 7      # forced target-lang BOS preserved
    print("KERNEL_OK")
</pallas_src>

<mosaic_0001>
module attributes {stable_mosaic.version = 11 : i64} {
  func.func @_translator_kernel(%arg0: memref<8xi32, #tpu.memory_space<smem>>, %arg1: memref<8x1xi32, #tpu.memory_space<vmem>>, %arg2: memref<256x128xf32, #tpu.memory_space<vmem>>, %arg3: memref<8x128xf32, #tpu.memory_space<vmem>>, %arg4: memref<8x128xf32, #tpu.memory_space<vmem>>, %arg5: memref<1x128xf32, #tpu.memory_space<vmem>>, %arg6: memref<1x128xf32, #tpu.memory_space<vmem>>, %arg7: memref<128x384xbf16, #tpu.memory_space<vmem>>, %arg8: memref<1x384xf32, #tpu.memory_space<vmem>>, %arg9: memref<128x128xbf16, #tpu.memory_space<vmem>>, %arg10: memref<1x128xf32, #tpu.memory_space<vmem>>, %arg11: memref<1x128xf32, #tpu.memory_space<vmem>>, %arg12: memref<1x128xf32, #tpu.memory_space<vmem>>, %arg13: memref<128x256xbf16, #tpu.memory_space<vmem>>, %arg14: memref<1x256xf32, #tpu.memory_space<vmem>>, %arg15: memref<256x128xbf16, #tpu.memory_space<vmem>>, %arg16: memref<1x128xf32, #tpu.memory_space<vmem>>, %arg17: memref<1x128xf32, #tpu.memory_space<vmem>>, %arg18: memref<1x128xf32, #tpu.memory_space<vmem>>, %arg19: memref<1x128xf32, #tpu.memory_space<vmem>>, %arg20: memref<1x128xf32, #tpu.memory_space<vmem>>, %arg21: memref<128x384xbf16, #tpu.memory_space<vmem>>, %arg22: memref<1x384xf32, #tpu.memory_space<vmem>>, %arg23: memref<128x128xbf16, #tpu.memory_space<vmem>>, %arg24: memref<1x128xf32, #tpu.memory_space<vmem>>, %arg25: memref<1x128xf32, #tpu.memory_space<vmem>>, %arg26: memref<1x128xf32, #tpu.memory_space<vmem>>, %arg27: memref<128x128xbf16, #tpu.memory_space<vmem>>, %arg28: memref<1x128xf32, #tpu.memory_space<vmem>>, %arg29: memref<128x256xbf16, #tpu.memory_space<vmem>>, %arg30: memref<1x256xf32, #tpu.memory_space<vmem>>, %arg31: memref<128x128xbf16, #tpu.memory_space<vmem>>, %arg32: memref<1x128xf32, #tpu.memory_space<vmem>>, %arg33: memref<1x128xf32, #tpu.memory_space<vmem>>, %arg34: memref<1x128xf32, #tpu.memory_space<vmem>>, %arg35: memref<128x256xbf16, #tpu.memory_space<vmem>>, %arg36: memref<1x256xf32, #tpu.memory_space<vmem>>, %arg37: memref<256x128xbf16, #tpu.memory_space<vmem>>, %arg38: memref<1x128xf32, #tpu.memory_space<vmem>>, %arg39: memref<1x128xf32, #tpu.memory_space<vmem>>, %arg40: memref<1x128xf32, #tpu.memory_space<vmem>>, %arg41: memref<128x256xbf16, #tpu.memory_space<vmem>>, %arg42: memref<1x256xf32, #tpu.memory_space<vmem>>, %arg43: memref<8x1xi32, #tpu.memory_space<vmem>>, %arg44: memref<8x128xf32, #tpu.memory_space<vmem>>, %arg45: memref<8x128xf32, #tpu.memory_space<vmem>>, %arg46: memref<8x128xf32, #tpu.memory_space<vmem>>, %arg47: memref<8x128xf32, #tpu.memory_space<vmem>>, %arg48: memref<8x128xf32, #tpu.memory_space<vmem>>) attributes {dimension_semantics = [], scalar_prefetch = 0 : i64, scratch_operands = 5 : i64, tpu.core_type = #tpu.core_type<tc>} {
    %c0 = arith.constant 0 : index
    %0 = memref.load %arg0[%c0] : memref<8xi32, #tpu.memory_space<smem>>
    %1 = arith.index_cast %0 : i32 to index
    %c0_0 = arith.constant 0 : index
    %2 = vector.load %arg2[%1, %c0_0] : memref<256x128xf32, #tpu.memory_space<vmem>>, vector<1x128xf32>
    %cst = arith.constant 11.3137083 : f32
    %3 = vector.broadcast %cst : f32 to vector<1x128xf32>
    %4 = arith.mulf %2, %3 : vector<1x128xf32>
    %c0_1 = arith.constant 0 : index
    %c0_2 = arith.constant 0 : index
    %5 = vector.load %arg3[%c0_1, %c0_2] : memref<8x128xf32, #tpu.memory_space<vmem>>, vector<1x128xf32>
    %6 = arith.addf %4, %5 : vector<1x128xf32>
    %c0_3 = arith.constant 0 : index
    %c0_4 = arith.constant 0 : index
    %7 = vector.load %arg44[%c0_3, %c0_4] : memref<8x128xf32, #tpu.memory_space<vmem>>, vector<1x128xf32>
    tpu.vector_store %arg44[%c0_3, %c0_4], %6 {strides = array<i32>} : memref<8x128xf32, #tpu.memory_space<vmem>>, vector<1x128xf32>,
    %c1 = arith.constant 1 : index
    %8 = memref.load %arg0[%c1] : memref<8xi32, #tpu.memory_space<smem>>
    %9 = arith.index_cast %8 : i32 to index
    %c0_5 = arith.constant 0 : index
    %10 = vector.load %arg2[%9, %c0_5] : memref<256x128xf32, #tpu.memory_space<vmem>>, vector<1x128xf32>
    %cst_6 = arith.constant 11.3137083 : f32
    %11 = vector.broadcast %cst_6 : f32 to vector<1x128xf32>
    %12 = arith.mulf %10, %11 : vector<1x128xf32>
    %c1_7 = arith.constant 1 : index
    %c0_8 = arith.constant 0 : index
    %13 = vector.load %arg3[%c1_7, %c0_8] : memref<8x128xf32, #tpu.memory_space<vmem>>, vector<1x128xf32>
    %14 = arith.addf %12, %13 : vector<1x128xf32>
    %c1_9 = arith.constant 1 : index
    %c0_10 = arith.constant 0 : index
    %15 = vector.load %arg44[%c1_9, %c0_10] : memref<8x128xf32, #tpu.memory_space<vmem>>, vector<1x128xf32>
    tpu.vector_store %arg44[%c1_9, %c0_10], %14 {strides = array<i32>} : memref<8x128xf32, #tpu.memory_space<vmem>>, vector<1x128xf32>,
    %c2 = arith.constant 2 : index
    %16 = memref.load %arg0[%c2] : memref<8xi32, #tpu.memory_space<smem>>
    %17 = arith.index_cast %16 : i32 to index
    %c0_11 = arith.constant 0 : index
    %18 = vector.load %arg2[%17, %c0_11] : memref<256x128xf32, #tpu.memory_space<vmem>>, vector<1x128xf32>
    %cst_12 = arith.constant 11.3137083 : f32
    %19 = vector.broadcast %cst_12 : f32 to vector<1x128xf32>
    %20 = arith.mulf %18, %19 : vector<1x128xf32>
    %c2_13 = arith.constant 2 : index
    %c0_14 = arith.constant 0 : index
    %21 = vector.load %arg3[%c2_13, %c0_14] : memref<8x128xf32, #tpu.memory_space<vmem>>, vector<1x128xf32>
    %22 = arith.addf %20, %21 : vector<1x128xf32>
    %c2_15 = arith.constant 2 : index
    %c0_16 = arith.constant 0 : index
    %23 = vector.load %arg44[%c2_15, %c0_16] : memref<8x128xf32, #tpu.memory_space<vmem>>, vector<1x128xf32>
    tpu.vector_store %arg44[%c2_15, %c0_16], %22 {strides = array<i32>} : memref<8x128xf32, #tpu.memory_space<vmem>>, vector<1x128xf32>,
    %c3 = arith.constant 3 : index
    %24 = memref.load %arg0[%c3] : memref<8xi32, #tpu.memory_space<smem>>
    %25 = arith.index_cast %24 : i32 to index
    %c0_17 = arith.constant 0 : index
    %26 = vector.load %arg2[%25, %c0_17] : memref<256x128xf32, #tpu.memory_space<vmem>>, vector<1x128xf32>
    %cst_18 = arith.constant 11.3137083 : f32
    %27 = vector.broadcast %cst_18 : f32 to vector<1x128xf32>
    %28 = arith.mulf %26, %27 : vector<1x128xf32>
    %c3_19 = arith.constant 3 : index
    %c0_20 = arith.constant 0 : index
    %29 = vector.load %arg3[%c3_19, %c0_20] : memref<8x128xf32, #tpu.memory_space<vmem>>, vector<1x128xf32>
    %30 = arith.addf %28, %29 : vector<1x128xf32>
    %c3_21 = arith.constant 3 : index
    %c0_22 = arith.constant 0 : index
    %31 = vector.load %arg44[%c3_21, %c0_22] : memref<8x128xf32, #tpu.memory_space<vmem>>, vector<1x128xf32>
    tpu.vector_store %arg44[%c3_21, %c0_22], %30 {strides = array<i32>} : memref<8x128xf32, #tpu.memory_space<vmem>>, vector<1x128xf32>,
    %c4 = arith.constant 4 : index
    %32 = memref.load %arg0[%c4] : memref<8xi32, #tpu.memory_space<smem>>
    %33 = arith.index_cast %32 : i32 to index
    %c0_23 = arith.constant 0 : index
    %34 = vector.load %arg2[%33, %c0_23] : memref<256x128xf32, #tpu.memory_space<vmem>>, vector<1x128xf32>
    %cst_24 = arith.constant 11.3137083 : f32
    %35 = vector.broadcast %cst_24 : f32 to vector<1x128xf32>
    %36 = arith.mulf %34, %35 : vector<1x128xf32>
    %c4_25 = arith.constant 4 : index
    %c0_26 = arith.constant 0 : index
    %37 = vector.load %arg3[%c4_25, %c0_26] : memref<8x128xf32, #tpu.memory_space<vmem>>, vector<1x128xf32>
    %38 = arith.addf %36, %37 : vector<1x128xf32>
    %c4_27 = arith.constant 4 : index
    %c0_28 = arith.constant 0 : index
    %39 = vector.load %arg44[%c4_27, %c0_28] : memref<8x128xf32, #tpu.memory_space<vmem>>, vector<1x128xf32>
    tpu.vector_store %arg44[%c4_27, %c0_28], %38 {strides = array<i32>} : memref<8x128xf32, #tpu.memory_space<vmem>>, vector<1x128xf32>,
    %c5 = arith.constant 5 : index
    %40 = memref.load %arg0[%c5] : memref<8xi32, #tpu.memory_space<smem>>
    %41 = arith.index_cast %40 : i32 to index
    %c0_29 = arith.constant 0 : index
    %42 = vector.load %arg2[%41, %c0_29] : memref<256x128xf32, #tpu.memory_space<vmem>>, vector<1x128xf32>
    %cst_30 = arith.constant 11.3137083 : f32
    %43 = vector.broadcast %cst_30 : f32 to vector<1x128xf32>
    %44 = arith.mulf %42, %43 : vector<1x128xf32>
    %c5_31 = arith.constant 5 : index
    %c0_32 = arith.constant 0 : index
    %45 = vector.load %arg3[%c5_31, %c0_32] : memref<8x128xf32, #tpu.memory_space<vmem>>, vector<1x128xf32>
    %46 = arith.addf %44, %45 : vector<1x128xf32>
    %c5_33 = arith.constant 5 : index
    %c0_34 = arith.constant 0 : index
    %47 = vector.load %arg44[%c5_33, %c0_34] : memref<8x128xf32, #tpu.memory_space<vmem>>, vector<1x128xf32>
    tpu.vector_store %arg44[%c5_33, %c0_34], %46 {strides = array<i32>} : memref<8x128xf32, #tpu.memory_space<vmem>>, vector<1x128xf32>,
    %c6 = arith.constant 6 : index
    %48 = memref.load %arg0[%c6] : memref<8xi32, #tpu.memory_space<smem>>
    %49 = arith.index_cast %48 : i32 to index
    %c0_35 = arith.constant 0 : index
    %50 = vector.load %arg2[%49, %c0_35] : memref<256x128xf32, #tpu.memory_space<vmem>>, vector<1x128xf32>
    %cst_36 = arith.constant 11.3137083 : f32
    %51 = vector.broadcast %cst_36 : f32 to vector<1x128xf32>
    %52 = arith.mulf %50, %51 : vector<1x128xf32>
    %c6_37 = arith.constant 6 : index
    %c0_38 = arith.constant 0 : index
    %53 = vector.load %arg3[%c6_37, %c0_38] : memref<8x128xf32, #tpu.memory_space<vmem>>, vector<1x128xf32>
    %54 = arith.addf %52, %53 : vector<1x128xf32>
    %c6_39 = arith.constant 6 : index
    %c0_40 = arith.constant 0 : index
    %55 = vector.load %arg44[%c6_39, %c0_40] : memref<8x128xf32, #tpu.memory_space<vmem>>, vector<1x128xf32>
    tpu.vector_store %arg44[%c6_39, %c0_40], %54 {strides = array<i32>} : memref<8x128xf32, #tpu.memory_space<vmem>>, vector<1x128xf32>,
    %c7 = arith.constant 7 : index
    %56 = memref.load %arg0[%c7] : memref<8xi32, #tpu.memory_space<smem>>
    %57 = arith.index_cast %56 : i32 to index
    %c0_41 = arith.constant 0 : index
    %58 = vector.load %arg2[%57, %c0_41] : memref<256x128xf32, #tpu.memory_space<vmem>>, vector<1x128xf32>
    %cst_42 = arith.constant 11.3137083 : f32
    %59 = vector.broadcast %cst_42 : f32 to vector<1x128xf32>
    %60 = arith.mulf %58, %59 : vector<1x128xf32>
    %c7_43 = arith.constant 7 : index
    %c0_44 = arith.constant 0 : index
    %61 = vector.load %arg3[%c7_43, %c0_44] : memref<8x128xf32, #tpu.memory_space<vmem>>, vector<1x128xf32>
    %62 = arith.addf %60, %61 : vector<1x128xf32>
    %c7_45 = arith.constant 7 : index
    %c0_46 = arith.constant 0 : index
    %63 = vector.load %arg44[%c7_45, %c0_46] : memref<8x128xf32, #tpu.memory_space<vmem>>, vector<1x128xf32>
    tpu.vector_store %arg44[%c7_45, %c0_46], %62 {strides = array<i32>} : memref<8x128xf32, #tpu.memory_space<vmem>>, vector<1x128xf32>,
    %c0_47 = arith.constant 0 : index
    %c0_48 = arith.constant 0 : index
    %64 = vector.load %arg44[%c0_47, %c0_48] : memref<8x128xf32, #tpu.memory_space<vmem>>, vector<8x128xf32>
    %cst_49 = arith.constant dense<0.000000e+00> : vector<8xf32>
    %65 = vector.multi_reduction <add>, %64, %cst_49 [1] : vector<8x128xf32> to vector<8xf32>
    %66 = vector.shape_cast %65 : vector<8xf32> to vector<8x1xf32>
    %cst_50 = arith.constant 1.280000e+02 : f32
    %67 = vector.broadcast %cst_50 : f32 to vector<8x1xf32>
    %68 = arith.divf %66, %67 : vector<8x1xf32>
    %69 = vector.broadcast %68 : vector<8x1xf32> to vector<8x128xf32>
    %70 = arith.subf %64, %69 : vector<8x128xf32>
    %71 = arith.mulf %70, %70 : vector<8x128xf32>
    %cst_51 = arith.constant dense<0.000000e+00> : vector<8xf32>
    %72 = vector.multi_reduction <add>, %71, %cst_51 [1] : vector<8x128xf32> to vector<8xf32>
    %73 = vector.shape_cast %72 : vector<8xf32> to vector<8x1xf32>
    %cst_52 = arith.constant 1.280000e+02 : f32
    %74 = vector.broadcast %cst_52 : f32 to vector<8x1xf32>
    %75 = arith.divf %73, %74 : vector<8x1xf32>
    %76 = vector.broadcast %68 : vector<8x1xf32> to vector<8x128xf32>
    %77 = arith.subf %64, %76 : vector<8x128xf32>
    %cst_53 = arith.constant 9.99999974E-6 : f32
    %78 = vector.broadcast %cst_53 : f32 to vector<8x1xf32>
    %79 = arith.addf %75, %78 : vector<8x1xf32>
    %80 = math.rsqrt %79 : vector<8x1xf32>
    %81 = vector.broadcast %80 : vector<8x1xf32> to vector<8x128xf32>
    %82 = arith.mulf %77, %81 : vector<8x128xf32>
    %c0_54 = arith.constant 0 : index
    %c0_55 = arith.constant 0 : index
    %83 = vector.load %arg5[%c0_54, %c0_55] : memref<1x128xf32, #tpu.memory_space<vmem>>, vector<1x128xf32>
    %84 = vector.broadcast %83 : vector<1x128xf32> to vector<8x128xf32>
    %85 = arith.mulf %82, %84 : vector<8x128xf32>
    %c0_56 = arith.constant 0 : index
    %c0_57 = arith.constant 0 : index
    %86 = vector.load %arg6[%c0_56, %c0_57] : memref<1x128xf32, #tpu.memory_space<vmem>>, vector<1x128xf32>
    %87 = vector.broadcast %86 : vector<1x128xf32> to vector<8x128xf32>
    %88 = arith.addf %85, %87 : vector<8x128xf32>
    %c0_58 = arith.constant 0 : index
    %c0_59 = arith.constant 0 : index
    %89 = vector.load %arg7[%c0_58, %c0_59] : memref<128x384xbf16, #tpu.memory_space<vmem>>, vector<128x384xbf16>
    %90 = arith.truncf %88 : vector<8x128xf32> to vector<8x128xbf16>
    %cst_60 = arith.constant dense<0.000000e+00> : vector<8x384xf32>
    %91 = tpu.matmul %90, %89, %cst_60 {dimension_numbers = #tpu.dot_dimension_numbers<[1], [0], [0], [1], [0, 0, 1, 1], [], []>} : vector<8x128xbf16>, vector<128x384xbf16>, vector<8x384xf32> -> vector<8x384xf32>
    %c0_61 = arith.constant 0 : index
    %c0_62 = arith.constant 0 : index
    %92 = vector.load %arg8[%c0_61, %c0_62] : memref<1x384xf32, #tpu.memory_space<vmem>>, vector<1x384xf32>
    %93 = vector.broadcast %92 : vector<1x384xf32> to vector<8x384xf32>
    %94 = arith.addf %91, %93 : vector<8x384xf32>
    %95 = vector.extract_strided_slice %94 {offsets = [0, 0], sizes = [8, 128], strides = [1, 1]} : vector<8x384xf32> to vector<8x128xf32>
    %96 = vector.extract_strided_slice %94 {offsets = [0, 128], sizes = [8, 128], strides = [1, 1]} : vector<8x384xf32> to vector<8x128xf32>
    %97 = vector.extract_strided_slice %94 {offsets = [0, 256], sizes = [8, 128], strides = [1, 1]} : vector<8x384xf32> to vector<8x128xf32>
    %98 = vector.extract_strided_slice %95 {offsets = [0, 0], sizes = [8, 32], strides = [1, 1]} : vector<8x128xf32> to vector<8x32xf32>
    %99 = vector.extract_strided_slice %96 {offsets = [0, 0], sizes = [8, 32], strides = [1, 1]} : vector<8x128xf32> to vector<8x32xf32>
    "tpu.trace_start"() <{level = 10 : i32, message = "qd,kd->qk"}> : () -> ()
    %cst_63 = arith.constant dense<0.000000e+00> : vector<8x8xf32>
    %100 = tpu.matmul %98, %99, %cst_63 {dimension_numbers = #tpu.dot_dimension_numbers<[1], [1], [0], [0], [0, 0, 1, 0], [], []>} : vector<8x32xf32>, vector<8x32xf32>, vector<8x8xf32> -> vector<8x8xf32>
    "tpu.trace_stop"() : () -> ()
    %cst_64 = arith.constant 0.176776692 : f32
    %101 = vector.broadcast %cst_64 : f32 to vector<8x8xf32>
    %102 = arith.mulf %100, %101 : vector<8x8xf32>
    %cst_65 = arith.constant dense<0xFF800000> : vector<8xf32>
    %103 = vector.multi_reduction <maximumf>, %102, %cst_65 [1] : vector<8x8xf32> to vector<8xf32>
    %104 = vector.shape_cast %103 : vector<8xf32> to vector<8x1xf32>
    %105 = vector.broadcast %104 : vector<8x1xf32> to vector<8x8xf32>
    %106 = arith.subf %102, %105 : vector<8x8xf32>
    %107 = math.exp %106 : vector<8x8xf32>
    %cst_66 = arith.constant dense<0.000000e+00> : vector<8xf32>
    %108 = vector.multi_reduction <add>, %107, %cst_66 [1] : vector<8x8xf32> to vector<8xf32>
    %109 = vector.shape_cast %108 : vector<8xf32> to vector<8x1xf32>
    %110 = tpu.reciprocal %109 {approx = true} : vector<8x1xf32> -> vector<8x1xf32>
    %111 = vector.broadcast %110 : vector<8x1xf32> to vector<8x8xf32>
    %112 = arith.mulf %107, %111 : vector<8x8xf32>
    %113 = vector.extract_strided_slice %97 {offsets = [0, 0], sizes = [8, 32], strides = [1, 1]} : vector<8x128xf32> to vector<8x32xf32>
    %cst_67 = arith.constant dense<0.000000e+00> : vector<8x32xf32>
    %114 = tpu.matmul %112, %113, %cst_67 {dimension_numbers = #tpu.dot_dimension_numbers<[1], [0], [0], [1], [0, 0, 1, 1], [], []>} : vector<8x8xf32>, vector<8x32xf32>, vector<8x32xf32> -> vector<8x32xf32>
    %115 = vector.extract_strided_slice %95 {offsets = [0, 32], sizes = [8, 32], strides = [1, 1]} : vector<8x128xf32> to vector<8x32xf32>
    %116 = vector.extract_strided_slice %96 {offsets = [0, 32], sizes = [8, 32], strides = [1, 1]} : vector<8x128xf32> to vector<8x32xf32>
    "tpu.trace_start"() <{level = 10 : i32, message = "qd,kd->qk"}> : () -> ()
    %cst_68 = arith.constant dense<0.000000e+00> : vector<8x8xf32>
    %117 = tpu.matmul %115, %116, %cst_68 {dimension_numbers = #tpu.dot_dimension_numbers<[1], [1], [0], [0], [0, 0, 1, 0], [], []>} : vector<8x32xf32>, vector<8x32xf32>, vector<8x8xf32> -> vector<8x8xf32>
    "tpu.trace_stop"() : () -> ()
    %cst_69 = arith.constant 0.176776692 : f32
    %118 = vector.broadcast %cst_69 : f32 to vector<8x8xf32>
    %119 = arith.mulf %117, %118 : vector<8x8xf32>
    %cst_70 = arith.constant dense<0xFF800000> : vector<8xf32>
    %120 = vector.multi_reduction <maximumf>, %119, %cst_70 [1] : vector<8x8xf32> to vector<8xf32>
    %121 = vector.shape_cast %120 : vector<8xf32> to vector<8x1xf32>
    %122 = vector.broadcast %121 : vector<8x1xf32> to vector<8x8xf32>
    %123 = arith.subf %119, %122 : vector<8x8xf32>
    %124 = math.exp %123 : vector<8x8xf32>
    %cst_71 = arith.constant dense<0.000000e+00> : vector<8xf32>
    %125 = vector.multi_reduction <add>, %124, %cst_71 [1] : vector<8x8xf32> to vector<8xf32>
    %126 = vector.shape_cast %125 : vector<8xf32> to vector<8x1xf32>
    %127 = tpu.reciprocal %126 {approx = true} : vector<8x1xf32> -> vector<8x1xf32>
    %128 = vector.broadcast %127 : vector<8x1xf32> to vector<8x8xf32>
    %129 = arith.mulf %124, %128 : vector<8x8xf32>
    %130 = vector.extract_strided_slice %97 {offsets = [0, 32], sizes = [8, 32], strides = [1, 1]} : vector<8x128xf32> to vector<8x32xf32>
    %cst_72 = arith.constant dense<0.000000e+00> : vector<8x32xf32>
    %131 = tpu.matmul %129, %130, %cst_72 {dimension_numbers = #tpu.dot_dimension_numbers<[1], [0], [0], [1], [0, 0, 1, 1], [], []>} : vector<8x8xf32>, vector<8x32xf32>, vector<8x32xf32> -> vector<8x32xf32>
    %132 = vector.extract_strided_slice %95 {offsets = [0, 64], sizes = [8, 32], strides = [1, 1]} : vector<8x128xf32> to vector<8x32xf32>
    %133 = vector.extract_strided_slice %96 {offsets = [0, 64], sizes = [8, 32], strides = [1, 1]} : vector<8x128xf32> to vector<8x32xf32>
    "tpu.trace_start"() <{level = 10 : i32, message = "qd,kd->qk"}> : () -> ()
    %cst_73 = arith.constant dense<0.000000e+00> : vector<8x8xf32>
    %134 = tpu.matmul %132, %133, %cst_73 {dimension_numbers = #tpu.dot_dimension_numbers<[1], [1], [0], [0], [0, 0, 1, 0], [], []>} : vector<8x32xf32>, vector<8x32xf32>, vector<8x8xf32> -> vector<8x8xf32>
    "tpu.trace_stop"() : () -> ()
    %cst_74 = arith.constant 0.176776692 : f32
    %135 = vector.broadcast %cst_74 : f32 to vector<8x8xf32>
    %136 = arith.mulf %134, %135 : vector<8x8xf32>
    %cst_75 = arith.constant dense<0xFF800000> : vector<8xf32>
    %137 = vector.multi_reduction <maximumf>, %136, %cst_75 [1] : vector<8x8xf32> to vector<8xf32>
    %138 = vector.shape_cast %137 : vector<8xf32> to vector<8x1xf32>
    %139 = vector.broadcast %138 : vector<8x1xf32> to vector<8x8xf32>
    %140 = arith.subf %136, %139 : vector<8x8xf32>
    %141 = math.exp %140 : vector<8x8xf32>
    %cst_76 = arith.constant dense<0.000000e+00> : vector<8xf32>
    %142 = vector.multi_reduction <add>, %141, %cst_76 [1] : vector<8x8xf32> to vector<8xf32>
    %143 = vector.shape_cast %142 : vector<8xf32> to vector<8x1xf32>
    %144 = tpu.reciprocal %143 {approx = true} : vector<8x1xf32> -> vector<8x1xf32>
    %145 = vector.broadcast %144 : vector<8x1xf32> to vector<8x8xf32>
    %146 = arith.mulf %141, %145 : vector<8x8xf32>
    %147 = vector.extract_strided_slice %97 {offsets = [0, 64], sizes = [8, 32], strides = [1, 1]} : vector<8x128xf32> to vector<8x32xf32>
    %cst_77 = arith.constant dense<0.000000e+00> : vector<8x32xf32>
    %148 = tpu.matmul %146, %147, %cst_77 {dimension_numbers = #tpu.dot_dimension_numbers<[1], [0], [0], [1], [0, 0, 1, 1], [], []>} : vector<8x8xf32>, vector<8x32xf32>, vector<8x32xf32> -> vector<8x32xf32>
    %149 = vector.extract_strided_slice %95 {offsets = [0, 96], sizes = [8, 32], strides = [1, 1]} : vector<8x128xf32> to vector<8x32xf32>
    %150 = vector.extract_strided_slice %96 {offsets = [0, 96], sizes = [8, 32], strides = [1, 1]} : vector<8x128xf32> to vector<8x32xf32>
    "tpu.trace_start"() <{level = 10 : i32, message = "qd,kd->qk"}> : () -> ()
    %cst_78 = arith.constant dense<0.000000e+00> : vector<8x8xf32>
    %151 = tpu.matmul %149, %150, %cst_78 {dimension_numbers = #tpu.dot_dimension_numbers<[1], [1], [0], [0], [0, 0, 1, 0], [], []>} : vector<8x32xf32>, vector<8x32xf32>, vector<8x8xf32> -> vector<8x8xf32>
    "tpu.trace_stop"() : () -> ()
    %cst_79 = arith.constant 0.176776692 : f32
    %152 = vector.broadcast %cst_79 : f32 to vector<8x8xf32>
    %153 = arith.mulf %151, %152 : vector<8x8xf32>
    %cst_80 = arith.constant dense<0xFF800000> : vector<8xf32>
    %154 = vector.multi_reduction <maximumf>, %153, %cst_80 [1] : vector<8x8xf32> to vector<8xf32>
    %155 = vector.shape_cast %154 : vector<8xf32> to vector<8x1xf32>
    %156 = vector.broadcast %155 : vector<8x1xf32> to vector<8x8xf32>
    %157 = arith.subf %153, %156 : vector<8x8xf32>
    %158 = math.exp %157 : vector<8x8xf32>
    %cst_81 = arith.constant dense<0.000000e+00> : vector<8xf32>
    %159 = vector.multi_reduction <add>, %158, %cst_81 [1] : vector<8x8xf32> to vector<8xf32>
    %160 = vector.shape_cast %159 : vector<8xf32> to vector<8x1xf32>
    %161 = tpu.reciprocal %160 {approx = true} : vector<8x1xf32> -> vector<8x1xf32>
    %162 = vector.broadcast %161 : vector<8x1xf32> to vector<8x8xf32>
    %163 = arith.mulf %158, %162 : vector<8x8xf32>
    %164 = vector.extract_strided_slice %97 {offsets = [0, 96], sizes = [8, 32], strides = [1, 1]} : vector<8x128xf32> to vector<8x32xf32>
    %cst_82 = arith.constant dense<0.000000e+00> : vector<8x32xf32>
    %165 = tpu.matmul %163, %164, %cst_82 {dimension_numbers = #tpu.dot_dimension_numbers<[1], [0], [0], [1], [0, 0, 1, 1], [], []>} : vector<8x8xf32>, vector<8x32xf32>, vector<8x32xf32> -> vector<8x32xf32>
    %166 = tpu.concatenate %114, %131, %148, %165 in 1 : vector<8x32xf32>, vector<8x32xf32>, vector<8x32xf32>, vector<8x32xf32> -> vector<8x128xf32>
    %c0_83 = arith.constant 0 : index
    %c0_84 = arith.constant 0 : index
    %167 = vector.load %arg9[%c0_83, %c0_84] : memref<128x128xbf16, #tpu.memory_space<vmem>>, vector<128x128xbf16>
    %168 = arith.truncf %166 : vector<8x128xf32> to vector<8x128xbf16>
    %cst_85 = arith.constant dense<0.000000e+00> : vector<8x128xf32>
    %169 = tpu.matmul %168, %167, %cst_85 {dimension_numbers = #tpu.dot_dimension_numbers<[1], [0], [0], [1], [0, 0, 1, 1], [], []>} : vector<8x128xbf16>, vector<128x128xbf16>, vector<8x128xf32> -> vector<8x128xf32>
    %c0_86 = arith.constant 0 : index
    %c0_87 = arith.constant 0 : index
    %170 = vector.load %arg10[%c0_86, %c0_87] : memref<1x128xf32, #tpu.memory_space<vmem>>, vector<1x128xf32>
    %171 = vector.broadcast %170 : vector<1x128xf32> to vector<8x128xf32>
    %172 = arith.addf %169, %171 : vector<8x128xf32>
    %173 = arith.addf %64, %172 : vector<8x128xf32>
    %cst_88 = arith.constant dense<0.000000e+00> : vector<8xf32>
    %174 = vector.multi_reduction <add>, %173, %cst_88 [1] : vector<8x128xf32> to vector<8xf32>
    %175 = vector.shape_cast %174 : vector<8xf32> to vector<8x1xf32>
    %cst_89 = arith.constant 1.280000e+02 : f32
    %176 = vector.broadcast %cst_89 : f32 to vector<8x1xf32>
    %177 = arith.divf %175, %176 : vector<8x1xf32>
    %178 = vector.broadcast %177 : vector<8x1xf32> to vector<8x128xf32>
    %179 = arith.subf %173, %178 : vector<8x128xf32>
    %180 = arith.mulf %179, %179 : vector<8x128xf32>
    %cst_90 = arith.constant dense<0.000000e+00> : vector<8xf32>
    %181 = vector.multi_reduction <add>, %180, %cst_90 [1] : vector<8x128xf32> to vector<8xf32>
    %182 = vector.shape_cast %181 : vector<8xf32> to vector<8x1xf32>
    %cst_91 = arith.constant 1.280000e+02 : f32
    %183 = vector.broadcast %cst_91 : f32 to vector<8x1xf32>
    %184 = arith.divf %182, %183 : vector<8x1xf32>
    %185 = vector.broadcast %177 : vector<8x1xf32> to vector<8x128xf32>
    %186 = arith.subf %173, %185 : vector<8x128xf32>
    %cst_92 = arith.constant 9.99999974E-6 : f32
    %187 = vector.broadcast %cst_92 : f32 to vector<8x1xf32>
    %188 = arith.addf %184, %187 : vector<8x1xf32>
    %189 = math.rsqrt %188 : vector<8x1xf32>
    %190 = vector.broadcast %189 : vector<8x1xf32> to vector<8x128xf32>
    %191 = arith.mulf %186, %190 : vector<8x128xf32>
    %c0_93 = arith.constant 0 : index
    %c0_94 = arith.constant 0 : index
    %192 = vector.load %arg11[%c0_93, %c0_94] : memref<1x128xf32, #tpu.memory_space<vmem>>, vector<1x128xf32>
    %193 = vector.broadcast %192 : vector<1x128xf32> to vector<8x128xf32>
    %194 = arith.mulf %191, %193 : vector<8x128xf32>
    %c0_95 = arith.constant 0 : index
    %c0_96 = arith.constant 0 : index
    %195 = vector.load %arg12[%c0_95, %c0_96] : memref<1x128xf32, #tpu.memory_space<vmem>>, vector<1x128xf32>
    %196 = vector.broadcast %195 : vector<1x128xf32> to vector<8x128xf32>
    %197 = arith.addf %194, %196 : vector<8x128xf32>
    %c0_97 = arith.constant 0 : index
    %c0_98 = arith.constant 0 : index
    %198 = vector.load %arg13[%c0_97, %c0_98] : memref<128x256xbf16, #tpu.memory_space<vmem>>, vector<128x256xbf16>
    %199 = arith.truncf %197 : vector<8x128xf32> to vector<8x128xbf16>
    %cst_99 = arith.constant dense<0.000000e+00> : vector<8x256xf32>
    %200 = tpu.matmul %199, %198, %cst_99 {dimension_numbers = #tpu.dot_dimension_numbers<[1], [0], [0], [1], [0, 0, 1, 1], [], []>} : vector<8x128xbf16>, vector<128x256xbf16>, vector<8x256xf32> -> vector<8x256xf32>
    %c0_100 = arith.constant 0 : index
    %c0_101 = arith.constant 0 : index
    %201 = vector.load %arg14[%c0_100, %c0_101] : memref<1x256xf32, #tpu.memory_space<vmem>>, vector<1x256xf32>
    %202 = vector.broadcast %201 : vector<1x256xf32> to vector<8x256xf32>
    %203 = arith.addf %200, %202 : vector<8x256xf32>
    %cst_102 = arith.constant 0.000000e+00 : f32
    %204 = vector.broadcast %cst_102 : f32 to vector<8x256xf32>
    %205 = arith.maximumf %203, %204 : vector<8x256xf32>
    %c0_103 = arith.constant 0 : index
    %c0_104 = arith.constant 0 : index
    %206 = vector.load %arg15[%c0_103, %c0_104] : memref<256x128xbf16, #tpu.memory_space<vmem>>, vector<256x128xbf16>
    %207 = arith.truncf %205 : vector<8x256xf32> to vector<8x256xbf16>
    %cst_105 = arith.constant dense<0.000000e+00> : vector<8x128xf32>
    %208 = tpu.matmul %207, %206, %cst_105 {dimension_numbers = #tpu.dot_dimension_numbers<[1], [0], [0], [1], [0, 0, 1, 1], [], []>} : vector<8x256xbf16>, vector<256x128xbf16>, vector<8x128xf32> -> vector<8x128xf32>
    %c0_106 = arith.constant 0 : index
    %c0_107 = arith.constant 0 : index
    %209 = vector.load %arg16[%c0_106, %c0_107] : memref<1x128xf32, #tpu.memory_space<vmem>>, vector<1x128xf32>
    %210 = vector.broadcast %209 : vector<1x128xf32> to vector<8x128xf32>
    %211 = arith.addf %208, %210 : vector<8x128xf32>
    %212 = arith.addf %173, %211 : vector<8x128xf32>
    %cst_108 = arith.constant dense<0.000000e+00> : vector<8xf32>
    %213 = vector.multi_reduction <add>, %212, %cst_108 [1] : vector<8x128xf32> to vector<8xf32>
    %214 = vector.shape_cast %213 : vector<8xf32> to vector<8x1xf32>
    %cst_109 = arith.constant 1.280000e+02 : f32
    %215 = vector.broadcast %cst_109 : f32 to vector<8x1xf32>
    %216 = arith.divf %214, %215 : vector<8x1xf32>
    %217 = vector.broadcast %216 : vector<8x1xf32> to vector<8x128xf32>
    %218 = arith.subf %212, %217 : vector<8x128xf32>
    %219 = arith.mulf %218, %218 : vector<8x128xf32>
    %cst_110 = arith.constant dense<0.000000e+00> : vector<8xf32>
    %220 = vector.multi_reduction <add>, %219, %cst_110 [1] : vector<8x128xf32> to vector<8xf32>
    %221 = vector.shape_cast %220 : vector<8xf32> to vector<8x1xf32>
    %cst_111 = arith.constant 1.280000e+02 : f32
    %222 = vector.broadcast %cst_111 : f32 to vector<8x1xf32>
    %223 = arith.divf %221, %222 : vector<8x1xf32>
    %224 = vector.broadcast %216 : vector<8x1xf32> to vector<8x128xf32>
    %225 = arith.subf %212, %224 : vector<8x128xf32>
    %cst_112 = arith.constant 9.99999974E-6 : f32
    %226 = vector.broadcast %cst_112 : f32 to vector<8x1xf32>
    %227 = arith.addf %223, %226 : vector<8x1xf32>
    %228 = math.rsqrt %227 : vector<8x1xf32>
    %229 = vector.broadcast %228 : vector<8x1xf32> to vector<8x128xf32>
    %230 = arith.mulf %225, %229 : vector<8x128xf32>
    %c0_113 = arith.constant 0 : index
    %c0_114 = arith.constant 0 : index
    %231 = vector.load %arg17[%c0_113, %c0_114] : memref<1x128xf32, #tpu.memory_space<vmem>>, vector<1x128xf32>
    %232 = vector.broadcast %231 : vector<1x128xf32> to vector<8x128xf32>
    %233 = arith.mulf %230, %232 : vector<8x128xf32>
    %c0_115 = arith.constant 0 : index
    %c0_116 = arith.constant 0 : index
    %234 = vector.load %arg18[%c0_115, %c0_116] : memref<1x128xf32, #tpu.memory_space<vmem>>, vector<1x128xf32>
    %235 = vector.broadcast %234 : vector<1x128xf32> to vector<8x128xf32>
    %236 = arith.addf %233, %235 : vector<8x128xf32>
    %c0_117 = arith.constant 0 : index
    %c0_118 = arith.constant 0 : index
    %237 = vector.load %arg29[%c0_117, %c0_118] : memref<128x256xbf16, #tpu.memory_space<vmem>>, vector<128x256xbf16>
    %238 = arith.truncf %236 : vector<8x128xf32> to vector<8x128xbf16>
    %cst_119 = arith.constant dense<0.000000e+00> : vector<8x256xf32>
    %239 = tpu.matmul %238, %237, %cst_119 {dimension_numbers = #tpu.dot_dimension_numbers<[1], [0], [0], [1], [0, 0, 1, 1], [], []>} : vector<8x128xbf16>, vector<128x256xbf16>, vector<8x256xf32> -> vector<8x256xf32>
    %c0_120 = arith.constant 0 : index
    %c0_121 = arith.constant 0 : index
    %240 = vector.load %arg30[%c0_120, %c0_121] : memref<1x256xf32, #tpu.memory_space<vmem>>, vector<1x256xf32>
    %241 = vector.broadcast %240 : vector<1x256xf32> to vector<8x256xf32>
    %242 = arith.addf %239, %241 : vector<8x256xf32>
    %243 = vector.extract_strided_slice %242 {offsets = [0, 0], sizes = [8, 128], strides = [1, 1]} : vector<8x256xf32> to vector<8x128xf32>
    %c0_122 = arith.constant 0 : index
    %c0_123 = arith.constant 0 : index
    %244 = vector.load %arg45[%c0_122, %c0_123] : memref<8x128xf32, #tpu.memory_space<vmem>>, vector<8x128xf32>
    tpu.vector_store %arg45[%c0_122, %c0_123], %243 {strides = array<i32>} : memref<8x128xf32, #tpu.memory_space<vmem>>, vector<8x128xf32>,
    %245 = vector.extract_strided_slice %242 {offsets = [0, 128], sizes = [8, 128], strides = [1, 1]} : vector<8x256xf32> to vector<8x128xf32>
    %c0_124 = arith.constant 0 : index
    %c0_125 = arith.constant 0 : index
    %246 = vector.load %arg46[%c0_124, %c0_125] : memref<8x128xf32, #tpu.memory_space<vmem>>, vector<8x128xf32>
    tpu.vector_store %arg46[%c0_124, %c0_125], %245 {strides = array<i32>} : memref<8x128xf32, #tpu.memory_space<vmem>>, vector<8x128xf32>,
    %cst_126 = arith.constant 0.000000e+00 : f32
    %247 = vector.broadcast %cst_126 : f32 to vector<8x128xf32>
    %c0_127 = arith.constant 0 : index
    %c0_128 = arith.constant 0 : index
    %248 = vector.load %arg47[%c0_127, %c0_128] : memref<8x128xf32, #tpu.memory_space<vmem>>, vector<8x128xf32>
    tpu.vector_store %arg47[%c0_127, %c0_128], %247 {strides = array<i32>} : memref<8x128xf32, #tpu.memory_space<vmem>>, vector<8x128xf32>,
    %cst_129 = arith.constant 0.000000e+00 : f32
    %249 = vector.broadcast %cst_129 : f32 to vector<8x128xf32>
    %c0_130 = arith.constant 0 : index
    %c0_131 = arith.constant 0 : index
    %250 = vector.load %arg48[%c0_130, %c0_131] : memref<8x128xf32, #tpu.memory_space<vmem>>, vector<8x128xf32>
    tpu.vector_store %arg48[%c0_130, %c0_131], %249 {strides = array<i32>} : memref<8x128xf32, #tpu.memory_space<vmem>>, vector<8x128xf32>,
    %c0_132 = arith.constant 0 : index
    %c0_133 = arith.constant 0 : index
    %251 = vector.load %arg1[%c0_132, %c0_133] : memref<8x1xi32, #tpu.memory_space<vmem>>, vector<8x1xi32>
    %c0_134 = arith.constant 0 : index
    %c0_135 = arith.constant 0 : index
    %252 = vector.load %arg43[%c0_134, %c0_135] : memref<8x1xi32, #tpu.memory_space<vmem>>, vector<8x1xi32>
    tpu.vector_store %arg43[%c0_134, %c0_135], %251 {strides = array<i32>} : memref<8x1xi32, #tpu.memory_space<vmem>>, vector<8x1xi32>,
    %c0_i32 = arith.constant 0 : i32
    %c7_i32 = arith.constant 7 : i32
    %253 = arith.addi %c0_i32, %c7_i32 : i32
    %c1_i32 = arith.constant 1 : i32
    scf.for %arg49 = %c0_i32 to %253 step %c1_i32  : i32 {
      %c1_i32_137 = arith.constant 1 : i32
      %254 = arith.muli %arg49, %c1_i32_137 : i32
      %c0_i32_138 = arith.constant 0 : i32
      %255 = arith.addi %c0_i32_138, %254 : i32
      %256 = arith.index_cast %255 : i32 to index
      %c0_139 = arith.constant 0 : index
      %257 = vector.load %arg43[%256, %c0_139] : memref<8x1xi32, #tpu.memory_space<vmem>>, vector<1x1xi32>
      %258 = tpu.iota {dimensions = array<i32: 1>} : vector<1x256xi32>
      %259 = vector.broadcast %257 : vector<1x1xi32> to vector<1x256xi32>
      %260 = arith.cmpi eq, %258, %259 : vector<1x256xi32>
      %261 = arith.extui %260 : vector<1x256xi1> to vector<1x256xi32>
      %262 = arith.sitofp %261 : vector<1x256xi32> to vector<1x256xf32>
      %c0_140 = arith.constant 0 : index
      %c0_141 = arith.constant 0 : index
      %263 = vector.load %arg2[%c0_140, %c0_141] : memref<256x128xf32, #tpu.memory_space<vmem>>, vector<256x128xf32>
      %cst_142 = arith.constant dense<0.000000e+00> : vector<1x128xf32>
      %264 = tpu.matmul %262, %263, %cst_142 {dimension_numbers = #tpu.dot_dimension_numbers<[1], [0], [0], [1], [0, 0, 1, 1], [], []>} : vector<1x256xf32>, vector<256x128xf32>, vector<1x128xf32> -> vector<1x128xf32>
      %cst_143 = arith.constant 11.3137083 : f32
      %265 = vector.broadcast %cst_143 : f32 to vector<1x128xf32>
      %266 = arith.mulf %264, %265 : vector<1x128xf32>
      %267 = arith.index_cast %255 : i32 to index
      %c0_144 = arith.constant 0 : index
      %268 = vector.load %arg4[%267, %c0_144] : memref<8x128xf32, #tpu.memory_space<vmem>>, vector<1x128xf32>
      %269 = arith.addf %266, %268 : vector<1x128xf32>
      %cst_145 = arith.constant dense<0.000000e+00> : vector<1xf32>
      %270 = vector.multi_reduction <add>, %269, %cst_145 [1] : vector<1x128xf32> to vector<1xf32>
      %271 = vector.shape_cast %270 : vector<1xf32> to vector<1x1xf32>
      %cst_146 = arith.constant 1.280000e+02 : f32
      %272 = vector.broadcast %cst_146 : f32 to vector<1x1xf32>
      %273 = arith.divf %271, %272 : vector<1x1xf32>
      %274 = vector.broadcast %273 : vector<1x1xf32> to vector<1x128xf32>
      %275 = arith.subf %269, %274 : vector<1x128xf32>
      %276 = arith.mulf %275, %275 : vector<1x128xf32>
      %cst_147 = arith.constant dense<0.000000e+00> : vector<1xf32>
      %277 = vector.multi_reduction <add>, %276, %cst_147 [1] : vector<1x128xf32> to vector<1xf32>
      %278 = vector.shape_cast %277 : vector<1xf32> to vector<1x1xf32>
      %cst_148 = arith.constant 1.280000e+02 : f32
      %279 = vector.broadcast %cst_148 : f32 to vector<1x1xf32>
      %280 = arith.divf %278, %279 : vector<1x1xf32>
      %281 = vector.broadcast %273 : vector<1x1xf32> to vector<1x128xf32>
      %282 = arith.subf %269, %281 : vector<1x128xf32>
      %cst_149 = arith.constant 9.99999974E-6 : f32
      %283 = vector.broadcast %cst_149 : f32 to vector<1x1xf32>
      %284 = arith.addf %280, %283 : vector<1x1xf32>
      %285 = math.rsqrt %284 : vector<1x1xf32>
      %286 = vector.broadcast %285 : vector<1x1xf32> to vector<1x128xf32>
      %287 = arith.mulf %282, %286 : vector<1x128xf32>
      %c0_150 = arith.constant 0 : index
      %c0_151 = arith.constant 0 : index
      %288 = vector.load %arg19[%c0_150, %c0_151] : memref<1x128xf32, #tpu.memory_space<vmem>>, vector<1x128xf32>
      %289 = arith.mulf %287, %288 : vector<1x128xf32>
      %c0_152 = arith.constant 0 : index
      %c0_153 = arith.constant 0 : index
      %290 = vector.load %arg20[%c0_152, %c0_153] : memref<1x128xf32, #tpu.memory_space<vmem>>, vector<1x128xf32>
      %291 = arith.addf %289, %290 : vector<1x128xf32>
      %c0_154 = arith.constant 0 : index
      %c0_155 = arith.constant 0 : index
      %292 = vector.load %arg21[%c0_154, %c0_155] : memref<128x384xbf16, #tpu.memory_space<vmem>>, vector<128x384xbf16>
      %293 = arith.truncf %291 : vector<1x128xf32> to vector<1x128xbf16>
      %cst_156 = arith.constant dense<0.000000e+00> : vector<1x384xf32>
      %294 = tpu.matmul %293, %292, %cst_156 {dimension_numbers = #tpu.dot_dimension_numbers<[1], [0], [0], [1], [0, 0, 1, 1], [], []>} : vector<1x128xbf16>, vector<128x384xbf16>, vector<1x384xf32> -> vector<1x384xf32>
      %c0_157 = arith.constant 0 : index
      %c0_158 = arith.constant 0 : index
      %295 = vector.load %arg22[%c0_157, %c0_158] : memref<1x384xf32, #tpu.memory_space<vmem>>, vector<1x384xf32>
      %296 = arith.addf %294, %295 : vector<1x384xf32>
      %297 = vector.extract_strided_slice %296 {offsets = [0, 128], sizes = [1, 128], strides = [1, 1]} : vector<1x384xf32> to vector<1x128xf32>
      %298 = arith.index_cast %255 : i32 to index
      %c0_159 = arith.constant 0 : index
      %299 = vector.load %arg47[%298, %c0_159] : memref<8x128xf32, #tpu.memory_space<vmem>>, vector<1x128xf32>
      tpu.vector_store %arg47[%298, %c0_159], %297 {strides = array<i32>} : memref<8x128xf32, #tpu.memory_space<vmem>>, vector<1x128xf32>,
      %300 = vector.extract_strided_slice %296 {offsets = [0, 256], sizes = [1, 128], strides = [1, 1]} : vector<1x384xf32> to vector<1x128xf32>
      %301 = arith.index_cast %255 : i32 to index
      %c0_160 = arith.constant 0 : index
      %302 = vector.load %arg48[%301, %c0_160] : memref<8x128xf32, #tpu.memory_space<vmem>>, vector<1x128xf32>
      tpu.vector_store %arg48[%301, %c0_160], %300 {strides = array<i32>} : memref<8x128xf32, #tpu.memory_space<vmem>>, vector<1x128xf32>,
      %303 = tpu.iota {dimensions = array<i32: 1>} : vector<1x8xi32>
      %304 = vector.broadcast %255 : i32 to vector<1x8xi32>
      %305 = arith.cmpi sle, %303, %304 : vector<1x8xi32>
      %cst_161 = arith.constant 0.000000e+00 : f32
      %cst_162 = arith.constant -1.000000e+09 : f32
      %306 = vector.broadcast %cst_161 : f32 to vector<1x8xf32>
      %307 = vector.broadcast %cst_162 : f32 to vector<1x8xf32>
      %308 = arith.select %305, %306, %307 : vector<1x8xi1>, vector<1x8xf32>
      %309 = vector.extract_strided_slice %296 {offsets = [0, 0], sizes = [1, 128], strides = [1, 1]} : vector<1x384xf32> to vector<1x128xf32>
      %c0_163 = arith.constant 0 : index
      %c0_164 = arith.constant 0 : index
      %310 = vector.load %arg47[%c0_163, %c0_164] : memref<8x128xf32, #tpu.memory_space<vmem>>, vector<8x128xf32>
      %c0_165 = arith.constant 0 : index
      %c0_166 = arith.constant 0 : index
      %311 = vector.load %arg48[%c0_165, %c0_166] : memref<8x128xf32, #tpu.memory_space<vmem>>, vector<8x128xf32>
      %312 = vector.extract_strided_slice %309 {offsets = [0, 0], sizes = [1, 32], strides = [1, 1]} : vector<1x128xf32> to vector<1x32xf32>
      %313 = vector.extract_strided_slice %310 {offsets = [0, 0], sizes = [8, 32], strides = [1, 1]} : vector<8x128xf32> to vector<8x32xf32>
      "tpu.trace_start"() <{level = 10 : i32, message = "qd,kd->qk"}> : () -> ()
      %cst_167 = arith.constant dense<0.000000e+00> : vector<1x8xf32>
      %314 = tpu.matmul %312, %313, %cst_167 {dimension_numbers = #tpu.dot_dimension_numbers<[1], [1], [0], [0], [0, 0, 1, 0], [], []>} : vector<1x32xf32>, vector<8x32xf32>, vector<1x8xf32> -> vector<1x8xf32>
      "tpu.trace_stop"() : () -> ()
      %cst_168 = arith.constant 0.176776692 : f32
      %315 = vector.broadcast %cst_168 : f32 to vector<1x8xf32>
      %316 = arith.mulf %314, %315 : vector<1x8xf32>
      %317 = arith.addf %316, %308 : vector<1x8xf32>
      %cst_169 = arith.constant dense<0xFF800000> : vector<1xf32>
      %318 = vector.multi_reduction <maximumf>, %317, %cst_169 [1] : vector<1x8xf32> to vector<1xf32>
      %319 = vector.shape_cast %318 : vector<1xf32> to vector<1x1xf32>
      %320 = vector.broadcast %319 : vector<1x1xf32> to vector<1x8xf32>
      %321 = arith.subf %317, %320 : vector<1x8xf32>
      %322 = math.exp %321 : vector<1x8xf32>
      %cst_170 = arith.constant dense<0.000000e+00> : vector<1xf32>
      %323 = vector.multi_reduction <add>, %322, %cst_170 [1] : vector<1x8xf32> to vector<1xf32>
      %324 = vector.shape_cast %323 : vector<1xf32> to vector<1x1xf32>
      %325 = tpu.reciprocal %324 {approx = true} : vector<1x1xf32> -> vector<1x1xf32>
      %326 = vector.broadcast %325 : vector<1x1xf32> to vector<1x8xf32>
      %327 = arith.mulf %322, %326 : vector<1x8xf32>
      %328 = vector.extract_strided_slice %311 {offsets = [0, 0], sizes = [8, 32], strides = [1, 1]} : vector<8x128xf32> to vector<8x32xf32>
      %cst_171 = arith.constant dense<0.000000e+00> : vector<1x32xf32>
      %329 = tpu.matmul %327, %328, %cst_171 {dimension_numbers = #tpu.dot_dimension_numbers<[1], [0], [0], [1], [0, 0, 1, 1], [], []>} : vector<1x8xf32>, vector<8x32xf32>, vector<1x32xf32> -> vector<1x32xf32>
      %330 = vector.extract_strided_slice %309 {offsets = [0, 32], sizes = [1, 32], strides = [1, 1]} : vector<1x128xf32> to vector<1x32xf32>
      %331 = vector.extract_strided_slice %310 {offsets = [0, 32], sizes = [8, 32], strides = [1, 1]} : vector<8x128xf32> to vector<8x32xf32>
      "tpu.trace_start"() <{level = 10 : i32, message = "qd,kd->qk"}> : () -> ()
      %cst_172 = arith.constant dense<0.000000e+00> : vector<1x8xf32>
      %332 = tpu.matmul %330, %331, %cst_172 {dimension_numbers = #tpu.dot_dimension_numbers<[1], [1], [0], [0], [0, 0, 1, 0], [], []>} : vector<1x32xf32>, vector<8x32xf32>, vector<1x8xf32> -> vector<1x8xf32>
      "tpu.trace_stop"() : () -> ()
      %cst_173 = arith.constant 0.176776692 : f32
      %333 = vector.broadcast %cst_173 : f32 to vector<1x8xf32>
      %334 = arith.mulf %332, %333 : vector<1x8xf32>
      %335 = arith.addf %334, %308 : vector<1x8xf32>
      %cst_174 = arith.constant dense<0xFF800000> : vector<1xf32>
      %336 = vector.multi_reduction <maximumf>, %335, %cst_174 [1] : vector<1x8xf32> to vector<1xf32>
      %337 = vector.shape_cast %336 : vector<1xf32> to vector<1x1xf32>
      %338 = vector.broadcast %337 : vector<1x1xf32> to vector<1x8xf32>
      %339 = arith.subf %335, %338 : vector<1x8xf32>
      %340 = math.exp %339 : vector<1x8xf32>
      %cst_175 = arith.constant dense<0.000000e+00> : vector<1xf32>
      %341 = vector.multi_reduction <add>, %340, %cst_175 [1] : vector<1x8xf32> to vector<1xf32>
      %342 = vector.shape_cast %341 : vector<1xf32> to vector<1x1xf32>
      %343 = tpu.reciprocal %342 {approx = true} : vector<1x1xf32> -> vector<1x1xf32>
      %344 = vector.broadcast %343 : vector<1x1xf32> to vector<1x8xf32>
      %345 = arith.mulf %340, %344 : vector<1x8xf32>
      %346 = vector.extract_strided_slice %311 {offsets = [0, 32], sizes = [8, 32], strides = [1, 1]} : vector<8x128xf32> to vector<8x32xf32>
      %cst_176 = arith.constant dense<0.000000e+00> : vector<1x32xf32>
      %347 = tpu.matmul %345, %346, %cst_176 {dimension_numbers = #tpu.dot_dimension_numbers<[1], [0], [0], [1], [0, 0, 1, 1], [], []>} : vector<1x8xf32>, vector<8x32xf32>, vector<1x32xf32> -> vector<1x32xf32>
      %348 = vector.extract_strided_slice %309 {offsets = [0, 64], sizes = [1, 32], strides = [1, 1]} : vector<1x128xf32> to vector<1x32xf32>
      %349 = vector.extract_strided_slice %310 {offsets = [0, 64], sizes = [8, 32], strides = [1, 1]} : vector<8x128xf32> to vector<8x32xf32>
      "tpu.trace_start"() <{level = 10 : i32, message = "qd,kd->qk"}> : () -> ()
      %cst_177 = arith.constant dense<0.000000e+00> : vector<1x8xf32>
      %350 = tpu.matmul %348, %349, %cst_177 {dimension_numbers = #tpu.dot_dimension_numbers<[1], [1], [0], [0], [0, 0, 1, 0], [], []>} : vector<1x32xf32>, vector<8x32xf32>, vector<1x8xf32> -> vector<1x8xf32>
      "tpu.trace_stop"() : () -> ()
      %cst_178 = arith.constant 0.176776692 : f32
      %351 = vector.broadcast %cst_178 : f32 to vector<1x8xf32>
      %352 = arith.mulf %350, %351 : vector<1x8xf32>
      %353 = arith.addf %352, %308 : vector<1x8xf32>
      %cst_179 = arith.constant dense<0xFF800000> : vector<1xf32>
      %354 = vector.multi_reduction <maximumf>, %353, %cst_179 [1] : vector<1x8xf32> to vector<1xf32>
      %355 = vector.shape_cast %354 : vector<1xf32> to vector<1x1xf32>
      %356 = vector.broadcast %355 : vector<1x1xf32> to vector<1x8xf32>
      %357 = arith.subf %353, %356 : vector<1x8xf32>
      %358 = math.exp %357 : vector<1x8xf32>
      %cst_180 = arith.constant dense<0.000000e+00> : vector<1xf32>
      %359 = vector.multi_reduction <add>, %358, %cst_180 [1] : vector<1x8xf32> to vector<1xf32>
      %360 = vector.shape_cast %359 : vector<1xf32> to vector<1x1xf32>
      %361 = tpu.reciprocal %360 {approx = true} : vector<1x1xf32> -> vector<1x1xf32>
      %362 = vector.broadcast %361 : vector<1x1xf32> to vector<1x8xf32>
      %363 = arith.mulf %358, %362 : vector<1x8xf32>
      %364 = vector.extract_strided_slice %311 {offsets = [0, 64], sizes = [8, 32], strides = [1, 1]} : vector<8x128xf32> to vector<8x32xf32>
      %cst_181 = arith.constant dense<0.000000e+00> : vector<1x32xf32>
      %365 = tpu.matmul %363, %364, %cst_181 {dimension_numbers = #tpu.dot_dimension_numbers<[1], [0], [0], [1], [0, 0, 1, 1], [], []>} : vector<1x8xf32>, vector<8x32xf32>, vector<1x32xf32> -> vector<1x32xf32>
      %366 = vector.extract_strided_slice %309 {offsets = [0, 96], sizes = [1, 32], strides = [1, 1]} : vector<1x128xf32> to vector<1x32xf32>
      %367 = vector.extract_strided_slice %310 {offsets = [0, 96], sizes = [8, 32], strides = [1, 1]} : vector<8x128xf32> to vector<8x32xf32>
      "tpu.trace_start"() <{level = 10 : i32, message = "qd,kd->qk"}> : () -> ()
      %cst_182 = arith.constant dense<0.000000e+00> : vector<1x8xf32>
      %368 = tpu.matmul %366, %367, %cst_182 {dimension_numbers = #tpu.dot_dimension_numbers<[1], [1], [0], [0], [0, 0, 1, 0], [], []>} : vector<1x32xf32>, vector<8x32xf32>, vector<1x8xf32> -> vector<1x8xf32>
      "tpu.trace_stop"() : () -> ()
      %cst_183 = arith.constant 0.176776692 : f32
      %369 = vector.broadcast %cst_183 : f32 to vector<1x8xf32>
      %370 = arith.mulf %368, %369 : vector<1x8xf32>
      %371 = arith.addf %370, %308 : vector<1x8xf32>
      %cst_184 = arith.constant dense<0xFF800000> : vector<1xf32>
      %372 = vector.multi_reduction <maximumf>, %371, %cst_184 [1] : vector<1x8xf32> to vector<1xf32>
      %373 = vector.shape_cast %372 : vector<1xf32> to vector<1x1xf32>
      %374 = vector.broadcast %373 : vector<1x1xf32> to vector<1x8xf32>
      %375 = arith.subf %371, %374 : vector<1x8xf32>
      %376 = math.exp %375 : vector<1x8xf32>
      %cst_185 = arith.constant dense<0.000000e+00> : vector<1xf32>
      %377 = vector.multi_reduction <add>, %376, %cst_185 [1] : vector<1x8xf32> to vector<1xf32>
      %378 = vector.shape_cast %377 : vector<1xf32> to vector<1x1xf32>
      %379 = tpu.reciprocal %378 {approx = true} : vector<1x1xf32> -> vector<1x1xf32>
      %380 = vector.broadcast %379 : vector<1x1xf32> to vector<1x8xf32>
      %381 = arith.mulf %376, %380 : vector<1x8xf32>
      %382 = vector.extract_strided_slice %311 {offsets = [0, 96], sizes = [8, 32], strides = [1, 1]} : vector<8x128xf32> to vector<8x32xf32>
      %cst_186 = arith.constant dense<0.000000e+00> : vector<1x32xf32>
      %383 = tpu.matmul %381, %382, %cst_186 {dimension_numbers = #tpu.dot_dimension_numbers<[1], [0], [0], [1], [0, 0, 1, 1], [], []>} : vector<1x8xf32>, vector<8x32xf32>, vector<1x32xf32> -> vector<1x32xf32>
      %384 = tpu.concatenate %329, %347, %365, %383 in 1 : vector<1x32xf32>, vector<1x32xf32>, vector<1x32xf32>, vector<1x32xf32> -> vector<1x128xf32>
      %c0_187 = arith.constant 0 : index
      %c0_188 = arith.constant 0 : index
      %385 = vector.load %arg23[%c0_187, %c0_188] : memref<128x128xbf16, #tpu.memory_space<vmem>>, vector<128x128xbf16>
      %386 = arith.truncf %384 : vector<1x128xf32> to vector<1x128xbf16>
      %cst_189 = arith.constant dense<0.000000e+00> : vector<1x128xf32>
      %387 = tpu.matmul %386, %385, %cst_189 {dimension_numbers = #tpu.dot_dimension_numbers<[1], [0], [0], [1], [0, 0, 1, 1], [], []>} : vector<1x128xbf16>, vector<128x128xbf16>, vector<1x128xf32> -> vector<1x128xf32>
      %c0_190 = arith.constant 0 : index
      %c0_191 = arith.constant 0 : index
      %388 = vector.load %arg24[%c0_190, %c0_191] : memref<1x128xf32, #tpu.memory_space<vmem>>, vector<1x128xf32>
      %389 = arith.addf %387, %388 : vector<1x128xf32>
      %390 = arith.addf %269, %389 : vector<1x128xf32>
      %cst_192 = arith.constant dense<0.000000e+00> : vector<1xf32>
      %391 = vector.multi_reduction <add>, %390, %cst_192 [1] : vector<1x128xf32> to vector<1xf32>
      %392 = vector.shape_cast %391 : vector<1xf32> to vector<1x1xf32>
      %cst_193 = arith.constant 1.280000e+02 : f32
      %393 = vector.broadcast %cst_193 : f32 to vector<1x1xf32>
      %394 = arith.divf %392, %393 : vector<1x1xf32>
      %395 = vector.broadcast %394 : vector<1x1xf32> to vector<1x128xf32>
      %396 = arith.subf %390, %395 : vector<1x128xf32>
      %397 = arith.mulf %396, %396 : vector<1x128xf32>
      %cst_194 = arith.constant dense<0.000000e+00> : vector<1xf32>
      %398 = vector.multi_reduction <add>, %397, %cst_194 [1] : vector<1x128xf32> to vector<1xf32>
      %399 = vector.shape_cast %398 : vector<1xf32> to vector<1x1xf32>
      %cst_195 = arith.constant 1.280000e+02 : f32
      %400 = vector.broadcast %cst_195 : f32 to vector<1x1xf32>
      %401 = arith.divf %399, %400 : vector<1x1xf32>
      %402 = vector.broadcast %394 : vector<1x1xf32> to vector<1x128xf32>
      %403 = arith.subf %390, %402 : vector<1x128xf32>
      %cst_196 = arith.constant 9.99999974E-6 : f32
      %404 = vector.broadcast %cst_196 : f32 to vector<1x1xf32>
      %405 = arith.addf %401, %404 : vector<1x1xf32>
      %406 = math.rsqrt %405 : vector<1x1xf32>
      %407 = vector.broadcast %406 : vector<1x1xf32> to vector<1x128xf32>
      %408 = arith.mulf %403, %407 : vector<1x128xf32>
      %c0_197 = arith.constant 0 : index
      %c0_198 = arith.constant 0 : index
      %409 = vector.load %arg25[%c0_197, %c0_198] : memref<1x128xf32, #tpu.memory_space<vmem>>, vector<1x128xf32>
      %410 = arith.mulf %408, %409 : vector<1x128xf32>
      %c0_199 = arith.constant 0 : index
      %c0_200 = arith.constant 0 : index
      %411 = vector.load %arg26[%c0_199, %c0_200] : memref<1x128xf32, #tpu.memory_space<vmem>>, vector<1x128xf32>
      %412 = arith.addf %410, %411 : vector<1x128xf32>
      %c0_201 = arith.constant 0 : index
      %c0_202 = arith.constant 0 : index
      %413 = vector.load %arg27[%c0_201, %c0_202] : memref<128x128xbf16, #tpu.memory_space<vmem>>, vector<128x128xbf16>
      %414 = arith.truncf %412 : vector<1x128xf32> to vector<1x128xbf16>
      %cst_203 = arith.constant dense<0.000000e+00> : vector<1x128xf32>
      %415 = tpu.matmul %414, %413, %cst_203 {dimension_numbers = #tpu.dot_dimension_numbers<[1], [0], [0], [1], [0, 0, 1, 1], [], []>} : vector<1x128xbf16>, vector<128x128xbf16>, vector<1x128xf32> -> vector<1x128xf32>
      %c0_204 = arith.constant 0 : index
      %c0_205 = arith.constant 0 : index
      %416 = vector.load %arg28[%c0_204, %c0_205] : memref<1x128xf32, #tpu.memory_space<vmem>>, vector<1x128xf32>
      %417 = arith.addf %415, %416 : vector<1x128xf32>
      %c0_206 = arith.constant 0 : index
      %c0_207 = arith.constant 0 : index
      %418 = vector.load %arg45[%c0_206, %c0_207] : memref<8x128xf32, #tpu.memory_space<vmem>>, vector<8x128xf32>
      %c0_208 = arith.constant 0 : index
      %c0_209 = arith.constant 0 : index
      %419 = vector.load %arg46[%c0_208, %c0_209] : memref<8x128xf32, #tpu.memory_space<vmem>>, vector<8x128xf32>
      %420 = vector.extract_strided_slice %417 {offsets = [0, 0], sizes = [1, 32], strides = [1, 1]} : vector<1x128xf32> to vector<1x32xf32>
      %421 = vector.extract_strided_slice %418 {offsets = [0, 0], sizes = [8, 32], strides = [1, 1]} : vector<8x128xf32> to vector<8x32xf32>
      "tpu.trace_start"() <{level = 10 : i32, message = "qd,kd->qk"}> : () -> ()
      %cst_210 = arith.constant dense<0.000000e+00> : vector<1x8xf32>
      %422 = tpu.matmul %420, %421, %cst_210 {dimension_numbers = #tpu.dot_dimension_numbers<[1], [1], [0], [0], [0, 0, 1, 0], [], []>} : vector<1x32xf32>, vector<8x32xf32>, vector<1x8xf32> -> vector<1x8xf32>
      "tpu.trace_stop"() : () -> ()
      %cst_211 = arith.constant 0.176776692 : f32
      %423 = vector.broadcast %cst_211 : f32 to vector<1x8xf32>
      %424 = arith.mulf %422, %423 : vector<1x8xf32>
      %cst_212 = arith.constant dense<0xFF800000> : vector<1xf32>
      %425 = vector.multi_reduction <maximumf>, %424, %cst_212 [1] : vector<1x8xf32> to vector<1xf32>
      %426 = vector.shape_cast %425 : vector<1xf32> to vector<1x1xf32>
      %427 = vector.broadcast %426 : vector<1x1xf32> to vector<1x8xf32>
      %428 = arith.subf %424, %427 : vector<1x8xf32>
      %429 = math.exp %428 : vector<1x8xf32>
      %cst_213 = arith.constant dense<0.000000e+00> : vector<1xf32>
      %430 = vector.multi_reduction <add>, %429, %cst_213 [1] : vector<1x8xf32> to vector<1xf32>
      %431 = vector.shape_cast %430 : vector<1xf32> to vector<1x1xf32>
      %432 = tpu.reciprocal %431 {approx = true} : vector<1x1xf32> -> vector<1x1xf32>
      %433 = vector.broadcast %432 : vector<1x1xf32> to vector<1x8xf32>
      %434 = arith.mulf %429, %433 : vector<1x8xf32>
      %435 = vector.extract_strided_slice %419 {offsets = [0, 0], sizes = [8, 32], strides = [1, 1]} : vector<8x128xf32> to vector<8x32xf32>
      %cst_214 = arith.constant dense<0.000000e+00> : vector<1x32xf32>
      %436 = tpu.matmul %434, %435, %cst_214 {dimension_numbers = #tpu.dot_dimension_numbers<[1], [0], [0], [1], [0, 0, 1, 1], [], []>} : vector<1x8xf32>, vector<8x32xf32>, vector<1x32xf32> -> vector<1x32xf32>
      %437 = vector.extract_strided_slice %417 {offsets = [0, 32], sizes = [1, 32], strides = [1, 1]} : vector<1x128xf32> to vector<1x32xf32>
      %438 = vector.extract_strided_slice %418 {offsets = [0, 32], sizes = [8, 32], strides = [1, 1]} : vector<8x128xf32> to vector<8x32xf32>
      "tpu.trace_start"() <{level = 10 : i32, message = "qd,kd->qk"}> : () -> ()
      %cst_215 = arith.constant dense<0.000000e+00> : vector<1x8xf32>
      %439 = tpu.matmul %437, %438, %cst_215 {dimension_numbers = #tpu.dot_dimension_numbers<[1], [1], [0], [0], [0, 0, 1, 0], [], []>} : vector<1x32xf32>, vector<8x32xf32>, vector<1x8xf32> -> vector<1x8xf32>
      "tpu.trace_stop"() : () -> ()
      %cst_216 = arith.constant 0.176776692 : f32
      %440 = vector.broadcast %cst_216 : f32 to vector<1x8xf32>
      %441 = arith.mulf %439, %440 : vector<1x8xf32>
      %cst_217 = arith.constant dense<0xFF800000> : vector<1xf32>
      %442 = vector.multi_reduction <maximumf>, %441, %cst_217 [1] : vector<1x8xf32> to vector<1xf32>
      %443 = vector.shape_cast %442 : vector<1xf32> to vector<1x1xf32>
      %444 = vector.broadcast %443 : vector<1x1xf32> to vector<1x8xf32>
      %445 = arith.subf %441, %444 : vector<1x8xf32>
      %446 = math.exp %445 : vector<1x8xf32>
      %cst_218 = arith.constant dense<0.000000e+00> : vector<1xf32>
      %447 = vector.multi_reduction <add>, %446, %cst_218 [1] : vector<1x8xf32> to vector<1xf32>
      %448 = vector.shape_cast %447 : vector<1xf32> to vector<1x1xf32>
      %449 = tpu.reciprocal %448 {approx = true} : vector<1x1xf32> -> vector<1x1xf32>
      %450 = vector.broadcast %449 : vector<1x1xf32> to vector<1x8xf32>
      %451 = arith.mulf %446, %450 : vector<1x8xf32>
      %452 = vector.extract_strided_slice %419 {offsets = [0, 32], sizes = [8, 32], strides = [1, 1]} : vector<8x128xf32> to vector<8x32xf32>
      %cst_219 = arith.constant dense<0.000000e+00> : vector<1x32xf32>
      %453 = tpu.matmul %451, %452, %cst_219 {dimension_numbers = #tpu.dot_dimension_numbers<[1], [0], [0], [1], [0, 0, 1, 1], [], []>} : vector<1x8xf32>, vector<8x32xf32>, vector<1x32xf32> -> vector<1x32xf32>
      %454 = vector.extract_strided_slice %417 {offsets = [0, 64], sizes = [1, 32], strides = [1, 1]} : vector<1x128xf32> to vector<1x32xf32>
      %455 = vector.extract_strided_slice %418 {offsets = [0, 64], sizes = [8, 32], strides = [1, 1]} : vector<8x128xf32> to vector<8x32xf32>
      "tpu.trace_start"() <{level = 10 : i32, message = "qd,kd->qk"}> : () -> ()
      %cst_220 = arith.constant dense<0.000000e+00> : vector<1x8xf32>
      %456 = tpu.matmul %454, %455, %cst_220 {dimension_numbers = #tpu.dot_dimension_numbers<[1], [1], [0], [0], [0, 0, 1, 0], [], []>} : vector<1x32xf32>, vector<8x32xf32>, vector<1x8xf32> -> vector<1x8xf32>
      "tpu.trace_stop"() : () -> ()
      %cst_221 = arith.constant 0.176776692 : f32
      %457 = vector.broadcast %cst_221 : f32 to vector<1x8xf32>
      %458 = arith.mulf %456, %457 : vector<1x8xf32>
      %cst_222 = arith.constant dense<0xFF800000> : vector<1xf32>
      %459 = vector.multi_reduction <maximumf>, %458, %cst_222 [1] : vector<1x8xf32> to vector<1xf32>
      %460 = vector.shape_cast %459 : vector<1xf32> to vector<1x1xf32>
      %461 = vector.broadcast %460 : vector<1x1xf32> to vector<1x8xf32>
      %462 = arith.subf %458, %461 : vector<1x8xf32>
      %463 = math.exp %462 : vector<1x8xf32>
      %cst_223 = arith.constant dense<0.000000e+00> : vector<1xf32>
      %464 = vector.multi_reduction <add>, %463, %cst_223 [1] : vector<1x8xf32> to vector<1xf32>
      %465 = vector.shape_cast %464 : vector<1xf32> to vector<1x1xf32>
      %466 = tpu.reciprocal %465 {approx = true} : vector<1x1xf32> -> vector<1x1xf32>
      %467 = vector.broadcast %466 : vector<1x1xf32> to vector<1x8xf32>
      %468 = arith.mulf %463, %467 : vector<1x8xf32>
      %469 = vector.extract_strided_slice %419 {offsets = [0, 64], sizes = [8, 32], strides = [1, 1]} : vector<8x128xf32> to vector<8x32xf32>
      %cst_224 = arith.constant dense<0.000000e+00> : vector<1x32xf32>
      %470 = tpu.matmul %468, %469, %cst_224 {dimension_numbers = #tpu.dot_dimension_numbers<[1], [0], [0], [1], [0, 0, 1, 1], [], []>} : vector<1x8xf32>, vector<8x32xf32>, vector<1x32xf32> -> vector<1x32xf32>
      %471 = vector.extract_strided_slice %417 {offsets = [0, 96], sizes = [1, 32], strides = [1, 1]} : vector<1x128xf32> to vector<1x32xf32>
      %472 = vector.extract_strided_slice %418 {offsets = [0, 96], sizes = [8, 32], strides = [1, 1]} : vector<8x128xf32> to vector<8x32xf32>
      "tpu.trace_start"() <{level = 10 : i32, message = "qd,kd->qk"}> : () -> ()
      %cst_225 = arith.constant dense<0.000000e+00> : vector<1x8xf32>
      %473 = tpu.matmul %471, %472, %cst_225 {dimension_numbers = #tpu.dot_dimension_numbers<[1], [1], [0], [0], [0, 0, 1, 0], [], []>} : vector<1x32xf32>, vector<8x32xf32>, vector<1x8xf32> -> vector<1x8xf32>
      "tpu.trace_stop"() : () -> ()
      %cst_226 = arith.constant 0.176776692 : f32
      %474 = vector.broadcast %cst_226 : f32 to vector<1x8xf32>
      %475 = arith.mulf %473, %474 : vector<1x8xf32>
      %cst_227 = arith.constant dense<0xFF800000> : vector<1xf32>
      %476 = vector.multi_reduction <maximumf>, %475, %cst_227 [1] : vector<1x8xf32> to vector<1xf32>
      %477 = vector.shape_cast %476 : vector<1xf32> to vector<1x1xf32>
      %478 = vector.broadcast %477 : vector<1x1xf32> to vector<1x8xf32>
      %479 = arith.subf %475, %478 : vector<1x8xf32>
      %480 = math.exp %479 : vector<1x8xf32>
      %cst_228 = arith.constant dense<0.000000e+00> : vector<1xf32>
      %481 = vector.multi_reduction <add>, %480, %cst_228 [1] : vector<1x8xf32> to vector<1xf32>
      %482 = vector.shape_cast %481 : vector<1xf32> to vector<1x1xf32>
      %483 = tpu.reciprocal %482 {approx = true} : vector<1x1xf32> -> vector<1x1xf32>
      %484 = vector.broadcast %483 : vector<1x1xf32> to vector<1x8xf32>
      %485 = arith.mulf %480, %484 : vector<1x8xf32>
      %486 = vector.extract_strided_slice %419 {offsets = [0, 96], sizes = [8, 32], strides = [1, 1]} : vector<8x128xf32> to vector<8x32xf32>
      %cst_229 = arith.constant dense<0.000000e+00> : vector<1x32xf32>
      %487 = tpu.matmul %485, %486, %cst_229 {dimension_numbers = #tpu.dot_dimension_numbers<[1], [0], [0], [1], [0, 0, 1, 1], [], []>} : vector<1x8xf32>, vector<8x32xf32>, vector<1x32xf32> -> vector<1x32xf32>
      %488 = tpu.concatenate %436, %453, %470, %487 in 1 : vector<1x32xf32>, vector<1x32xf32>, vector<1x32xf32>, vector<1x32xf32> -> vector<1x128xf32>
      %c0_230 = arith.constant 0 : index
      %c0_231 = arith.constant 0 : index
      %489 = vector.load %arg31[%c0_230, %c0_231] : memref<128x128xbf16, #tpu.memory_space<vmem>>, vector<128x128xbf16>
      %490 = arith.truncf %488 : vector<1x128xf32> to vector<1x128xbf16>
      %cst_232 = arith.constant dense<0.000000e+00> : vector<1x128xf32>
      %491 = tpu.matmul %490, %489, %cst_232 {dimension_numbers = #tpu.dot_dimension_numbers<[1], [0], [0], [1], [0, 0, 1, 1], [], []>} : vector<1x128xbf16>, vector<128x128xbf16>, vector<1x128xf32> -> vector<1x128xf32>
      %c0_233 = arith.constant 0 : index
      %c0_234 = arith.constant 0 : index
      %492 = vector.load %arg32[%c0_233, %c0_234] : memref<1x128xf32, #tpu.memory_space<vmem>>, vector<1x128xf32>
      %493 = arith.addf %491, %492 : vector<1x128xf32>
      %494 = arith.addf %390, %493 : vector<1x128xf32>
      %cst_235 = arith.constant dense<0.000000e+00> : vector<1xf32>
      %495 = vector.multi_reduction <add>, %494, %cst_235 [1] : vector<1x128xf32> to vector<1xf32>
      %496 = vector.shape_cast %495 : vector<1xf32> to vector<1x1xf32>
      %cst_236 = arith.constant 1.280000e+02 : f32
      %497 = vector.broadcast %cst_236 : f32 to vector<1x1xf32>
      %498 = arith.divf %496, %497 : vector<1x1xf32>
      %499 = vector.broadcast %498 : vector<1x1xf32> to vector<1x128xf32>
      %500 = arith.subf %494, %499 : vector<1x128xf32>
      %501 = arith.mulf %500, %500 : vector<1x128xf32>
      %cst_237 = arith.constant dense<0.000000e+00> : vector<1xf32>
      %502 = vector.multi_reduction <add>, %501, %cst_237 [1] : vector<1x128xf32> to vector<1xf32>
      %503 = vector.shape_cast %502 : vector<1xf32> to vector<1x1xf32>
      %cst_238 = arith.constant 1.280000e+02 : f32
      %504 = vector.broadcast %cst_238 : f32 to vector<1x1xf32>
      %505 = arith.divf %503, %504 : vector<1x1xf32>
      %506 = vector.broadcast %498 : vector<1x1xf32> to vector<1x128xf32>
      %507 = arith.subf %494, %506 : vector<1x128xf32>
      %cst_239 = arith.constant 9.99999974E-6 : f32
      %508 = vector.broadcast %cst_239 : f32 to vector<1x1xf32>
      %509 = arith.addf %505, %508 : vector<1x1xf32>
      %510 = math.rsqrt %509 : vector<1x1xf32>
      %511 = vector.broadcast %510 : vector<1x1xf32> to vector<1x128xf32>
      %512 = arith.mulf %507, %511 : vector<1x128xf32>
      %c0_240 = arith.constant 0 : index
      %c0_241 = arith.constant 0 : index
      %513 = vector.load %arg33[%c0_240, %c0_241] : memref<1x128xf32, #tpu.memory_space<vmem>>, vector<1x128xf32>
      %514 = arith.mulf %512, %513 : vector<1x128xf32>
      %c0_242 = arith.constant 0 : index
      %c0_243 = arith.constant 0 : index
      %515 = vector.load %arg34[%c0_242, %c0_243] : memref<1x128xf32, #tpu.memory_space<vmem>>, vector<1x128xf32>
      %516 = arith.addf %514, %515 : vector<1x128xf32>
      %c0_244 = arith.constant 0 : index
      %c0_245 = arith.constant 0 : index
      %517 = vector.load %arg35[%c0_244, %c0_245] : memref<128x256xbf16, #tpu.memory_space<vmem>>, vector<128x256xbf16>
      %518 = arith.truncf %516 : vector<1x128xf32> to vector<1x128xbf16>
      %cst_246 = arith.constant dense<0.000000e+00> : vector<1x256xf32>
      %519 = tpu.matmul %518, %517, %cst_246 {dimension_numbers = #tpu.dot_dimension_numbers<[1], [0], [0], [1], [0, 0, 1, 1], [], []>} : vector<1x128xbf16>, vector<128x256xbf16>, vector<1x256xf32> -> vector<1x256xf32>
      %c0_247 = arith.constant 0 : index
      %c0_248 = arith.constant 0 : index
      %520 = vector.load %arg36[%c0_247, %c0_248] : memref<1x256xf32, #tpu.memory_space<vmem>>, vector<1x256xf32>
      %521 = arith.addf %519, %520 : vector<1x256xf32>
      %cst_249 = arith.constant 0.000000e+00 : f32
      %522 = vector.broadcast %cst_249 : f32 to vector<1x256xf32>
      %523 = arith.maximumf %521, %522 : vector<1x256xf32>
      %c0_250 = arith.constant 0 : index
      %c0_251 = arith.constant 0 : index
      %524 = vector.load %arg37[%c0_250, %c0_251] : memref<256x128xbf16, #tpu.memory_space<vmem>>, vector<256x128xbf16>
      %525 = arith.truncf %523 : vector<1x256xf32> to vector<1x256xbf16>
      %cst_252 = arith.constant dense<0.000000e+00> : vector<1x128xf32>
      %526 = tpu.matmul %525, %524, %cst_252 {dimension_numbers = #tpu.dot_dimension_numbers<[1], [0], [0], [1], [0, 0, 1, 1], [], []>} : vector<1x256xbf16>, vector<256x128xbf16>, vector<1x128xf32> -> vector<1x128xf32>
      %c0_253 = arith.constant 0 : index
      %c0_254 = arith.constant 0 : index
      %527 = vector.load %arg38[%c0_253, %c0_254] : memref<1x128xf32, #tpu.memory_space<vmem>>, vector<1x128xf32>
      %528 = arith.addf %526, %527 : vector<1x128xf32>
      %529 = arith.addf %494, %528 : vector<1x128xf32>
      %cst_255 = arith.constant dense<0.000000e+00> : vector<1xf32>
      %530 = vector.multi_reduction <add>, %529, %cst_255 [1] : vector<1x128xf32> to vector<1xf32>
      %531 = vector.shape_cast %530 : vector<1xf32> to vector<1x1xf32>
      %cst_256 = arith.constant 1.280000e+02 : f32
      %532 = vector.broadcast %cst_256 : f32 to vector<1x1xf32>
      %533 = arith.divf %531, %532 : vector<1x1xf32>
      %534 = vector.broadcast %533 : vector<1x1xf32> to vector<1x128xf32>
      %535 = arith.subf %529, %534 : vector<1x128xf32>
      %536 = arith.mulf %535, %535 : vector<1x128xf32>
      %cst_257 = arith.constant dense<0.000000e+00> : vector<1xf32>
      %537 = vector.multi_reduction <add>, %536, %cst_257 [1] : vector<1x128xf32> to vector<1xf32>
      %538 = vector.shape_cast %537 : vector<1xf32> to vector<1x1xf32>
      %cst_258 = arith.constant 1.280000e+02 : f32
      %539 = vector.broadcast %cst_258 : f32 to vector<1x1xf32>
      %540 = arith.divf %538, %539 : vector<1x1xf32>
      %541 = vector.broadcast %533 : vector<1x1xf32> to vector<1x128xf32>
      %542 = arith.subf %529, %541 : vector<1x128xf32>
      %cst_259 = arith.constant 9.99999974E-6 : f32
      %543 = vector.broadcast %cst_259 : f32 to vector<1x1xf32>
      %544 = arith.addf %540, %543 : vector<1x1xf32>
      %545 = math.rsqrt %544 : vector<1x1xf32>
      %546 = vector.broadcast %545 : vector<1x1xf32> to vector<1x128xf32>
      %547 = arith.mulf %542, %546 : vector<1x128xf32>
      %c0_260 = arith.constant 0 : index
      %c0_261 = arith.constant 0 : index
      %548 = vector.load %arg39[%c0_260, %c0_261] : memref<1x128xf32, #tpu.memory_space<vmem>>, vector<1x128xf32>
      %549 = arith.mulf %547, %548 : vector<1x128xf32>
      %c0_262 = arith.constant 0 : index
      %c0_263 = arith.constant 0 : index
      %550 = vector.load %arg40[%c0_262, %c0_263] : memref<1x128xf32, #tpu.memory_space<vmem>>, vector<1x128xf32>
      %551 = arith.addf %549, %550 : vector<1x128xf32>
      %c0_264 = arith.constant 0 : index
      %c0_265 = arith.constant 0 : index
      %552 = vector.load %arg41[%c0_264, %c0_265] : memref<128x256xbf16, #tpu.memory_space<vmem>>, vector<128x256xbf16>
      %553 = arith.truncf %551 : vector<1x128xf32> to vector<1x128xbf16>
      %cst_266 = arith.constant dense<0.000000e+00> : vector<1x256xf32>
      %554 = tpu.matmul %553, %552, %cst_266 {dimension_numbers = #tpu.dot_dimension_numbers<[1], [0], [0], [1], [0, 0, 1, 1], [], []>} : vector<1x128xbf16>, vector<128x256xbf16>, vector<1x256xf32> -> vector<1x256xf32>
      %c0_267 = arith.constant 0 : index
      %c0_268 = arith.constant 0 : index
      %555 = vector.load %arg42[%c0_267, %c0_268] : memref<1x256xf32, #tpu.memory_space<vmem>>, vector<1x256xf32>
      %556 = arith.addf %554, %555 : vector<1x256xf32>
      %557 = tpu.iota {dimensions = array<i32: 1>} : vector<1x256xi32>
      %cst_269 = arith.constant dense<0xFF800000> : vector<1xf32>
      %558 = vector.multi_reduction <maximumf>, %556, %cst_269 [1] : vector<1x256xf32> to vector<1xf32>
      %559 = vector.shape_cast %558 : vector<1xf32> to vector<1x1xf32>
      %560 = vector.broadcast %559 : vector<1x1xf32> to vector<1x256xf32>
      %561 = arith.cmpf oeq, %556, %560 : vector<1x256xf32>
      %c256_i32 = arith.constant 256 : i32
      %562 = vector.broadcast %c256_i32 : i32 to vector<1x256xi32>
      %563 = arith.select %561, %557, %562 : vector<1x256xi1>, vector<1x256xi32>
      %cst_270 = arith.constant dense<2147483647> : vector<1xi32>
      %564 = vector.multi_reduction <minsi>, %563, %cst_270 [1] : vector<1x256xi32> to vector<1xi32>
      %565 = vector.shape_cast %564 : vector<1xi32> to vector<1x1xi32>
      %c1_i32_271 = arith.constant 1 : i32
      %566 = arith.cmpi sge, %255, %c1_i32_271 : i32
      %567 = arith.extui %566 : i1 to i32
      %c0_i32_272 = arith.constant 0 : i32
      %568 = arith.cmpi ne, %567, %c0_i32_272 : i32
      scf.if %568 {
        %c1_i32_273 = arith.constant 1 : i32
        %569 = arith.addi %255, %c1_i32_273 : i32
        %570 = arith.index_cast %569 : i32 to index
        %c0_274 = arith.constant 0 : index
        %571 = vector.load %arg43[%570, %c0_274] : memref<8x1xi32, #tpu.memory_space<vmem>>, vector<1x1xi32>
        tpu.vector_store %arg43[%570, %c0_274], %565 {strides = array<i32>} : memref<8x1xi32, #tpu.memory_space<vmem>>, vector<1x1xi32>,
      } else {
      }
    }
    %c7_i32_136 = arith.constant 7 : i32
    return
  }
}

</mosaic_0001>

<bundles_post_ra>
// kernel: translate_tokens.1
= control target key start
LH: loop header
LB: loop body
LE: loop exit
PB: predicated region body
PF: predicated region fallthrough
CT: control target
= control target key end

     0   :  { %s5277_s6 = smov 1   ;;  %s5278_s10 = smov 2   ;;  %s6018_s0 = inlined_call_operand.smem [shape: u32[44], index: -1, kind: input, shape index: {}] }
   0x1   :  { %s5372_s5 = sld [smem:[%s6018_s0]]   ;;  %s5279_s14 = smov 3  }
   0x2   :  { %s5377_s9 = sld [smem:[%s6018_s0 + %s5277_s6]]   ;;  %s5280_s18 = smov 4  }
   0x3   :  { %s5382_s13 = sld [smem:[%s6018_s0 + %s5278_s10]]   ;;  %s5281_s22 = smov 5  }
   0x4   :  { %s5387_s17 = sld [smem:[%s6018_s0 + %s5279_s14]]   ;;  %s5282_s26 = smov 6  }
   0x5   :  { %s5392_s21 = sld [smem:[%s6018_s0 + %s5280_s18]]   ;;  %s5283_s30 = smov 7  }
   0x6   :  { %s5397_s25 = sld [smem:[%s6018_s0 + %s5281_s22]]   ;;  %s5284_s4 = smov 8  }
   0x7   :  { %s5402_s29 = sld [smem:[%s6018_s0 + %s5282_s26]]   ;;  %s5285_s10 = smov 9  }
   0x8   :  { %6032 = sst [smem:[#allocation65_spill]] %s5377_s9  ;;  %s5286_s15 = smov 10  }
   0x9   :  { %s5407_s3 = sld [smem:[%s6018_s0 + %s5283_s30]]   ;;  %s5287_s20 = smov 11  }
   0xa   :  { %6033 = sst [smem:[#allocation66_spill]] %s5387_s17  ;;  %s5288_s26 = smov 12  }
   0xb   :  { %6034 = sst [smem:[#allocation67_spill]] %s5392_s21  ;;  %s5289_s1 = smov 13  }
   0xc   :  { %6035 = sst [smem:[#allocation68_spill]] %s5397_s25  ;;  %s5290_s7 = smov 14  }
   0xd   :  { %6036 = sst [smem:[#allocation69_spill]] %s5402_s29  ;;  %s5292_s22 = smov 16  }
   0xe   :  { %s5412_s8 = sld [smem:[%s6018_s0 + %s5284_s4]]   ;;  %s5293_s28 = smov 17  }
   0xf   :  { %s5417_s14 = sld [smem:[%s6018_s0 + %s5285_s10]]  }
  0x10   :  { %s5422_s19 = sld [smem:[%s6018_s0 + %s5286_s15]]   ;;  %s5291_s15 = smov 15  }
  0x11   :  { %s5427_s24 = sld [smem:[%s6018_s0 + %s5287_s20]]  }
  0x12   :  { %s5432_s30 = sld [smem:[%s6018_s0 + %s5288_s26]]  }
  0x13   :  { %s5437_s6 = sld [smem:[%s6018_s0 + %s5289_s1]]  }
  0x14   :  { %6037 = sst [smem:[#allocation70_spill]] %s5412_s8 }
  0x15   :  { %6038 = sst [smem:[#allocation71_spill]] %s5417_s14 }
  0x16   :  { %6039 = sst [smem:[#allocation72_spill]] %s5422_s19 }
  0x17   :  { %6040 = sst [smem:[#allocation73_spill]] %s5427_s24 }
  0x18   :  { %6041 = sst [smem:[#allocation74_spill]] %s5432_s30 }
  0x19   :  { %s5442_s12 = sld [smem:[%s6018_s0 + %s5290_s7]]   ;;  %s5294_s7 = smov 18  }
  0x1a   :  { %s5447_s20 = sld [smem:[%s6018_s0 + %s5291_s15]]   ;;  %s5295_s15 = smov 19  }
  0x1b   :  { %s5452_s27 = sld [smem:[%s6018_s0 + %s5292_s22]]   ;;  %s5296_s22 = smov 20  }
  0x1c   :  { %s5457_s4 = sld [smem:[%s6018_s0 + %s5293_s28]]   ;;  %s5297_s28 = smov 21  }
  0x1d   :  { %s5462_s21 = sld [smem:[%s6018_s0 + %s5294_s7]]   ;;  %s5298_s7 = smov 22  }
  0x1e   :  { %s5467_s9 = sld [smem:[%s6018_s0 + %s5295_s15]]   ;;  %s5299_s15 = smov 23  }
  0x1f   :  { %6042 = sst [smem:[#allocation75_spill]] %s5442_s12 }
  0x20   :  { %6043 = sst [smem:[#allocation76_spill]] %s5447_s20 }
  0x21   :  { %6044 = sst [smem:[#allocation77_spill]] %s5452_s27 }
  0x22   :  { %6045 = sst [smem:[#allocation78_spill]] %s5457_s4 }
  0x23   :  { %6046 = sst [smem:[#allocation79_spill]] %s5462_s21 }
  0x24   :  { %s5472_s27 = sld [smem:[%s6018_s0 + %s5296_s22]]   ;;  %s5300_s22 = smov 24  }
  0x25   :  { %s5477_s4 = sld [smem:[%s6018_s0 + %s5297_s28]]   ;;  %s5301_s28 = smov 25  }
  0x26   :  { %s5482_s21 = sld [smem:[%s6018_s0 + %s5298_s7]]   ;;  %s5302_s7 = smov 26  }
  0x27   :  { %s5487_s12 = sld [smem:[%s6018_s0 + %s5299_s15]]   ;;  %s5303_s15 = smov 27  }
  0x28   :  { %s5492_s30 = sld [smem:[%s6018_s0 + %s5300_s22]]   ;;  %s5304_s22 = smov 28  }
  0x29   :  { %s5497_s24 = sld [smem:[%s6018_s0 + %s5301_s28]]   ;;  %s5305_s28 = smov 29  }
  0x2a   :  { %6047 = sst [smem:[#allocation80_spill]] %s5472_s27 }
  0x2b   :  { %s5507_s19 = sld [smem:[%s6018_s0 + %s5303_s15]]   ;;  %s5307_s15 = smov 31  }
  0x2c   :  { %6048 = sst [smem:[#allocation81_spill]] %s5482_s21 }
  0x2d   :  { %6049 = sst [smem:[#allocation82_spill]] %s5487_s12 }
  0x2e   :  { %s5502_s21 = sld [smem:[%s6018_s0 + %s5302_s7]]   ;;  %s5306_s7 = smov 30  }
  0x2f   :  { %6050 = sst [smem:[#allocation83_spill]] %s5497_s24 }
  0x30   :  { %s5512_s8 = sld [smem:[%s6018_s0 + %s5304_s22]]   ;;  %s5308_s22 = smov 32  }
  0x31   :  { %6051 = sst [smem:[#allocation84_spill]] %s5507_s19 }
  0x32   :  { %s5517_s29 = sld [smem:[%s6018_s0 + %s5305_s28]]   ;;  %s5309_s28 = smov 33  }
  0x33   :  { %s5522_s25 = sld [smem:[%s6018_s0 + %s5306_s7]]   ;;  %s5310_s7 = smov 34  }
  0x34   :  { %s5527_s17 = sld [smem:[%s6018_s0 + %s5307_s15]]   ;;  %s5311_s15 = smov 35  }
  0x35   :  { %s5532_s19 = sld [smem:[%s6018_s0 + %s5308_s22]]   ;;  %s5312_s22 = smov 36  }
  0x36   :  { %s5542_s24 = sld [smem:[%s6018_s0 + %s5310_s7]]   ;;  %s5314_s7 = smov 38  }
  0x37   :  { %s5552_s12 = sld [smem:[%s6018_s0 + %s5312_s22]]   ;;  %s5316_s22 = smov 40  }
  0x38   :  { %6052 = sst [smem:[#allocation85_spill]] %s5517_s29 }
  0x39   :  { %s5537_s29 = sld [smem:[%s6018_s0 + %s5309_s28]]   ;;  %s5313_s28 = smov 37  }
  0x3a   :  { %6053 = sst [smem:[#allocation86_spill]] %s5527_s17 }
  0x3b   :  { %s5547_s17 = sld [smem:[%s6018_s0 + %s5311_s15]]   ;;  %s5315_s15 = smov 39  }
  0x3c   :  { %s5562_s27 = sld [smem:[%s6018_s0 + %s5314_s7]]   ;;  %s5318_s7 = smov 42  }
  0x3d   :  { %s5572_s20 = sld [smem:[%s6018_s0 + %s5316_s22]]  }
  0x3e   :  { %s5582_s14 = sld [smem:[%s6018_s0 + %s5318_s7]]  }
  0x3f   :  { %6054 = sst [smem:[#allocation87_spill]] %s5537_s29 }
  0x40   :  { %s5557_s29 = sld [smem:[%s6018_s0 + %s5313_s28]]   ;;  %s5317_s28 = smov 41  }
  0x41   :  { %6055 = sst [smem:[#allocation88_spill]] %s5547_s17 }
  0x42   :  { %s5567_s17 = sld [smem:[%s6018_s0 + %s5315_s15]]   ;;  %s5319_s15 = smov 43  }
  0x46   :  { %6056 = sst [smem:[#allocation89_spill]] %s5557_s29 }
  0x47   :  { %s5577_s29 = sld [smem:[%s6018_s0 + %s5317_s28]]  }
  0x48   :  { %6057 = sst [smem:[#allocation90_spill]] %s5567_s17 }
  0x49   :  { %s5587_s17 = sld [smem:[%s6018_s0 + %s5319_s15]]  }
  0x4a   :  { %92 = vsyncpa [#allocation9], 0 }
  0x4b   :  { %93 = vsyncpa [#allocation8], 0 }
  0x4c   :  { %94 = vsyncpa [#allocation12], 0 }
  0x4d   :  { %95 = vsyncpa [#allocation15], 0 }
  0x4e   :  { %96 = vsyncpa [#allocation18], 0 }
  0x4f   :  { %97 = vsyncpa [#allocation21], 0 }
  0x50   :  { %98 = vsyncpa [#allocation24], 0 }
  0x51   :  { %99 = vsyncpa [#allocation27], 0 }
  0x52   :  { %100 = vsyncpa [#allocation30], 0 }
  0x53   :  { %101 = vsyncpa [#allocation33], 0 }
  0x54   :  { %102 = vsyncpa [#allocation36], 0 }
  0x55   :  { %103 = vsyncpa [#allocation39], 0 }
  0x56   :  { %104 = vsyncpa [#allocation42], 0 }
  0x57   :  { %105 = vsyncpa [#allocation45], 0  ;;  %s143_s22 = sshll.u32 %s5407_s3, 4  ;;  %s144_s22 = int_to_ptr.hbm [resolvable:$true] %s143_s22 }
  0x58   :  { %106 = vsyncpa [#allocation48], 0  ;;  %s5320_s0 = smov [#allocation11]   ;;  %s4579_s26 = sshra.s32 %s144_s22, 4  ;;  %s4580_s26 = int_to_ptr.hbm [resolvable:$true] %s4579_s26 }
  0x59   :  { %s145_s23 = sshll.u32 %s5320_s0, 4  ;;  %s4581_s28 = scalar_lea.hbm %s4580_s26, 192  ;;  %s146_s23 = int_to_ptr.vmem [resolvable:$true] %s145_s23 }
  0x5a   :  { %p4582_p0 = scmp.ne.s32.totalorder %s4580_s26, %s4581_s28  ;;  %s4583_s1 = scalar_lea.hbm %s5407_s3, 192 }
  0x5b   :  { %p4584_p1 = scmp.lt.s32.totalorder %s4580_s26, %s5407_s3  ;;  %p4585_p2 = scmp.lt.s32.totalorder %s4583_s1, %s4581_s28 }
  0x5d   :  { %p4586_p3 = por %p4585_p2, %p4584_p1 }
  0x5f   :  { %p4587_p4 = pnand %p4586_p3, %p4582_p0 }
  0x61   :  { %4590 = shalt.err (!%p4587_p4)
}
  0x62   :  { %s5321_s2 = smov 192   ;;  %s5322_s7 = smov 12  }
  0x63   :  { %151 = dma.hbm_to_vmem [thread:$0]  %s144_s22, 3072, %s146_s23, [#allocation12], %s5321_s2, %s5321_s2, %s5322_s7  }
  0x64   :  { %s177_s10 = sshll.u32 %s5437_s6, 4  ;;  %s5323_s11 = smov [#allocation14]   ;;  %s178_s10 = int_to_ptr.hbm [resolvable:$true] %s177_s10 }
  0x65   :  { %s179_s15 = sshll.u32 %s5323_s11, 4  ;;  %s212_s16 = sshll.u32 %s5467_s9, 4  ;;  %s180_s15 = int_to_ptr.vmem [resolvable:$true] %s179_s15  ;;  %s5597_s16 = int_to_ptr.hbm [resolvable:$true] %s212_s16 }
  0x66   :  { %s4603_s3 = sshra.s32 %s178_s10, 4  ;;  %s4607_s0 = scalar_lea.hbm %s5437_s6, 128  ;;  %s4604_s3 = int_to_ptr.hbm [resolvable:$true] %s4603_s3 }
  0x67   :  { %s4605_s18 = scalar_lea.hbm %s4604_s3, 128  ;;  %p4608_p6 = scmp.lt.s32.totalorder %s4604_s3, %s5437_s6 }
  0x68   :  { %p4606_p5 = scmp.ne.s32.totalorder %s4604_s3, %s4605_s18  ;;  %p4609_p7 = scmp.lt.s32.totalorder %s4607_s0, %s4605_s18 }
  0x6a   :  { %p4610_p8 = por %p4609_p7, %p4608_p6 }
  0x6c   :  { %p4611_p9 = pnand %p4610_p8, %p4606_p5 }
  0x6e   :  { %4614 = shalt.err (!%p4611_p9)
}
  0x6f   :  { %s5324_s26 = smov 128   ;;  %s5325_s22 = smov 8  }
  0x70   :  { %185 = dma.hbm_to_vmem [thread:$0]  %s178_s10, 2048, %s180_s15, [#allocation15], %s5324_s26, %s5324_s26, %s5325_s22  }
  0x71   :  { %s233_s23 = sshll.u32 %s5477_s4, 4  ;;  %s5326_s28 = smov [#allocation17]   ;;  %s5605_s23 = int_to_ptr.hbm [resolvable:$true] %s233_s23 }
  0x72   :  { %s214_s1 = sshll.u32 %s5326_s28, 4  ;;  %s4627_s6 = sshra.s32 %s5597_s16, 4  ;;  %s215_s1 = int_to_ptr.vmem [resolvable:$true] %s214_s1  ;;  %s4628_s6 = int_to_ptr.hbm [resolvable:$true] %s4627_s6 }
  0x73   :  { %s4629_s11 = scalar_lea.hbm %s4628_s6, 1  ;;  %s4631_s3 = scalar_lea.hbm %s5467_s9, 1 }
  0x74   :  { %p4630_p10 = scmp.ne.s32.totalorder %s4628_s6, %s4629_s11  ;;  %p4632_p11 = scmp.lt.s32.totalorder %s4628_s6, %s5467_s9 }
  0x75   :  { %p4633_p12 = scmp.lt.s32.totalorder %s4631_s3, %s4629_s11 }
  0x77   :  { %p4634_p13 = por %p4633_p12, %p4632_p11 }
  0x79   :  { %p4635_p0 = pnand %p4634_p13, %p4630_p10 }
  0x7b   :  { %4638 = shalt.err (!%p4635_p0)
}
  0x7c   :  { %217 = dma.hbm_to_vmem [thread:$0]  %s5597_s16, 16, %s215_s1, [#allocation18]  }
  0x7d   :  { %s5327_s10 = smov [#allocation20]   ;;  %s262_s18 = sshll.u32 %s5492_s30, 4  ;;  %s263_s18 = int_to_ptr.hbm [resolvable:$true] %s262_s18 }
  0x7e   :  { %s235_s15 = sshll.u32 %s5327_s10, 4  ;;  %s4651_s0 = sshra.s32 %s5605_s23, 4  ;;  %s236_s15 = int_to_ptr.vmem [resolvable:$true] %s235_s15  ;;  %s4652_s0 = int_to_ptr.hbm [resolvable:$true] %s4651_s0 }
  0x7f   :  { %s4653_s28 = scalar_lea.hbm %s4652_s0, 192  ;;  %s4655_s9 = scalar_lea.hbm %s5477_s4, 192 }
  0x80   :  { %p4654_p1 = scmp.ne.s32.totalorder %s4652_s0, %s4653_s28  ;;  %p4656_p2 = scmp.lt.s32.totalorder %s4652_s0, %s5477_s4 }
  0x81   :  { %p4657_p3 = scmp.lt.s32.totalorder %s4655_s9, %s4653_s28 }
  0x83   :  { %p4658_p4 = por %p4657_p3, %p4656_p2 }
  0x85   :  { %p4659_p5 = pnand %p4658_p4, %p4654_p1 }
  0x87   :  { %4662 = shalt.err (!%p4659_p5)
}
  0x88   :  { %241 = dma.hbm_to_vmem [thread:$0]  %s5605_s23, 3072, %s236_s15, [#allocation21], %s5321_s2, %s5321_s2, %s5322_s7  }
  0x89   :  { %s284_s16 = sshll.u32 %s5502_s21, 4  ;;  %s5328_s1 = smov [#allocation23]   ;;  %s285_s16 = int_to_ptr.hbm [resolvable:$true] %s284_s16 }
  0x8a   :  { %s264_s6 = sshll.u32 %s5328_s1, 4  ;;  %s4675_s11 = sshra.s32 %s263_s18, 4  ;;  %s265_s6 = int_to_ptr.vmem [resolvable:$true] %s264_s6  ;;  %s4676_s11 = int_to_ptr.hbm [resolvable:$true] %s4675_s11 }
  0x8b   :  { %s4677_s4 = scalar_lea.hbm %s4676_s11, 1  ;;  %s4679_s3 = scalar_lea.hbm %s5492_s30, 1 }
  0x8c   :  { %p4678_p6 = scmp.ne.s32.totalorder %s4676_s11, %s4677_s4  ;;  %p4680_p7 = scmp.lt.s32.totalorder %s4676_s11, %s5492_s30 }
  0x8d   :  { %p4681_p8 = scmp.lt.s32.totalorder %s4679_s3, %s4677_s4 }
  0x8f   :  { %p4682_p9 = por %p4681_p8, %p4680_p7 }
  0x91   :  { %p4683_p10 = pnand %p4682_p9, %p4678_p6 }
  0x93   :  { %4686 = shalt.err (!%p4683_p10)
}
  0x94   :  { %267 = dma.hbm_to_vmem [thread:$0]  %s263_s18, 16, %s265_s6, [#allocation24]  }
  0x95   :  { %s5329_s2 = smov [#allocation26]   ;;  %s308_s23 = sshll.u32 %s5512_s8, 4  ;;  %s309_s23 = int_to_ptr.hbm [resolvable:$true] %s308_s23 }
  0x96   :  { %s286_s7 = sshll.u32 %s5329_s2, 4  ;;  %s4699_s10 = sshra.s32 %s285_s16, 4  ;;  %s287_s7 = int_to_ptr.vmem [resolvable:$true] %s286_s7  ;;  %s4700_s10 = int_to_ptr.hbm [resolvable:$true] %s4699_s10 }
  0x97   :  { %s4701_s15 = scalar_lea.hbm %s4700_s10, 1  ;;  %s4703_s0 = scalar_lea.hbm %s5502_s21, 1 }
  0x98   :  { %p4702_p11 = scmp.ne.s32.totalorder %s4700_s10, %s4701_s15  ;;  %p4704_p12 = scmp.lt.s32.totalorder %s4700_s10, %s5502_s21 }
  0x99   :  { %p4705_p13 = scmp.lt.s32.totalorder %s4703_s0, %s4701_s15 }
  0x9b   :  { %p4706_p0 = por %p4705_p13, %p4704_p12 }
  0x9d   :  { %p4707_p1 = pnand %p4706_p0, %p4702_p11 }
  0x9f   :  { %4710 = shalt.err (!%p4707_p1)
}
  0xa0   :  { %289 = dma.hbm_to_vmem [thread:$0]  %s285_s16, 16, %s287_s7, [#allocation27]  }
  0xa1   :  { %s332_s30 = sshll.u32 %s5522_s25, 4  ;;  %s5330_s18 = smov [#allocation29]   ;;  %s333_s30 = int_to_ptr.hbm [resolvable:$true] %s332_s30 }
  0xa2   :  { %s310_s28 = sshll.u32 %s5330_s18, 4  ;;  %s4723_s9 = sshra.s32 %s309_s23, 4  ;;  %s311_s28 = int_to_ptr.vmem [resolvable:$true] %s310_s28  ;;  %s4724_s9 = int_to_ptr.hbm [resolvable:$true] %s4723_s9 }
  0xa3   :  { %s4725_s1 = scalar_lea.hbm %s4724_s9, 1  ;;  %s4727_s6 = scalar_lea.hbm %s5512_s8, 1 }
  0xa4   :  { %p4726_p2 = scmp.ne.s32.totalorder %s4724_s9, %s4725_s1  ;;  %p4728_p3 = scmp.lt.s32.totalorder %s4724_s9, %s5512_s8 }
  0xa5   :  { %p4729_p4 = scmp.lt.s32.totalorder %s4727_s6, %s4725_s1 }
  0xa7   :  { %p4730_p5 = por %p4729_p4, %p4728_p3 }
  0xa9   :  { %p4731_p6 = pnand %p4730_p5, %p4726_p2 }
  0xab   :  { %4734 = shalt.err (!%p4731_p6)
}
  0xac   :  { %313 = dma.hbm_to_vmem [thread:$0]  %s309_s23, 16, %s311_s28, [#allocation30]  }
  0xad   :  { %s5331_s21 = smov [#allocation32]   ;;  %s356_s11 = sshll.u32 %s5532_s19, 4  ;;  %s357_s11 = int_to_ptr.hbm [resolvable:$true] %s356_s11 }
  0xae   :  { %s334_s16 = sshll.u32 %s5331_s21, 4  ;;  %s4747_s4 = sshra.s32 %s333_s30, 4  ;;  %s335_s16 = int_to_ptr.vmem [resolvable:$true] %s334_s16  ;;  %s4748_s4 = int_to_ptr.hbm [resolvable:$true] %s4747_s4 }
  0xaf   :  { %s4749_s3 = scalar_lea.hbm %s4748_s4, 2  ;;  %s4751_s2 = scalar_lea.hbm %s5522_s25, 2 }
  0xb0   :  { %p4750_p7 = scmp.ne.s32.totalorder %s4748_s4, %s4749_s3  ;;  %p4752_p8 = scmp.lt.s32.totalorder %s4748_s4, %s5522_s25 }
  0xb1   :  { %p4753_p9 = scmp.lt.s32.totalorder %s4751_s2, %s4749_s3 }
  0xb3   :  { %p4754_p10 = por %p4753_p9, %p4752_p8 }
  0xb5   :  { %p4755_p11 = pnand %p4754_p10, %p4750_p7 }
  0xb7   :  { %4758 = shalt.err (!%p4755_p11)
}
  0xb8   :  { %337 = dma.hbm_to_vmem [thread:$0]  %s333_s30, 32, %s335_s16, [#allocation33]  }
  0xb9   :  { %s378_s8 = sshll.u32 %s5542_s24, 4  ;;  %s5332_s7 = smov [#allocation35]   ;;  %s379_s8 = int_to_ptr.hbm [resolvable:$true] %s378_s8 }
  0xba   :  { %s358_s23 = sshll.u32 %s5332_s7, 4  ;;  %s4771_s10 = sshra.s32 %s357_s11, 4  ;;  %s359_s23 = int_to_ptr.vmem [resolvable:$true] %s358_s23  ;;  %s4772_s10 = int_to_ptr.hbm [resolvable:$true] %s4771_s10 }
  0xbb   :  { %s4773_s15 = scalar_lea.hbm %s4772_s10, 1  ;;  %s4775_s0 = scalar_lea.hbm %s5532_s19, 1 }
  0xbc   :  { %p4774_p12 = scmp.ne.s32.totalorder %s4772_s10, %s4773_s15  ;;  %p4776_p13 = scmp.lt.s32.totalorder %s4772_s10, %s5532_s19 }
  0xbd   :  { %p4777_p0 = scmp.lt.s32.totalorder %s4775_s0, %s4773_s15 }
  0xbf   :  { %p4778_p1 = por %p4777_p0, %p4776_p13 }
  0xc1   :  { %p4779_p2 = pnand %p4778_p1, %p4774_p12 }
  0xc3   :  { %4782 = shalt.err (!%p4779_p2)
}
  0xc4   :  { %361 = dma.hbm_to_vmem [thread:$0]  %s357_s11, 16, %s359_s23, [#allocation36]  }
  0xc5   :  { %s5333_s25 = smov [#allocation38]   ;;  %s402_s18 = sshll.u32 %s5552_s12, 4  ;;  %s403_s18 = int_to_ptr.hbm [resolvable:$true] %s402_s18 }
  0xc6   :  { %s380_s30 = sshll.u32 %s5333_s25, 4  ;;  %s4795_s28 = sshra.s32 %s379_s8, 4  ;;  %s381_s30 = int_to_ptr.vmem [resolvable:$true] %s380_s30  ;;  %s4796_s28 = int_to_ptr.hbm [resolvable:$true] %s4795_s28 }
  0xc7   :  { %s4797_s9 = scalar_lea.hbm %s4796_s28, 1  ;;  %s4799_s1 = scalar_lea.hbm %s5542_s24, 1 }
  0xc8   :  { %p4798_p3 = scmp.ne.s32.totalorder %s4796_s28, %s4797_s9  ;;  %p4800_p4 = scmp.lt.s32.totalorder %s4796_s28, %s5542_s24 }
  0xc9   :  { %p4801_p5 = scmp.lt.s32.totalorder %s4799_s1, %s4797_s9 }
  0xcb   :  { %p4802_p6 = por %p4801_p5, %p4800_p4 }
  0xcd   :  { %p4803_p7 = pnand %p4802_p6, %p4798_p3 }
  0xcf   :  { %4806 = shalt.err (!%p4803_p7)
}
  0xd0   :  { %383 = dma.hbm_to_vmem [thread:$0]  %s379_s8, 16, %s381_s30, [#allocation39]  }
  0xd1   :  { %s426_s19 = sshll.u32 %s5562_s27, 4  ;;  %s5334_s6 = smov [#allocation41]   ;;  %s427_s19 = int_to_ptr.hbm [resolvable:$true] %s426_s19 }
  0xd2   :  { %s404_s21 = sshll.u32 %s5334_s6, 4  ;;  %s4819_s16 = sshra.s32 %s403_s18, 4  ;;  %s405_s21 = int_to_ptr.vmem [resolvable:$true] %s404_s21  ;;  %s4820_s16 = int_to_ptr.hbm [resolvable:$true] %s4819_s16 }
  0xd3   :  { %s4821_s11 = scalar_lea.hbm %s4820_s16, 2  ;;  %s4823_s4 = scalar_lea.hbm %s5552_s12, 2 }
  0xd4   :  { %p4822_p8 = scmp.ne.s32.totalorder %s4820_s16, %s4821_s11  ;;  %p4824_p9 = scmp.lt.s32.totalorder %s4820_s16, %s5552_s12 }
  0xd5   :  { %p4825_p10 = scmp.lt.s32.totalorder %s4823_s4, %s4821_s11 }
  0xd7   :  { %p4826_p11 = por %p4825_p10, %p4824_p9 }
  0xd9   :  { %p4827_p12 = pnand %p4826_p11, %p4822_p8 }
  0xdb   :  { %4830 = shalt.err (!%p4827_p12)
}
  0xdc   :  { %407 = dma.hbm_to_vmem [thread:$0]  %s403_s18, 32, %s405_s21, [#allocation42]  }
  0xdd   :  { %s5335_s24 = smov [#allocation44]   ;;  %s448_s2 = sshll.u32 %s5572_s20, 4  ;;  %s449_s2 = int_to_ptr.hbm [resolvable:$true] %s448_s2 }
  0xde   :  { %s428_s3 = sshll.u32 %s5335_s24, 4  ;;  %s4843_s8 = sshra.s32 %s427_s19, 4  ;;  %s429_s3 = int_to_ptr.vmem [resolvable:$true] %s428_s3  ;;  %s4844_s8 = int_to_ptr.hbm [resolvable:$true] %s4843_s8 }
  0xdf   :  { %s4845_s7 = scalar_lea.hbm %s4844_s8, 1  ;;  %s4847_s23 = scalar_lea.hbm %s5562_s27, 1 }
  0xe0   :  { %p4846_p13 = scmp.ne.s32.totalorder %s4844_s8, %s4845_s7  ;;  %p4848_p0 = scmp.lt.s32.totalorder %s4844_s8, %s5562_s27 }
  0xe1   :  { %p4849_p1 = scmp.lt.s32.totalorder %s4847_s23, %s4845_s7 }
  0xe3   :  { %p4850_p2 = por %p4849_p1, %p4848_p0 }
  0xe5   :  { %p4851_p3 = pnand %p4850_p2, %p4846_p13 }
  0xe7   :  { %4854 = shalt.err (!%p4851_p3)
}
  0xe8   :  { %431 = dma.hbm_to_vmem [thread:$0]  %s427_s19, 16, %s429_s3, [#allocation45]  }
  0xe9   :  { %s112_s12 = sshll.u32 %s5372_s5, 4  ;;  %s5336_s10 = smov [#allocation47]   ;;  %s113_s12 = int_to_ptr.hbm [resolvable:$true] %s112_s12 }
  0xea   :  { %s450_s15 = sshll.u32 %s5336_s10, 4  ;;  %s4867_s0 = sshra.s32 %s449_s2, 4  ;;  %s451_s15 = int_to_ptr.vmem [resolvable:$true] %s450_s15  ;;  %s4868_s0 = int_to_ptr.hbm [resolvable:$true] %s4867_s0 }
  0xeb   :  { %s4869_s25 = scalar_lea.hbm %s4868_s0, 1  ;;  %s4871_s30 = scalar_lea.hbm %s5572_s20, 1 }
  0xec   :  { %p4870_p4 = scmp.ne.s32.totalorder %s4868_s0, %s4869_s25  ;;  %p4872_p5 = scmp.lt.s32.totalorder %s4868_s0, %s5572_s20 }
  0xed   :  { %p4873_p6 = scmp.lt.s32.totalorder %s4871_s30, %s4869_s25 }
  0xef   :  { %p4874_p7 = por %p4873_p6, %p4872_p5 }
  0xf1   :  { %p4875_p8 = pnand %p4874_p7, %p4870_p4 }
  0xf3   :  { %4878 = shalt.err (!%p4875_p8)
}
  0xf4   :  { %453 = dma.hbm_to_vmem [thread:$0]  %s449_s2, 16, %s451_s15, [#allocation48]  }
  0xf5   :  { %s4891_s27 = sshra.s32 %s113_s12, 4  ;;  %s4895_s28 = scalar_lea.hbm %s5372_s5, 1  ;;  %s4892_s27 = int_to_ptr.hbm [resolvable:$true] %s4891_s27 }
  0xf6   :  { %s4893_s18 = scalar_lea.hbm %s4892_s27, 1  ;;  %p4896_p10 = scmp.lt.s32.totalorder %s4892_s27, %s5372_s5 }
  0xf7   :  { %p4894_p9 = scmp.ne.s32.totalorder %s4892_s27, %s4893_s18  ;;  %p4897_p11 = scmp.lt.s32.totalorder %s4895_s28, %s4893_s18 }
  0xf9   :  { %p4898_p12 = por %p4897_p11, %p4896_p10 }
  0xfb   :  { %p4899_p13 = pnand %p4898_p12, %p4894_p9 }
  0xfd   :  { %4902 = shalt.err (!%p4899_p13)
}
  0xfe   :  { %s5337_s9 = smov [#allocation7]   ;;  %s6058_s20 = sld [smem:[#allocation71_spill]] }
  0xff   :  { %115 = dma.hbm_to_smem %s113_s12, 16, %s5337_s9, [#allocation9]  }
 0x100   :  { %s122_s1 = sshll.u32 %s5382_s13, 4  ;;  %s5338_s19 = smov [#allocation10]   ;;  %s123_s1 = int_to_ptr.hbm [resolvable:$true] %s122_s1 }
 0x101   :  { %s124_s6 = sshll.u32 %s5338_s19, 4  ;;  %s4903_s16 = sshra.s32 %s123_s1, 4  ;;  %s125_s6 = int_to_ptr.vmem [resolvable:$true] %s124_s6  ;;  %s4904_s16 = int_to_ptr.hbm [resolvable:$true] %s4903_s16 }
 0x102   :  { %s4905_s11 = scalar_lea.hbm %s4904_s16, 256  ;;  %s4907_s5 = scalar_lea.hbm %s5382_s13, 256 }
 0x103   :  { %p4906_p0 = scmp.ne.s32.totalorder %s4904_s16, %s4905_s11  ;;  %p4908_p1 = scmp.lt.s32.totalorder %s4904_s16, %s5382_s13 }
 0x104   :  { %s158_s21 = sshll.u32 %s6058_s20, 4  ;;  %p4909_p2 = scmp.lt.s32.totalorder %s4907_s5, %s4905_s11  ;;  %s159_s21 = int_to_ptr.hbm [resolvable:$true] %s158_s21 }
 0x106   :  { %p4910_p3 = por %p4909_p2, %p4908_p1 }
 0x108   :  { %p4911_p4 = pnand %p4910_p3, %p4906_p0 }
 0x10a   :  { %4914 = shalt.err (!%p4911_p4)
}
 0x10b   :  { %130 = dma.hbm_to_vmem [thread:$0]  %s123_s1, 4096, %s125_s6, [#allocation8], %s5324_s26, %s5324_s26, %s5325_s22  }
 0x10c   :  { %s5339_s4 = smov [#allocation13]   ;;  %s4927_s3 = sshra.s32 %s159_s21, 4  ;;  %s4928_s3 = int_to_ptr.hbm [resolvable:$true] %s4927_s3 }
 0x10d   :  { %s160_s24 = sshll.u32 %s5339_s4, 4  ;;  %s4929_s2 = scalar_lea.hbm %s4928_s3, 64  ;;  %s161_s24 = int_to_ptr.vmem [resolvable:$true] %s160_s24 }
 0x10e   :  { %p4930_p5 = scmp.ne.s32.totalorder %s4928_s3, %s4929_s2  ;;  %s4931_s8 = scalar_lea.hbm %s6058_s20, 64 }
 0x10f   :  { %p4932_p6 = scmp.lt.s32.totalorder %s4928_s3, %s6058_s20  ;;  %p4933_p7 = scmp.lt.s32.totalorder %s4931_s8, %s4929_s2 }
 0x111   :  { %p4934_p8 = por %p4933_p7, %p4932_p6 }
 0x113   :  { %p4935_p9 = pnand %p4934_p8, %p4930_p5 }
 0x115   :  { %4938 = shalt.err (!%p4935_p9)
}
 0x116   :  { %s5340_s13 = smov 64   ;;  %s6059_s7 = sld [smem:[#allocation76_spill]] }
 0x117   :  { %s6060_s23 = sld [smem:[#allocation80_spill]]  ;;  %s5341_s12 = smov 4  }
 0x118   :  { %166 = dma.hbm_to_vmem [thread:$0]  %s159_s21, 1024, %s161_s24, [#allocation12], %s5340_s13, %s5340_s13, %s5341_s12  }
 0x119   :  { %s5342_s15 = smov [#allocation16]  }
 0x11a   :  { %s194_s0 = sshll.u32 %s5342_s15, 4  ;;  %s195_s0 = int_to_ptr.vmem [resolvable:$true] %s194_s0 }
 0x11c   :  { %s192_s10 = sshll.u32 %s6059_s7, 4  ;;  %s4955_s18 = scalar_lea.hbm %s6059_s7, 128  ;;  %s193_s10 = int_to_ptr.hbm [resolvable:$true] %s192_s10 }
 0x11d   :  { %s223_s25 = sshll.u32 %s6060_s23, 4  ;;  %s4951_s30 = sshra.s32 %s193_s10, 4  ;;  %s4952_s30 = int_to_ptr.hbm [resolvable:$true] %s4951_s30  ;;  %s224_s25 = int_to_ptr.hbm [resolvable:$true] %s223_s25 }
 0x11e   :  { %s4953_s27 = scalar_lea.hbm %s4952_s30, 128  ;;  %p4956_p11 = scmp.lt.s32.totalorder %s4952_s30, %s6059_s7 }
 0x11f   :  { %p4954_p10 = scmp.ne.s32.totalorder %s4952_s30, %s4953_s27  ;;  %p4957_p12 = scmp.lt.s32.totalorder %s4955_s18, %s4953_s27 }
 0x121   :  { %p4958_p13 = por %p4957_p12, %p4956_p11 }
 0x123   :  { %p4959_p0 = pnand %p4958_p13, %p4954_p10 }
 0x125   :  { %4962 = shalt.err (!%p4959_p0)
}
 0x126   :  { %s6061_s28 = sld [smem:[#allocation82_spill]]  ;;  %s5343_s9 = smov [#allocation19]  }
 0x127   :  { %200 = dma.hbm_to_vmem [thread:$0]  %s193_s10, 2048, %s195_s0, [#allocation15], %s5340_s13, %s5340_s13, %s5341_s12  }
 0x128   :  { %s225_s20 = sshll.u32 %s5343_s9, 4  ;;  %s4975_s19 = sshra.s32 %s224_s25, 4  ;;  %s226_s20 = int_to_ptr.vmem [resolvable:$true] %s225_s20  ;;  %s4976_s19 = int_to_ptr.hbm [resolvable:$true] %s4975_s19 }
 0x129   :  { %s4977_s6 = scalar_lea.hbm %s4976_s19, 1  ;;  %s4979_s21 = scalar_lea.hbm %s6060_s23, 1 }
 0x12a   :  { %p4978_p1 = scmp.ne.s32.totalorder %s4976_s19, %s4977_s6  ;;  %p4980_p2 = scmp.lt.s32.totalorder %s4976_s19, %s6060_s23 }
 0x12b   :  { %p4981_p3 = scmp.lt.s32.totalorder %s4979_s21, %s4977_s6 }
 0x12c   :  { %s248_s1 = sshll.u32 %s6061_s28, 4  ;;  %s5668_s1 = int_to_ptr.hbm [resolvable:$true] %s248_s1 }
 0x12d   :  { %p4982_p4 = por %p4981_p3, %p4980_p2 }
 0x12f   :  { %p4983_p5 = pnand %p4982_p4, %p4978_p1 }
 0x131   :  { %4986 = shalt.err (!%p4983_p5)
}
 0x132   :  { %228 = dma.hbm_to_vmem [thread:$0]  %s224_s25, 16, %s226_s20, [#allocation18]  }
 0x133   :  { %s6062_s16 = sld [smem:[#allocation83_spill]]  ;;  %s5344_s5 = smov [#allocation22]  }
 0x134   :  { %s250_s4 = sshll.u32 %s5344_s5, 4  ;;  %s4999_s24 = sshra.s32 %s5668_s1, 4  ;;  %s251_s4 = int_to_ptr.vmem [resolvable:$true] %s250_s4  ;;  %s5000_s24 = int_to_ptr.hbm [resolvable:$true] %s4999_s24 }
 0x135   :  { %s5001_s3 = scalar_lea.hbm %s5000_s24, 64  ;;  %s5003_s2 = scalar_lea.hbm %s6061_s28, 64 }
 0x136   :  { %p5002_p6 = scmp.ne.s32.totalorder %s5000_s24, %s5001_s3  ;;  %p5004_p7 = scmp.lt.s32.totalorder %s5000_s24, %s6061_s28 }
 0x137   :  { %p5005_p8 = scmp.lt.s32.totalorder %s5003_s2, %s5001_s3 }
 0x139   :  { %s273_s11 = sshll.u32 %s6062_s16, 4  ;;  %p5006_p9 = por %p5005_p8, %p5004_p7  ;;  %s274_s11 = int_to_ptr.hbm [resolvable:$true] %s273_s11 }
 0x13b   :  { %p5007_p10 = pnand %p5006_p9, %p5002_p6 }
 0x13d   :  { %5010 = shalt.err (!%p5007_p10)
}
 0x13e   :  { %s6063_s8 = sld [smem:[#allocation84_spill]]  ;;  %s5345_s7 = smov [#allocation25]  }
 0x13f   :  { %256 = dma.hbm_to_vmem [thread:$0]  %s5668_s1, 1024, %s251_s4, [#allocation21], %s5340_s13, %s5340_s13, %s5341_s12  }
 0x140   :  { %s275_s23 = sshll.u32 %s5345_s7, 4  ;;  %s5023_s15 = sshra.s32 %s274_s11, 4  ;;  %s276_s23 = int_to_ptr.vmem [resolvable:$true] %s275_s23  ;;  %s5024_s15 = int_to_ptr.hbm [resolvable:$true] %s5023_s15 }
 0x141   :  { %s5025_s0 = scalar_lea.hbm %s5024_s15, 1  ;;  %s5027_s25 = scalar_lea.hbm %s6062_s16, 1 }
 0x142   :  { %p5026_p11 = scmp.ne.s32.totalorder %s5024_s15, %s5025_s0  ;;  %p5028_p12 = scmp.lt.s32.totalorder %s5024_s15, %s6062_s16 }
 0x143   :  { %p5029_p13 = scmp.lt.s32.totalorder %s5027_s25, %s5025_s0 }
 0x144   :  { %s294_s10 = sshll.u32 %s6063_s8, 4  ;;  %s5681_s10 = int_to_ptr.hbm [resolvable:$true] %s294_s10 }
 0x145   :  { %p5030_p0 = por %p5029_p13, %p5028_p12 }
 0x147   :  { %p5031_p1 = pnand %p5030_p0, %p5026_p11 }
 0x149   :  { %5034 = shalt.err (!%p5031_p1)
}
 0x14a   :  { %278 = dma.hbm_to_vmem [thread:$0]  %s274_s11, 16, %s276_s23, [#allocation24]  }
 0x14b   :  { %s6064_s30 = sld [smem:[#allocation85_spill]]  ;;  %s5346_s18 = smov [#allocation28]  }
 0x14c   :  { %s296_s28 = sshll.u32 %s5346_s18, 4  ;;  %s5047_s9 = sshra.s32 %s5681_s10, 4  ;;  %s297_s28 = int_to_ptr.vmem [resolvable:$true] %s296_s28  ;;  %s5048_s9 = int_to_ptr.hbm [resolvable:$true] %s5047_s9 }
 0x14d   :  { %s5049_s20 = scalar_lea.hbm %s5048_s9, 64  ;;  %s5051_s1 = scalar_lea.hbm %s6063_s8, 64 }
 0x14e   :  { %p5050_p2 = scmp.ne.s32.totalorder %s5048_s9, %s5049_s20  ;;  %p5052_p3 = scmp.lt.s32.totalorder %s5048_s9, %s6063_s8 }
 0x14f   :  { %p5053_p4 = scmp.lt.s32.totalorder %s5051_s1, %s5049_s20 }
 0x151   :  { %s318_s27 = sshll.u32 %s6064_s30, 4  ;;  %p5054_p5 = por %p5053_p4, %p5052_p3  ;;  %s5686_s27 = int_to_ptr.hbm [resolvable:$true] %s318_s27 }
 0x153   :  { %p5055_p6 = pnand %p5054_p5, %p5050_p2 }
 0x155   :  { %5058 = shalt.err (!%p5055_p6)
}
 0x156   :  { %s6065_s19 = sld [smem:[#allocation86_spill]]  ;;  %s5347_s6 = smov [#allocation31]  }
 0x157   :  { %302 = dma.hbm_to_vmem [thread:$0]  %s5681_s10, 1024, %s297_s28, [#allocation27], %s5340_s13, %s5340_s13, %s5341_s12  }
 0x158   :  { %s320_s21 = sshll.u32 %s5347_s6, 4  ;;  %s5071_s11 = sshra.s32 %s5686_s27, 4  ;;  %s321_s21 = int_to_ptr.vmem [resolvable:$true] %s320_s21  ;;  %s5072_s11 = int_to_ptr.hbm [resolvable:$true] %s5071_s11 }
 0x159   :  { %s5073_s5 = scalar_lea.hbm %s5072_s11, 128  ;;  %s5075_s4 = scalar_lea.hbm %s6064_s30, 128 }
 0x15a   :  { %p5074_p7 = scmp.ne.s32.totalorder %s5072_s11, %s5073_s5  ;;  %p5076_p8 = scmp.lt.s32.totalorder %s5072_s11, %s6064_s30 }
 0x15b   :  { %p5077_p9 = scmp.lt.s32.totalorder %s5075_s4, %s5073_s5 }
 0x15c   :  { %s342_s16 = sshll.u32 %s6065_s19, 4  ;;  %s5696_s16 = int_to_ptr.hbm [resolvable:$true] %s342_s16 }
 0x15d   :  { %p5078_p10 = por %p5077_p9, %p5076_p8 }
 0x15f   :  { %p5079_p11 = pnand %p5078_p10, %p5074_p7 }
 0x161   :  { %5082 = shalt.err (!%p5079_p11)
}
 0x162   :  { %s6066_s24 = sld [smem:[#allocation87_spill]]  ;;  %s5348_s2 = smov [#allocation34]  }
 0x163   :  { %326 = dma.hbm_to_vmem [thread:$0]  %s5686_s27, 2048, %s321_s21, [#allocation30], %s5324_s26, %s5324_s26, %s5325_s22  }
 0x164   :  { %s344_s8 = sshll.u32 %s5348_s2, 4  ;;  %s5095_s7 = sshra.s32 %s5696_s16, 4  ;;  %s345_s8 = int_to_ptr.vmem [resolvable:$true] %s344_s8  ;;  %s5096_s7 = int_to_ptr.hbm [resolvable:$true] %s5095_s7 }
 0x165   :  { %s5097_s23 = scalar_lea.hbm %s5096_s7, 64  ;;  %s5099_s10 = scalar_lea.hbm %s6065_s19, 64 }
 0x166   :  { %p5098_p12 = scmp.ne.s32.totalorder %s5096_s7, %s5097_s23  ;;  %p5100_p13 = scmp.lt.s32.totalorder %s5096_s7, %s6065_s19 }
 0x167   :  { %p5101_p0 = scmp.lt.s32.totalorder %s5099_s10, %s5097_s23 }
 0x168   :  { %s367_s3 = sshll.u32 %s6066_s24, 4  ;;  %s368_s3 = int_to_ptr.hbm [resolvable:$true] %s367_s3 }
 0x169   :  { %p5102_p1 = por %p5101_p0, %p5100_p13 }
 0x16b   :  { %p5103_p2 = pnand %p5102_p1, %p5098_p12 }
 0x16d   :  { %5106 = shalt.err (!%p5103_p2)
}
 0x16e   :  { %s6067_s15 = sld [smem:[#allocation88_spill]]  ;;  %s5349_s0 = smov [#allocation37]  }
 0x16f   :  { %350 = dma.hbm_to_vmem [thread:$0]  %s5696_s16, 1024, %s345_s8, [#allocation33], %s5340_s13, %s5340_s13, %s5341_s12  }
 0x170   :  { %s369_s25 = sshll.u32 %s5349_s0, 4  ;;  %s5119_s27 = sshra.s32 %s368_s3, 4  ;;  %s370_s25 = int_to_ptr.vmem [resolvable:$true] %s369_s25  ;;  %s5120_s27 = int_to_ptr.hbm [resolvable:$true] %s5119_s27 }
 0x171   :  { %s5121_s18 = scalar_lea.hbm %s5120_s27, 1  ;;  %s5123_s28 = scalar_lea.hbm %s6066_s24, 1 }
 0x172   :  { %p5122_p3 = scmp.ne.s32.totalorder %s5120_s27, %s5121_s18  ;;  %p5124_p4 = scmp.lt.s32.totalorder %s5120_s27, %s6066_s24 }
 0x173   :  { %p5125_p5 = scmp.lt.s32.totalorder %s5123_s28, %s5121_s18 }
 0x174   :  { %s388_s30 = sshll.u32 %s6067_s15, 4  ;;  %s5714_s30 = int_to_ptr.hbm [resolvable:$true] %s388_s30 }
 0x175   :  { %p5126_p6 = por %p5125_p5, %p5124_p4 }
 0x177   :  { %p5127_p7 = pnand %p5126_p6, %p5122_p3 }
 0x179   :  { %5130 = shalt.err (!%p5127_p7)
}
 0x17a   :  { %372 = dma.hbm_to_vmem [thread:$0]  %s368_s3, 16, %s370_s25, [#allocation36]  }
 0x17b   :  { %s6068_s9 = sld [smem:[#allocation89_spill]]  ;;  %s5350_s1 = smov [#allocation40]  }
 0x17c   :  { %s390_s19 = sshll.u32 %s5350_s1, 4  ;;  %s5143_s6 = sshra.s32 %s5714_s30, 4  ;;  %s391_s19 = int_to_ptr.vmem [resolvable:$true] %s390_s19  ;;  %s5144_s6 = int_to_ptr.hbm [resolvable:$true] %s5143_s6 }
 0x17d   :  { %s5145_s21 = scalar_lea.hbm %s5144_s6, 128  ;;  %s5147_s16 = scalar_lea.hbm %s6067_s15, 128 }
 0x17e   :  { %p5146_p8 = scmp.ne.s32.totalorder %s5144_s6, %s5145_s21  ;;  %p5148_p9 = scmp.lt.s32.totalorder %s5144_s6, %s6067_s15 }
 0x17f   :  { %p5149_p10 = scmp.lt.s32.totalorder %s5147_s16, %s5145_s21 }
 0x181   :  { %s412_s20 = sshll.u32 %s6068_s9, 4  ;;  %p5150_p11 = por %p5149_p10, %p5148_p9  ;;  %s5719_s20 = int_to_ptr.hbm [resolvable:$true] %s412_s20 }
 0x183   :  { %p5151_p12 = pnand %p5150_p11, %p5146_p8 }
 0x185   :  { %5154 = shalt.err (!%p5151_p12)
}
 0x186   :  { %s6069_s11 = sld [smem:[#allocation90_spill]]  ;;  %s5351_s5 = smov [#allocation43]  }
 0x187   :  { %396 = dma.hbm_to_vmem [thread:$0]  %s5714_s30, 2048, %s391_s19, [#allocation39], %s5324_s26, %s5324_s26, %s5325_s22  }
 0x188   :  { %s414_s4 = sshll.u32 %s5351_s5, 4  ;;  %s5167_s3 = sshra.s32 %s5719_s20, 4  ;;  %s415_s4 = int_to_ptr.vmem [resolvable:$true] %s414_s4  ;;  %s5168_s3 = int_to_ptr.hbm [resolvable:$true] %s5167_s3 }
 0x189   :  { %s5169_s2 = scalar_lea.hbm %s5168_s3, 128  ;;  %s5171_s8 = scalar_lea.hbm %s6068_s9, 128 }
 0x18a   :  { %p5170_p13 = scmp.ne.s32.totalorder %s5168_s3, %s5169_s2  ;;  %p5172_p0 = scmp.lt.s32.totalorder %s5168_s3, %s6068_s9 }
 0x18b   :  { %p5173_p1 = scmp.lt.s32.totalorder %s5171_s8, %s5169_s2 }
 0x18c   :  { %s437_s24 = sshll.u32 %s6069_s11, 4  ;;  %s438_s24 = int_to_ptr.hbm [resolvable:$true] %s437_s24 }
 0x18d   :  { %p5174_p2 = por %p5173_p1, %p5172_p0 }
 0x18f   :  { %p5175_p3 = pnand %p5174_p2, %p5170_p13 }
 0x191   :  { %5178 = shalt.err (!%p5175_p3)
}
 0x192   :  { %420 = dma.hbm_to_vmem [thread:$0]  %s5719_s20, 2048, %s415_s4, [#allocation42], %s5340_s13, %s5340_s13, %s5341_s12  }
 0x193   :  { %s458_s7 = sshll.u32 %s5577_s29, 4  ;;  %s5352_s23 = smov [#allocation46]   ;;  %s5737_s7 = int_to_ptr.hbm [resolvable:$true] %s458_s7 }
 0x194   :  { %s439_s10 = sshll.u32 %s5352_s23, 4  ;;  %s5191_s15 = sshra.s32 %s438_s24, 4  ;;  %s440_s10 = int_to_ptr.vmem [resolvable:$true] %s439_s10  ;;  %s5192_s15 = int_to_ptr.hbm [resolvable:$true] %s5191_s15 }
 0x195   :  { %s5193_s0 = scalar_lea.hbm %s5192_s15, 1  ;;  %s5195_s25 = scalar_lea.hbm %s6069_s11, 1 }
 0x196   :  { %p5194_p4 = scmp.ne.s32.totalorder %s5192_s15, %s5193_s0  ;;  %p5196_p5 = scmp.lt.s32.totalorder %s5192_s15, %s6069_s11 }
 0x197   :  { %p5197_p6 = scmp.lt.s32.totalorder %s5195_s25, %s5193_s0 }
 0x199   :  { %p5198_p7 = por %p5197_p6, %p5196_p5 }
 0x19b   :  { %p5199_p8 = pnand %p5198_p7, %p5194_p4 }
 0x19d   :  { %5202 = shalt.err (!%p5199_p8)
}
 0x19e   :  { %442 = dma.hbm_to_vmem [thread:$0]  %s438_s24, 16, %s440_s10, [#allocation45]  }
 0x19f   :  { %s5353_s12 = smov [#allocation49]   ;;  %s5215_s27 = sshra.s32 %s5737_s7, 4  ;;  %s5216_s27 = int_to_ptr.hbm [resolvable:$true] %s5215_s27 }
 0x1a0   :  { %s460_s30 = sshll.u32 %s5353_s12, 4  ;;  %s5217_s18 = scalar_lea.hbm %s5216_s27, 128  ;;  %s461_s30 = int_to_ptr.vmem [resolvable:$true] %s460_s30 }
 0x1a1   :  { %p5218_p9 = scmp.ne.s32.totalorder %s5216_s27, %s5217_s18  ;;  %s5219_s28 = scalar_lea.hbm %s5577_s29, 128 }
 0x1a2   :  { %p5220_p10 = scmp.lt.s32.totalorder %s5216_s27, %s5577_s29  ;;  %p5221_p11 = scmp.lt.s32.totalorder %s5219_s28, %s5217_s18 }
 0x1a4   :  { %p5222_p12 = por %p5221_p11, %p5220_p10 }
 0x1a6   :  { %p5223_p13 = pnand %p5222_p12, %p5218_p9 }
 0x1a8   :  { %5226 = shalt.err (!%p5223_p13)
}
 0x1a9   :  { %466 = dma.hbm_to_vmem [thread:$0]  %s5737_s7, 2048, %s461_s30, [#allocation48], %s5324_s26, %s5324_s26, %s5325_s22  }
 0x1aa   :  { %5243 = dma.done.wait [#allocation9], 16  }
 0x1ab   :  { %5244 = vsyncadd [#allocation9], 4294967280 }
 0x1ac   :  { %5245 = dma.done.wait [#allocation8], 4096  }
 0x1ad   :  { %5246 = vsyncadd [#allocation8], 4294963200 }
 0x1ae   :  { %5247 = dma.done.wait [#allocation12], 4096  }
 0x1af   :  { %5248 = vsyncadd [#allocation12], 4294963200 }
 0x1b0   :  { %5249 = dma.done.wait [#allocation15], 4096  }
 0x1b1   :  { %5250 = vsyncadd [#allocation15], 4294963200 }
 0x1b2   :  { %5251 = dma.done.wait [#allocation18], 32  }
 0x1b3   :  { %5252 = vsyncadd [#allocation18], 4294967264 }
 0x1b4   :  { %5253 = dma.done.wait [#allocation21], 4096  }
 0x1b5   :  { %5254 = vsyncadd [#allocation21], 4294963200 }
 0x1b6   :  { %5255 = dma.done.wait [#allocation24], 32  }
 0x1b7   :  { %5256 = vsyncadd [#allocation24], 4294967264 }
 0x1b8   :  { %5257 = dma.done.wait [#allocation27], 1040  }
 0x1b9   :  { %5258 = vsyncadd [#allocation27], 4294966256 }
 0x1ba   :  { %5259 = dma.done.wait [#allocation30], 2064  }
 0x1bb   :  { %5260 = vsyncadd [#allocation30], 4294965232 }
 0x1bc   :  { %5261 = dma.done.wait [#allocation33], 1056  }
 0x1bd   :  { %5262 = vsyncadd [#allocation33], 4294966240 }
 0x1be   :  { %5263 = dma.done.wait [#allocation36], 32  }
 0x1bf   :  { %5264 = vsyncadd [#allocation36], 4294967264 }
 0x1c0   :  { %5265 = dma.done.wait [#allocation39], 2064  }
 0x1c1   :  { %5266 = vsyncadd [#allocation39], 4294965232 }
 0x1c2   :  { %5267 = dma.done.wait [#allocation42], 2080  }
 0x1c3   :  { %5268 = vsyncadd [#allocation42], 4294965216 }
 0x1c4   :  { %5269 = dma.done.wait [#allocation45], 32  }
 0x1c5   :  { %5270 = vsyncadd [#allocation45], 4294967264 }
 0x1c6   :  { %5271 = dma.done.wait [#allocation48], 2064  }
 0x1c7   :  { %5272 = vsyncadd [#allocation48], 4294965232 }
 0x1c8   :  { %581 = sfence }
 0x1c9   :  { %s582_s29 = sld [smem:[#allocation7]]  ;;  %v5354_v33 = vmov 128.0   ;;  %v3575_v34 = vld [vmem:[#allocation11 + $0xa8] sm:$0xf]  ;;  %v4257_v35 = vld [vmem:[#allocation11 + $0xb0] sm:$0xf0] }
 0x1ca   :  { %s6070_s26 = sld [smem:[#allocation66_spill]]  ;;  %4514 = vrcp.f32 %v5354_v33  ;;  %v4256_v36 = vld [vmem:[#allocation11 + $0xac] sm:$0xf]  ;;  %v3576_v37 = vor.u32 %v4257_v35, %v3575_v34  ;;  %v3577_v38 = vld [vmem:[#allocation11 + $0xb4] sm:$0xf0]  ;;  %vm884_vm4 = vcmask 261120  }
 0x1cb   :  { %s3482_s22 = sld [smem:[#allocation7 + $0x1]]  ;;  %v3583_v39 = vld [vmem:[#allocation11 + $0xb0] sm:$0xf]  ;;  %v4258_v40 = vld [vmem:[#allocation11 + $0xb8] sm:$0xf0]  ;;  %v3580_v41 = vor.u32 %v4256_v36, %v3577_v38  ;;  %s5355_s15 = smov 96  }
 0x1cc   :  { %s3483_s9 = sld [smem:[#allocation7 + $0x2]]  ;;  %v3584_v42 = vor.u32 %v4258_v40, %v3583_v39  ;;  %845 = vmatpush.bf16.msra.mxu0 %v3576_v37  ;;  %v3563_v53 = vld [vmem:[#allocation11 + $0x90] sm:$0xf]  ;;  %v4254_v54 = vld [vmem:[#allocation11 + $0x98] sm:$0xf0]  ;;  %s5356_s0 = smov 32  }
 0x1cd   :  { %s3484_s20 = sld [smem:[#allocation7 + $0x3]]  ;;  %858 = vmatpush.bf16.msra.mxu1 %v3580_v41  ;;  %v4253_v55 = vld [vmem:[#allocation11 + $0x94] sm:$0xf]  ;;  %v3564_v56 = vor.u32 %v4254_v54, %v3563_v53  ;;  %v3565_v57 = vld [vmem:[#allocation11 + $0x9c] sm:$0xf0]  ;;  %vm912_vm5 = vcmask 64512  }
 0x1ce   :  { %s3485_s1 = sld [smem:[#allocation7 + $0x4]]  ;;  %871 = vmatpush.bf16.msra.mxu2 %v3584_v42  ;;  %v3571_v58 = vld [vmem:[#allocation11 + $0x98] sm:$0xf]  ;;  %v4255_v59 = vld [vmem:[#allocation11 + $0xa0] sm:$0xf0]  ;;  %v3568_v60 = vor.u32 %v4253_v55, %v3565_v57  ;;  %vm1159_vm6 = vcmask 523264  }
 0x1cf   :  { %s3486_s19 = sld [smem:[#allocation7 + $0x5]]  ;;  %s583_s21 = scalar_lea.vmem [#allocation10], %s582_s29  ;;  %v3572_v61 = vor.u32 %v4255_v59, %v3571_v58  ;;  %v3551_v62 = vld [vmem:[#allocation11 + $0x78] sm:$0xf]  ;;  %v4251_v63 = vld [vmem:[#allocation11 + $0x80] sm:$0xf0] }
 0x1d0   :  { %v586_v0 = vld [vmem:[%s6070_s26] sm:$0x1]  ;;  %v593_v1 = vld [vmem:[%s6070_s26 + $0x1] sm:$0x1]  ;;  %s5750_s6 = sld [smem:[#allocation7 + $0x6]]  ;;  %v4515_v43 = vpop.eup %4514  ;;  %846 = vmatpush.bf16.msra.mxu0 %v3564_v56  ;;  %vm1161_vm7 = vcmask 785408  }
 0x1d1   :  { %v584_v2 = vld [vmem:[%s583_s21] sm:$0x1]  ;;  %v600_v3 = vld [vmem:[%s6070_s26 + $0x2] sm:$0x1]  ;;  %s5753_s16 = sld [smem:[#allocation7 + $0x7]]  ;;  %s590_s11 = scalar_lea.vmem [#allocation10], %s3482_s22  ;;  %vm646_vm0 = vweird.f32 %v4515_v43  ;;  %859 = vmatpush.bf16.msra.mxu1 %v3568_v60 }
 0x1d2   :  { %v585_v4 = vmul.f32 11.313708, %v584_v2  ;;  %v591_v5 = vld [vmem:[%s590_s11] sm:$0x1]  ;;  %v607_v6 = vld [vmem:[%s6070_s26 + $0x3] sm:$0x1]  ;;  %872 = vmatpush.bf16.msra.mxu2 %v3572_v61 }
 0x1d3   :  { %v592_v7 = vmul.f32 11.313708, %v591_v5  ;;  %s597_s5 = scalar_lea.vmem [#allocation10], %s3483_s9  ;;  %v614_v9 = vld [vmem:[%s6070_s26 + $0x4] sm:$0x1]  ;;  %s604_s4 = scalar_lea.vmem [#allocation10], %s3484_s20 }
 0x1d4   :  { %v598_v8 = vld [vmem:[%s597_s5] sm:$0x1]  ;;  %v587_v10 = vadd.f32 %v586_v0, %v585_v4  ;;  %v621_v13 = vld [vmem:[%s6070_s26 + $0x5] sm:$0x1]  ;;  %s611_s24 = scalar_lea.vmem [#allocation10], %s3485_s1  ;;  %v642_v44 = vmul.f32 128.0, %v4515_v43 }
 0x1d5   :  { %v599_v11 = vmul.f32 11.313708, %v598_v8  ;;  %v605_v12 = vld [vmem:[%s604_s4] sm:$0x1]  ;;  %v594_v14 = vadd.f32 %v593_v1, %v592_v7  ;;  %s618_s3 = scalar_lea.vmem [#allocation10], %s3486_s19  ;;  %v3552_v1 = vor.u32 %v4251_v63, %v3551_v62  ;;  %s6071_s7 = sld [smem:[#allocation68_spill]] }
 0x1d6   :  { %v606_v15 = vmul.f32 11.313708, %v605_v12  ;;  %v612_v16 = vld [vmem:[%s611_s24] sm:$0x1]  ;;  %588 = vst [vmem:[#allocation2] sm:$0x1] %v587_v10 }
 0x1d7   :  { %v601_v17 = vadd.f32 %v600_v3, %v599_v11  ;;  %v613_v18 = vmul.f32 11.313708, %v612_v16  ;;  %v619_v19 = vld [vmem:[%s618_s3] sm:$0x1]  ;;  %v628_v20 = vld [vmem:[%s6070_s26 + $0x6] sm:$0x1]  ;;  %847 = vmatpush.bf16.msra.mxu0 %v3552_v1 }
 0x1d8   :  { %v635_v21 = vld [vmem:[%s6070_s26 + $0x7] sm:$0x1]  ;;  %595 = vst [vmem:[#allocation2 + $0x1] sm:$0x1] %v594_v14  ;;  %v608_v22 = vadd.f32 %v607_v6, %v606_v15  ;;  %v620_v23 = vmul.f32 11.313708, %v619_v19 }
 0x1d9   :  { %602 = vst [vmem:[#allocation2 + $0x2] sm:$0x1] %v601_v17  ;;  %v615_v24 = vadd.f32 %v614_v9, %v613_v18  ;;  %s625_s2 = scalar_lea.vmem [#allocation10], %s5750_s6  ;;  %s632_s8 = scalar_lea.vmem [#allocation10], %s5753_s16  ;;  %v643_v45 = vsub.f32 1.0, %v642_v44  ;;  %vm1732_vm14 = vcmask 7168  }
 0x1da   :  { %v626_v25 = vld [vmem:[%s625_s2] sm:$0x1]  ;;  %609 = vst [vmem:[#allocation2 + $0x3] sm:$0x1] %v608_v22  ;;  %v622_v27 = vadd.f32 %v621_v13, %v620_v23  ;;  %v4250_v0 = vld [vmem:[#allocation11 + $0x7c] sm:$0xf] }
 0x1db   :  { %v633_v26 = vld [vmem:[%s632_s8] sm:$0x1]  ;;  %v627_v28 = vmul.f32 11.313708, %v626_v25  ;;  %616 = vst [vmem:[#allocation2 + $0x4] sm:$0x1] %v615_v24  ;;  %v644_v46 = vmul.f32 %v4515_v43, %v643_v45 }
 0x1dc   :  { %v634_v29 = vmul.f32 11.313708, %v633_v26  ;;  %623 = vst [vmem:[#allocation2 + $0x5] sm:$0x1] %v622_v27  ;;  %v3553_v2 = vld [vmem:[#allocation11 + $0x84] sm:$0xf0] }
 0x1dd   :  { %v629_v30 = vadd.f32 %v628_v20, %v627_v28  ;;  %v645_v47 = vadd.f32 %v4515_v43, %v644_v46  ;;  %v3559_v3 = vld [vmem:[#allocation11 + $0x80] sm:$0xf]  ;;  %v4252_v4 = vld [vmem:[#allocation11 + $0x88] sm:$0xf0]  ;;  %v3556_v5 = vor.u32 %v4250_v0, %v3553_v2  ;;  %v4247_v9 = vld [vmem:[#allocation11 + $0x64] sm:$0xf] }
 0x1de   :  { %v636_v31 = vadd.f32 %v635_v21, %v634_v29  ;;  %v3560_v6 = vor.u32 %v4252_v4, %v3559_v3  ;;  %v3539_v7 = vld [vmem:[#allocation11 + $0x60] sm:$0xf]  ;;  %v4248_v8 = vld [vmem:[#allocation11 + $0x68] sm:$0xf0]  ;;  %v3541_v11 = vld [vmem:[#allocation11 + $0x6c] sm:$0xf0] }
 0x1df   :  { %630 = vst [vmem:[#allocation2 + $0x6] sm:$0x1] %v629_v30  ;;  %v5765_v48 = vsel %vm646_vm0, %v4515_v43, %v645_v47  ;;  %860 = vmatpush.bf16.msra.mxu1 %v3556_v5  ;;  %v3540_v10 = vor.u32 %v4248_v8, %v3539_v7  ;;  %v3547_v12 = vld [vmem:[#allocation11 + $0x68] sm:$0xf]  ;;  %v4249_v13 = vld [vmem:[#allocation11 + $0x70] sm:$0xf0]  ;;  %v3544_v14 = vor.u32 %v4247_v9, %v3541_v11 }
 0x1e0   :  { %637 = vst [vmem:[#allocation2 + $0x7] sm:$0x1] %v636_v31  ;;  %873 = vmatpush.bf16.msra.mxu2 %v3560_v6  ;;  %v3548_v15 = vor.u32 %v4249_v13, %v3547_v12  ;;  %v3527_v16 = vld [vmem:[#allocation11 + $0x48] sm:$0xf]  ;;  %v4245_v17 = vld [vmem:[#allocation11 + $0x50] sm:$0xf0] }
 0x1e1   :  { %848 = vmatpush.bf16.msra.mxu0 %v3540_v10  ;;  %v4244_v18 = vld [vmem:[#allocation11 + $0x4c] sm:$0xf]  ;;  %v3528_v19 = vor.u32 %v4245_v17, %v3527_v16  ;;  %v3529_v20 = vld [vmem:[#allocation11 + $0x54] sm:$0xf0]  ;;  %v3535_v21 = vld [vmem:[#allocation11 + $0x50] sm:$0xf] }
 0x1e2   :  { %v4246_v22 = vld [vmem:[#allocation11 + $0x58] sm:$0xf0]  ;;  %v3532_v23 = vor.u32 %v4244_v18, %v3529_v20  ;;  %v3515_v25 = vld [vmem:[#allocation11 + $0x30] sm:$0xf]  ;;  %v4241_v27 = vld [vmem:[#allocation11 + $0x34] sm:$0xf] }
 0x1e3   :  { %861 = vmatpush.bf16.msra.mxu1 %v3544_v14  ;;  %v3536_v24 = vor.u32 %v4246_v22, %v3535_v21  ;;  %v4242_v26 = vld [vmem:[#allocation11 + $0x38] sm:$0xf0]  ;;  %v3517_v29 = vld [vmem:[#allocation11 + $0x3c] sm:$0xf0]  ;;  %v3523_v30 = vld [vmem:[#allocation11 + $0x38] sm:$0xf] }
 0x1e4   :  { %874 = vmatpush.bf16.msra.mxu2 %v3548_v15  ;;  %v3516_v28 = vor.u32 %v4242_v26, %v3515_v25  ;;  %v4243_v31 = vld [vmem:[#allocation11 + $0x40] sm:$0xf0]  ;;  %v3520_v33 = vor.u32 %v4241_v27, %v3517_v29  ;;  %v3503_v35 = vld [vmem:[#allocation11 + $0x18] sm:$0xf]  ;;  %v4238_v37 = vld [vmem:[#allocation11 + $0x1c] sm:$0xf] }
 0x1e5   :  { %849 = vmatpush.bf16.msra.mxu0 %v3528_v19  ;;  %v3524_v34 = vor.u32 %v4243_v31, %v3523_v30  ;;  %v4239_v36 = vld [vmem:[#allocation11 + $0x20] sm:$0xf0]  ;;  %v3505_v39 = vld [vmem:[#allocation11 + $0x24] sm:$0xf0]  ;;  %v3511_v40 = vld [vmem:[#allocation11 + $0x20] sm:$0xf] }
 0x1e6   :  { %v3504_v38 = vor.u32 %v4239_v36, %v3503_v35  ;;  %v4240_v41 = vld [vmem:[#allocation11 + $0x28] sm:$0xf0]  ;;  %v3508_v42 = vor.u32 %v4238_v37, %v3505_v39  ;;  %v3491_v44 = vld [vmem:[#allocation11] sm:$0xf]  ;;  %v4235_v46 = vld [vmem:[#allocation11 + $0x4] sm:$0xf] }
 0x1e7   :  { %v5762_v32 = vld [vmem:[#allocation2] sm:$0xff]  ;;  %862 = vmatpush.bf16.msra.mxu1 %v3532_v23  ;;  %v3512_v43 = vor.u32 %v4240_v41, %v3511_v40  ;;  %v4236_v45 = vld [vmem:[#allocation11 + $0x8] sm:$0xf0]  ;;  %s6072_s23 = sld [smem:[#allocation69_spill]]  ;;  %s5851_s26 = smov 0  }
 0x1e8   :  { %639 = vadd.xlane.f32.xlu0 %v5762_v32  ;;  %875 = vmatpush.bf16.msra.mxu2 %v3536_v24  ;;  %v3492_v47 = vor.u32 %v4236_v45, %v3491_v44  ;;  %s6073_s10 = sld [smem:[#allocation70_spill]]  ;;  %v4506_v0 = vld [vmem:[%s6071_s7] ss:$0 sm:$0xff] }
 0x1e9   :  { %850 = vmatpush.bf16.msra.mxu0 %v3516_v28  ;;  %s6074_s25 = sld [smem:[#allocation72_spill]] }
 0x1ea   :  { %s6076_s12 = sld [smem:[#allocation74_spill]] }
 0x1eb   :  { %863 = vmatpush.bf16.msra.mxu1 %v3520_v33  ;;  %s6077_s30 = sld [smem:[#allocation75_spill]] }
 0x1ec   :  { %876 = vmatpush.bf16.msra.mxu2 %v3524_v34  ;;  %s6078_s27 = sld [smem:[#allocation77_spill]] }
 0x1ed   :  { %851 = vmatpush.bf16.msra.mxu0 %v3504_v38  ;;  %v4507_v3 = vld [vmem:[%s6072_s23] ss:$0 sm:$0xff]  ;;  %s6079_s18 = sld [smem:[#allocation78_spill]] }
 0x1ee   :  { %v709_v7 = vld [vmem:[%s6073_s10] sm:$0x7]  ;;  %s6080_s28 = sld [smem:[#allocation79_spill]] }
 0x1ef   :  { %864 = vmatpush.bf16.msra.mxu1 %v3508_v42  ;;  %v712_v8 = vperm.slane %v709_v7, 1  ;;  %v711_v9 = vperm.slane %v709_v7, 0  ;;  %v713_v13 = vperm.slane %v709_v7, 2  ;;  %s6081_s29 = sld [smem:[#allocation65_spill]] }
 0x1f0   :  { %877 = vmatpush.bf16.msra.mxu2 %v3512_v43 }
 0x1f1   :  { %852 = vmatpush.bf16.msra.mxu0 %v3492_v47 }
 0x25b   :  { %v640_v49 = vpop.xlane.xlu0 %639 }
 0x25c   :  { %v648_v50 = vmul.f32 %v5765_v48, %v640_v49  ;;  %v3493_v49 = vld [vmem:[#allocation11 + $0xc] sm:$0xf0] }
 0x25d   :  { %v3496_v53 = vor.u32 %v4235_v46, %v3493_v49 }
 0x25e   :  { %v5769_v51 = vsub.f32 %v5762_v32, %v648_v50  ;;  %v3499_v50 = vld [vmem:[#allocation11 + $0x8] sm:$0xf] }
 0x25f   :  { %865 = vmatpush.bf16.msra.mxu1 %v3496_v53 }
 0x260   :  { %v650_v52 = vmul.f32 %v5769_v51, %v5769_v51 }
 0x262   :  { %651 = vadd.xlane.f32.xlu0 %v650_v52  ;;  %v4237_v52 = vld [vmem:[#allocation11 + $0x10] sm:$0xf0] }
 0x263   :  { %v3500_v54 = vor.u32 %v4237_v52, %v3499_v50 }
 0x265   :  { %878 = vmatpush.bf16.msra.mxu2 %v3500_v54 }
 0x2d5   :  { %v652_v55 = vpop.xlane.xlu0 %651 }
 0x2d6   :  { %v653_v56 = vmul.f32 %v652_v55, %v5765_v48 }
 0x2d8   :  { %v654_v57 = vadd.f32 1e-05, %v653_v56 }
 0x2da   :  { %4516 = vrsqrt.f32 %v654_v57  ;;  %vm661_vm2 = vweird.f32 %v654_v57 }
 0x2e0   :  { %v4517_v58 = vpop.eup %4516 }
 0x2e1   :  { %v656_v59 = vmul.f32 %v4517_v58, %v654_v57  ;;  %vm662_vm1 = vweird.f32 %v4517_v58 }
 0x2e2   :  { %vm663_vm3 = vmor %vm661_vm2, %vm662_vm1 }
 0x2e3   :  { %v657_v60 = vmul.f32 %v4517_v58, %v656_v59 }
 0x2e5   :  { %v658_v61 = vmul.f32 0.5, %v657_v60 }
 0x2e7   :  { %v659_v62 = vsub.f32 1.5, %v658_v61 }
 0x2e9   :  { %v660_v63 = vmul.f32 %v4517_v58, %v659_v62 }
 0x2eb   :  { %v664_v1 = vsel %vm663_vm3, %v4517_v58, %v660_v63 }
 0x2ec   :  { %v665_v2 = vmul.f32 %v664_v1, %v5769_v51 }
 0x2ee   :  { %v670_v4 = vmul.f32 %v4506_v0, %v665_v2 }
 0x2f0   :  { %v675_v5 = vadd.f32 %v4507_v3, %v670_v4 }
 0x2f2   :  { %v708_v6 = vpack.c.bf16 %v675_v5, %v675_v5 }
 0x2f4   :  { %853 = vmatmul.bf16.vlgmr.msra.gmra.mxu0 %v708_v6  ;;  %866 = vmatmul.bf16.vlgmr.msra.gmra.mxu1 %v708_v6 }
 0x2f5   :  { %879 = vmatmul.bf16.vlgmr.msra.gmra.mxu2 %v708_v6 }
 0x371   :  { %v854_v10 = vpop.f32.mrf.mxu0  ;;  %v867_v11 = vpop.f32.mrf.mxu1 }
 0x372   :  { %v868_v12 = vadd.f32 %v867_v11, %v712_v8  ;;  %v855_v51 = vadd.f32 %v854_v10, %v711_v9 }
 0x374   :  { %949 = vrot.lane.b32.xlu2 %v868_v12, %s5355_s15  ;;  %3585 = vmatpush.xpose.msk.msrb.mxu1 %vm884_vm4, %v868_v12 }
 0x377   :  { %3586 = vmatmul.msk.f32.vlgmr.msrb.gmra.mxu1 %vm884_vm4, %v855_v51 }
 0x378   :  { %v880_v14 = vpop.f32.mrf.mxu2 }
 0x379   :  { %v5781_v15 = vadd.f32 %v880_v14, %v713_v13  ;;  %v856_v16 = vpop.f32.mrf.mxu0  ;;  %v869_v17 = vpop.f32.mrf.mxu1  ;;  %v4266_v13 = vld [vmem:[#allocation13 + $0x38] sm:$0xff]  ;;  %v4265_v14 = vld [vmem:[#allocation13 + $0x30] sm:$0xff] }
 0x37a   :  { %1232 = vmatpush.bf16.msrb.mxu2 %v4266_v13  ;;  %v4263_v16 = vld [vmem:[#allocation13 + $0x20] sm:$0xff]  ;;  %v4262_v17 = vld [vmem:[#allocation13 + $0x18] sm:$0xff]  ;;  %v4269_v13 = vld [vmem:[#allocation14 + $0x14] sm:$0xf] }
 0x37b   :  { %942 = vmatpush.msra.mxu3 %v5781_v15 }
 0x37c   :  { %947 = vrot.lane.b32.xlu2 %v855_v51, %s5355_s15 }
 0x37e   :  { %1233 = vmatpush.bf16.msrb.mxu2 %v4265_v14 }
 0x380   :  { %v882_v18 = vpop.f32.mrf.mxu2 }
 0x381   :  { %v4261_v18 = vld [vmem:[#allocation13 + $0x10] sm:$0xff] }
 0x384   :  { %988 = vrot.lane.b32.xlu2 %v5781_v15, %s5355_s15 }
 0x38c   :  { %1082 = vrot.lane.b32.xlu2 %v868_v12, %s5356_s0 }
 0x394   :  { %1080 = vrot.lane.b32.xlu2 %v855_v51, %s5356_s0 }
 0x3ce   :  { %v950_v19 = vpop.permute.xlu2 %949 }
 0x3cf   :  { %3588 = vmatpush.xpose.msk.msrb.mxu3 %vm884_vm4, %v950_v19  ;;  %v4260_v19 = vld [vmem:[#allocation13 + $0x8] sm:$0xff] }
 0x3d6   :  { %v948_v20 = vpop.permute.xlu2 %947 }
 0x3de   :  { %v989_v21 = vpop.permute.xlu2 %988 }
 0x3e6   :  { %v1083_v22 = vpop.permute.xlu2 %1082 }
 0x3e7   :  { %3594 = vmatpush.xpose.msk.msra.mxu1 %vm884_vm4, %v1083_v22 }
 0x3ee   :  { %v1081_v23 = vpop.permute.xlu2 %1080 }
 0x3ef   :  { %3595 = vmatmul.msk.f32.vlgmr.msra.gmra.mxu1 %vm884_vm4, %v1081_v23 }
 0x3f4   :  { %v908_v24 = vpop.f32.mrf.mxu1 }
 0x3f5   :  { %v911_v25 = vmul.f32 0.17677669, %v908_v24 }
 0x3f7   :  { %v913_v26 = vsel %vm912_vm5, %v911_v25, -inf }
 0x3f8   :  { %914 = vmax.xlane.f32.xlu1 %v913_v26 }
 0x46b   :  { %v915_v27 = vpop.xlane.xlu1 %914 }
 0x46c   :  { %v916_v28 = vsub.f32 %v911_v25, %v915_v27  ;;  %v1105_v40 = vpop.f32.mrf.mxu1 }
 0x46d   :  { %v1108_v41 = vmul.f32 0.17677669, %v1105_v40 }
 0x46e   :  { %v917_v29 = vmul.f32 1.442695, %v916_v28 }
 0x46f   :  { %v1109_v42 = vsel %vm912_vm5, %v1108_v41, -inf }
 0x470   :  { %4518 = vpow2.f32 %v917_v29  ;;  %v4508_v29 = vld [vmem:[%s6074_s25] ss:$0 sm:$0xff] }
 0x476   :  { %v4519_v30 = vpop.eup %4518 }
 0x477   :  { %v919_v31 = vsel %vm912_vm5, %v4519_v30, 0.0 }
 0x478   :  { %920 = vadd.xlane.f32.xlu1 %v919_v31 }
 0x4eb   :  { %v921_v33 = vpop.xlane.xlu1 %920 }
 0x4ec   :  { %4520 = vrcp.f32 %v921_v33 }
 0x4f2   :  { %v4521_v34 = vpop.eup %4520 }
 0x4f3   :  { %v923_v35 = vmul.f32 %v4521_v34, %v4519_v30 }
 0x4f5   :  { %3587 = vmatmul.msk.f32.vlgmr.msra.gmra.mxu3 %vm912_vm5, %v923_v35  ;;  %v3687_v35 = vld [vmem:[#allocation14 + $0x70] sm:$0xf] }
 0x4f6   :  { %1009 = vmatpush.msra.mxu3 %v989_v21  ;;  %v4259_v21 = vld [vmem:[#allocation13] sm:$0xff] }
 0x4fd   :  { %3589 = vmatmul.msk.f32.vlgmr.msrb.gmra.mxu3 %vm884_vm4, %v948_v20 }
 0x578   :  { %v5796_v36 = vpop.f32.mrf.mxu3 }
 0x580   :  { %v972_v37 = vpop.f32.mrf.mxu3 }
 0x581   :  { %v975_v38 = vmul.f32 0.17677669, %v972_v37  ;;  %v4282_v37 = vld [vmem:[#allocation14 + $0x74] sm:$0xf0] }
 0x583   :  { %v976_v39 = vsel %vm912_vm5, %v975_v38, -inf }
 0x584   :  { %977 = vmax.xlane.f32.xlu0 %v976_v39  ;;  %v3689_v39 = vld [vmem:[#allocation14 + $0x78] sm:$0xf0] }
 0x598   :  { %1016 = vrot.lane.b32.xlu0 %v868_v12, %s5340_s13 }
 0x5c2   :  { %1110 = vmax.xlane.f32.xlu0 %v1109_v42 }
 0x5d6   :  { %1054 = vrot.lane.b32.xlu0 %v5781_v15, %s5340_s13 }
 0x5f7   :  { %v978_v43 = vpop.xlane.xlu0 %977 }
 0x5f8   :  { %v979_v44 = vsub.f32 %v975_v38, %v978_v43  ;;  %v3688_v38 = vor.u32 %v4282_v37, %v3687_v35  ;;  %v4287_v35 = vld [vmem:[#allocation16 + $0x20] sm:$0xff] }
 0x5fa   :  { %v980_v45 = vmul.f32 1.442695, %v979_v44  ;;  %v3679_v44 = vld [vmem:[#allocation14 + $0x60] sm:$0xf] }
 0x5fc   :  { %4522 = vpow2.f32 %v980_v45  ;;  %v4280_v45 = vld [vmem:[#allocation14 + $0x64] sm:$0xf0] }
 0x602   :  { %v4523_v46 = vpop.eup %4522 }
 0x603   :  { %v982_v47 = vsel %vm912_vm5, %v4523_v46, 0.0 }
 0x604   :  { %983 = vadd.xlane.f32.xlu1 %v982_v47  ;;  %v3680_v47 = vor.u32 %v4280_v45, %v3679_v44 }
 0x60a   :  { %v1017_v49 = vpop.permute.xlu0 %1016 }
 0x60b   :  { %3591 = vmatpush.xpose.msk.msrb.mxu3 %vm884_vm4, %v1017_v49  ;;  %v3681_v49 = vld [vmem:[#allocation14 + $0x68] sm:$0xf0] }
 0x61d   :  { %1014 = vrot.lane.b32.xlu1 %v855_v51, %s5340_s13 }
 0x635   :  { %v1111_v52 = vpop.xlane.xlu0 %1110 }
 0x636   :  { %v1112_v58 = vsub.f32 %v1108_v41, %v1111_v52  ;;  %v3671_v52 = vld [vmem:[#allocation14 + $0x50] sm:$0xf] }
 0x638   :  { %v1113_v59 = vmul.f32 1.442695, %v1112_v58  ;;  %v3663_v58 = vld [vmem:[#allocation14 + $0x40] sm:$0xf] }
 0x648   :  { %v1055_v55 = vpop.permute.xlu0 %1054 }
 0x677   :  { %v984_v50 = vpop.xlane.xlu1 %983 }
 0x678   :  { %4524 = vrcp.f32 %v984_v50 }
 0x679   :  { %4526 = vpow2.f32 %v1113_v59  ;;  %v4276_v59 = vld [vmem:[#allocation14 + $0x44] sm:$0xf0] }
 0x67e   :  { %v4525_v53 = vpop.eup %4524 }
 0x67f   :  { %v986_v54 = vmul.f32 %v4525_v53, %v4523_v46  ;;  %v4527_v63 = vpop.eup %4526  ;;  %v4279_v46 = vld [vmem:[#allocation14 + $0x64] sm:$0xf]  ;;  %v4278_v53 = vld [vmem:[#allocation14 + $0x54] sm:$0xf0] }
 0x680   :  { %v1115_v0 = vsel %vm912_vm5, %v4527_v63, 0.0  ;;  %v3684_v50 = vor.u32 %v4279_v46, %v3681_v49  ;;  %v4510_v49 = vld [vmem:[%s6076_s12] ss:$0 sm:$0xff] }
 0x681   :  { %3590 = vmatmul.msk.f32.vlgmr.msra.gmra.mxu3 %vm912_vm5, %v986_v54  ;;  %v4277_v54 = vld [vmem:[#allocation14 + $0x54] sm:$0xf] }
 0x682   :  { %1075 = vmatpush.msra.mxu3 %v1055_v55  ;;  %v3672_v55 = vor.u32 %v4278_v53, %v3671_v52 }
 0x68f   :  { %v1015_v56 = vpop.permute.xlu1 %1014 }
 0x690   :  { %3592 = vmatmul.msk.f32.vlgmr.msrb.gmra.mxu3 %vm884_vm4, %v1015_v56  ;;  %v3673_v56 = vld [vmem:[#allocation14 + $0x58] sm:$0xf0] }
 0x691   :  { %1379 = vmatpush.bf16.msrb.mxu3 %v3688_v38  ;;  %v4294_v38 = vld [vmem:[#allocation16 + $0x58] sm:$0xff] }
 0x695   :  { %1380 = vmatpush.bf16.msrb.mxu3 %v3680_v47 }
 0x699   :  { %1381 = vmatpush.bf16.msrb.mxu3 %v3672_v55  ;;  %v4285_v55 = vld [vmem:[#allocation16 + $0x10] sm:$0xff] }
 0x704   :  { %v1011_v57 = vpop.f32.mrf.mxu3 }
 0x713   :  { %v1039_v60 = vpop.f32.mrf.mxu3 }
 0x714   :  { %v1042_v61 = vmul.f32 0.17677669, %v1039_v60  ;;  %v4275_v60 = vld [vmem:[#allocation14 + $0x44] sm:$0xf] }
 0x716   :  { %v1043_v62 = vsel %vm912_vm5, %v1042_v61, -inf }
 0x717   :  { %1044 = vmax.xlane.f32.xlu2 %v1043_v62  ;;  %v3665_v62 = vld [vmem:[#allocation14 + $0x48] sm:$0xf0] }
 0x71f   :  { %1116 = vadd.xlane.f32.xlu2 %v1115_v0  ;;  %v3655_v0 = vld [vmem:[#allocation14 + $0x30] sm:$0xf] }
 0x737   :  { %1120 = vrot.lane.b32.xlu2 %v5781_v15, %s5356_s0  ;;  %v4264_v15 = vld [vmem:[#allocation13 + $0x28] sm:$0xff] }
 0x738   :  { %1234 = vmatpush.bf16.msrb.mxu2 %v4264_v15  ;;  %v3641_v15 = vld [vmem:[#allocation14 + $0x18] sm:$0xf0] }
 0x73c   :  { %1235 = vmatpush.bf16.msrb.mxu2 %v4263_v16  ;;  %v3631_v16 = vld [vmem:[#allocation14] sm:$0xf] }
 0x740   :  { %1236 = vmatpush.bf16.msrb.mxu2 %v4262_v17  ;;  %v4268_v17 = vld [vmem:[#allocation14 + $0x4] sm:$0xf0] }
 0x744   :  { %1237 = vmatpush.bf16.msrb.mxu2 %v4261_v18  ;;  %v3644_v18 = vor.u32 %v4269_v13, %v3641_v15  ;;  %v4314_v15 = vld [vmem:[#allocation31 + $0x74] sm:$0xf0] }
 0x748   :  { %1238 = vmatpush.bf16.msrb.mxu2 %v4260_v19  ;;  %v4267_v19 = vld [vmem:[#allocation14 + $0x4] sm:$0xf] }
 0x74c   :  { %1239 = vmatpush.bf16.msrb.mxu2 %v4259_v21  ;;  %v3632_v21 = vor.u32 %v4268_v17, %v3631_v16  ;;  %v4313_v16 = vld [vmem:[#allocation31 + $0x74] sm:$0xf] }
 0x78a   :  { %v1045_v1 = vpop.xlane.xlu2 %1044 }
 0x78b   :  { %v1046_v2 = vsub.f32 %v1042_v61, %v1045_v1  ;;  %v3664_v61 = vor.u32 %v4276_v59, %v3663_v58  ;;  %v4274_v1 = vld [vmem:[#allocation14 + $0x34] sm:$0xf0]  ;;  %v4283_v58 = vld [vmem:[#allocation16] sm:$0xff] }
 0x78c   :  { %v1293_v59 = vld [vmem:[%s6077_s30] sm:$0x3] }
 0x78d   :  { %v1047_v3 = vmul.f32 1.442695, %v1046_v2  ;;  %1382 = vmatpush.bf16.msrb.mxu3 %v3664_v61  ;;  %v4273_v2 = vld [vmem:[#allocation14 + $0x34] sm:$0xf] }
 0x78f   :  { %4528 = vpow2.f32 %v1047_v3  ;;  %v3656_v3 = vor.u32 %v4274_v1, %v3655_v0 }
 0x791   :  { %1383 = vmatpush.bf16.msrb.mxu3 %v3656_v3 }
 0x792   :  { %v1117_v4 = vpop.xlane.xlu2 %1116 }
 0x793   :  { %4530 = vrcp.f32 %v1117_v4  ;;  %v3657_v4 = vld [vmem:[#allocation14 + $0x38] sm:$0xf0] }
 0x795   :  { %v4529_v5 = vpop.eup %4528 }
 0x796   :  { %v1049_v6 = vsel %vm912_vm5, %v4529_v5, 0.0 }
 0x797   :  { %1050 = vadd.xlane.f32.xlu1 %v1049_v6  ;;  %v3647_v6 = vld [vmem:[#allocation14 + $0x20] sm:$0xf] }
 0x799   :  { %v4531_v7 = vpop.eup %4530 }
 0x79a   :  { %v1119_v8 = vmul.f32 %v4531_v7, %v4527_v63  ;;  %v1121_v9 = vpop.permute.xlu2 %1120  ;;  %v3668_v63 = vor.u32 %v4275_v60, %v3665_v62  ;;  %v4272_v7 = vld [vmem:[#allocation14 + $0x24] sm:$0xf0] }
 0x79b   :  { %1141 = vmatpush.msrb.mxu1 %v1121_v9  ;;  %v3648_v9 = vor.u32 %v4272_v7, %v3647_v6  ;;  %v4511_v7 = vld [vmem:[%s6078_s27] ss:$0 sm:$0xff] }
 0x79c   :  { %3596 = vmatmul.msk.f32.vlgmr.msrb.gmra.mxu1 %vm912_vm5, %v1119_v8  ;;  %v4271_v8 = vld [vmem:[#allocation14 + $0x24] sm:$0xf] }
 0x79d   :  { %1384 = vmatpush.bf16.msrb.mxu3 %v3648_v9 }
 0x7b0   :  { %1147 = vrot.lane.b32.xlu1 %v1011_v57, %s5356_s0  ;;  %v3676_v57 = vor.u32 %v4277_v54, %v3673_v56  ;;  %v4292_v54 = vld [vmem:[#allocation16 + $0x48] sm:$0xff]  ;;  %v4291_v56 = vld [vmem:[#allocation16 + $0x40] sm:$0xff] }
 0x80a   :  { %v1051_v10 = vpop.xlane.xlu1 %1050 }
 0x80b   :  { %4532 = vrcp.f32 %v1051_v10  ;;  %v3649_v10 = vld [vmem:[#allocation14 + $0x28] sm:$0xf0] }
 0x811   :  { %v4533_v11 = vpop.eup %4532 }
 0x812   :  { %v1053_v12 = vmul.f32 %v4533_v11, %v4529_v5  ;;  %v3660_v5 = vor.u32 %v4273_v2, %v3657_v4  ;;  %v3652_v11 = vor.u32 %v4271_v8, %v3649_v10 }
 0x814   :  { %3593 = vmatmul.msk.f32.vlgmr.msra.gmra.mxu3 %vm912_vm5, %v1053_v12  ;;  %v3639_v12 = vld [vmem:[#allocation14 + $0x10] sm:$0xf] }
 0x819   :  { %v1143_v51 = vpop.f32.mrf.mxu1 }
 0x81a   :  { %1155 = vrot.lane.b32.xlu2 %v1143_v51, %s5355_s15  ;;  %v4270_v51 = vld [vmem:[#allocation14 + $0x14] sm:$0xf0] }
 0x81b   :  { %v3640_v14 = vor.u32 %v4270_v51, %v3639_v12 }
 0x81d   :  { %1385 = vmatpush.bf16.msrb.mxu3 %v3640_v14  ;;  %v3815_v14 = vld [vmem:[#allocation31 + $0x70] sm:$0xf] }
 0x81e   :  { %v3816_v17 = vor.u32 %v4314_v15, %v3815_v14  ;;  %v4513_v15 = vld [vmem:[%s6080_s28] ss:$0 sm:$0xff] }
 0x821   :  { %1386 = vmatpush.bf16.msrb.mxu3 %v3632_v21 }
 0x822   :  { %v1148_v22 = vpop.permute.xlu1 %1147 }
 0x823   :  { %v1158_v23 = vsel %vm884_vm4, %v5796_v36, %v1148_v22  ;;  %v4281_v36 = vld [vmem:[#allocation14 + $0x74] sm:$0xf] }
 0x824   :  { %v3692_v40 = vor.u32 %v4281_v36, %v3689_v39  ;;  %v4286_v39 = vld [vmem:[#allocation16 + $0x18] sm:$0xff] }
 0x825   :  { %1701 = vmatpush.bf16.msra.mxu3 %v3816_v17 }
 0x826   :  { %1392 = vmatpush.bf16.msrb.mxu0 %v3692_v40 }
 0x82a   :  { %1393 = vmatpush.bf16.msrb.mxu0 %v3684_v50 }
 0x82e   :  { %1394 = vmatpush.bf16.msrb.mxu0 %v3676_v57  ;;  %v4284_v57 = vld [vmem:[#allocation16 + $0x8] sm:$0xff] }
 0x832   :  { %1395 = vmatpush.bf16.msrb.mxu0 %v3668_v63  ;;  %v1295_v63 = vperm.slane %v1293_v59, 0 }
 0x836   :  { %1396 = vmatpush.bf16.msrb.mxu0 %v3660_v5 }
 0x83a   :  { %1397 = vmatpush.bf16.msrb.mxu0 %v3652_v11 }
 0x83e   :  { %1398 = vmatpush.bf16.msrb.mxu0 %v3644_v18  ;;  %v3817_v18 = vld [vmem:[#allocation31 + $0x78] sm:$0xf0] }
 0x874   :  { %v1156_v25 = vpop.permute.xlu2 %1155 }
 0x897   :  { %v1077_v20 = vpop.f32.mrf.mxu3 }
 0x898   :  { %1151 = vrot.lane.b32.xlu0 %v1077_v20, %s5340_s13  ;;  %v3633_v20 = vld [vmem:[#allocation14 + $0x8] sm:$0xf0]  ;;  %s6075_s13 = sld [smem:[#allocation73_spill]] }
 0x899   :  { %v3636_v22 = vor.u32 %v4267_v19, %v3633_v20  ;;  %v3820_v19 = vor.u32 %v4313_v16, %v3817_v18 }
 0x89b   :  { %1399 = vmatpush.bf16.msrb.mxu0 %v3636_v22 }
 0x89e   :  { %v4509_v45 = vld [vmem:[%s6075_s13] ss:$0 sm:$0xff] }
 0x89f   :  { %1714 = vmatpush.bf16.msra.mxu0 %v3820_v19  ;;  %v1731_v19 = vld [vmem:[%s6081_s29] sm:$0xff] }
 0x8a0   :  { %1733 = vst.msk [vmem:[%s5587_s17] sm:$0xff] %vm1732_vm14, %v1731_v19 }
 0x90a   :  { %v1152_v24 = vpop.permute.xlu0 %1151 }
 0x90b   :  { %v1160_v26 = vsel %vm1159_vm6, %v1158_v23, %v1152_v24  ;;  %v4298_v23 = vld [vmem:[#allocation16 + $0x78] sm:$0xff] }
 0x90c   :  { %v1162_v27 = vsel %vm1161_vm7, %v1160_v26, %v1156_v25  ;;  %v4290_v24 = vld [vmem:[#allocation16 + $0x38] sm:$0xff]  ;;  %1554 = vmatpush.bf16.msra.mxu2 %v4298_v23 }
 0x90d   :  { %v1179_v28 = vpack.c.bf16 %v1162_v27, %v1162_v27  ;;  %v4297_v27 = vld [vmem:[#allocation16 + $0x70] sm:$0xff]  ;;  %1541 = vmatpush.bf16.msra.mxu1 %v4290_v24 }
 0x90e   :  { %v4312_v24 = vld [vmem:[#allocation31 + $0x64] sm:$0xf0] }
 0x90f   :  { %1240 = vmatmul.bf16.vlgmr.msrb.gmra.mxu2 %v1179_v28  ;;  %v4289_v28 = vld [vmem:[#allocation16 + $0x30] sm:$0xff] }
 0x910   :  { %1555 = vmatpush.bf16.msra.mxu2 %v4297_v27  ;;  %v3809_v27 = vld [vmem:[#allocation31 + $0x68] sm:$0xf0] }
 0x911   :  { %1542 = vmatpush.bf16.msra.mxu1 %v4289_v28 }
 0x992   :  { %v1241_v30 = vpop.f32.mrf.mxu2 }
 0x993   :  { %v1242_v31 = vadd.f32 %v4508_v29, %v1241_v30  ;;  %v4296_v30 = vld [vmem:[#allocation16 + $0x68] sm:$0xff] }
 0x994   :  { %1556 = vmatpush.bf16.msra.mxu2 %v4296_v30  ;;  %v4310_v30 = vld [vmem:[#allocation31 + $0x54] sm:$0xf0] }
 0x995   :  { %v5824_v33 = vadd.f32 %v1242_v31, %v5762_v32  ;;  %v4288_v31 = vld [vmem:[#allocation16 + $0x28] sm:$0xff] }
 0x996   :  { %1543 = vmatpush.bf16.msra.mxu1 %v4288_v31  ;;  %v4309_v31 = vld [vmem:[#allocation31 + $0x54] sm:$0xf] }
 0x997   :  { %1246 = vadd.xlane.f32.xlu0 %v5824_v33 }
 0x99a   :  { %v1243_v34 = vpop.f32.mrf.mxu2  ;;  %1544 = vmatpush.bf16.msra.mxu1 %v4287_v35  ;;  %v3801_v35 = vld [vmem:[#allocation31 + $0x58] sm:$0xf0] }
 0x99b   :  { %v4295_v34 = vld [vmem:[#allocation16 + $0x60] sm:$0xff] }
 0x99c   :  { %1557 = vmatpush.bf16.msra.mxu2 %v4295_v34 }
 0x99e   :  { %1545 = vmatpush.bf16.msra.mxu1 %v4286_v39  ;;  %v4307_v39 = vld [vmem:[#allocation31 + $0x44] sm:$0xf] }
 0x9a0   :  { %1558 = vmatpush.bf16.msra.mxu2 %v4294_v38  ;;  %v4308_v38 = vld [vmem:[#allocation31 + $0x44] sm:$0xf0] }
 0x9a2   :  { %1546 = vmatpush.bf16.msra.mxu1 %v4285_v55  ;;  %v3777_v55 = vld [vmem:[#allocation31 + $0x28] sm:$0xf0] }
 0x9a6   :  { %1547 = vmatpush.bf16.msra.mxu1 %v4284_v57  ;;  %v3767_v57 = vld [vmem:[#allocation31 + $0x10] sm:$0xf] }
 0x9aa   :  { %1548 = vmatpush.bf16.msra.mxu1 %v4283_v58  ;;  %v4302_v58 = vld [vmem:[#allocation31 + $0x14] sm:$0xf0] }
 0xa0a   :  { %v1247_v41 = vpop.xlane.xlu0 %1246 }
 0xa0b   :  { %v1248_v42 = vmul.f32 %v1247_v41, %v5765_v48 }
 0xa0d   :  { %v5829_v43 = vsub.f32 %v5824_v33, %v1248_v42  ;;  %v4293_v42 = vld [vmem:[#allocation16 + $0x50] sm:$0xff] }
 0xa0e   :  { %1559 = vmatpush.bf16.msra.mxu2 %v4293_v42 }
 0xa0f   :  { %v1250_v32 = vmul.f32 %v5829_v43, %v5829_v43 }
 0xa11   :  { %1251 = vadd.xlane.f32.xlu1 %v1250_v32 }
 0xa12   :  { %1560 = vmatpush.bf16.msra.mxu2 %v4292_v54 }
 0xa16   :  { %1561 = vmatpush.bf16.msra.mxu2 %v4291_v56 }
 0xa84   :  { %v1252_v25 = vpop.xlane.xlu1 %1251 }
 0xa85   :  { %v1253_v26 = vmul.f32 %v1252_v25, %v5765_v48  ;;  %v4311_v25 = vld [vmem:[#allocation31 + $0x64] sm:$0xf] }
 0xa86   :  { %v3812_v28 = vor.u32 %v4311_v25, %v3809_v27 }
 0xa87   :  { %v1254_v29 = vadd.f32 1e-05, %v1253_v26 }
 0xa88   :  { %1715 = vmatpush.bf16.msra.mxu0 %v3812_v28 }
 0xa89   :  { %4534 = vrsqrt.f32 %v1254_v29  ;;  %vm1261_vm9 = vweird.f32 %v1254_v29 }
 0xa8f   :  { %v4535_v37 = vpop.eup %4534 }
 0xa90   :  { %v1256_v36 = vmul.f32 %v4535_v37, %v1254_v29  ;;  %vm1262_vm8 = vweird.f32 %v4535_v37  ;;  %v3799_v29 = vld [vmem:[#allocation31 + $0x50] sm:$0xf] }
 0xa91   :  { %vm1263_vm10 = vmor %vm1261_vm9, %vm1262_vm8  ;;  %v3800_v34 = vor.u32 %v4310_v30, %v3799_v29 }
 0xa92   :  { %v1257_v40 = vmul.f32 %v4535_v37, %v1256_v36  ;;  %v3791_v36 = vld [vmem:[#allocation31 + $0x40] sm:$0xf] }
 0xa94   :  { %v1258_v41 = vmul.f32 0.5, %v1257_v40  ;;  %v3792_v40 = vor.u32 %v4308_v38, %v3791_v36 }
 0xa96   :  { %v1259_v32 = vsub.f32 1.5, %v1258_v41  ;;  %v3793_v41 = vld [vmem:[#allocation31 + $0x48] sm:$0xf0] }
 0xa97   :  { %v3796_v42 = vor.u32 %v4307_v39, %v3793_v41 }
 0xa98   :  { %v1260_v44 = vmul.f32 %v4535_v37, %v1259_v32  ;;  %v3783_v32 = vld [vmem:[#allocation31 + $0x30] sm:$0xf] }
 0xa9a   :  { %v1264_v46 = vsel %vm1263_vm10, %v4535_v37, %v1260_v44  ;;  %v3804_v37 = vor.u32 %v4309_v31, %v3801_v35  ;;  %v4306_v44 = vld [vmem:[#allocation31 + $0x34] sm:$0xf0] }
 0xa9b   :  { %v1265_v47 = vmul.f32 %v1264_v46, %v5829_v43  ;;  %v1296_v43 = vperm.slane %v1293_v59, 1  ;;  %v3784_v46 = vor.u32 %v4306_v44, %v3783_v32  ;;  %v4301_v59 = vld [vmem:[#allocation31 + $0x14] sm:$0xf] }
 0xa9c   :  { %1716 = vmatpush.bf16.msra.mxu0 %v3804_v37 }
 0xa9d   :  { %v1270_v50 = vmul.f32 %v4509_v45, %v1265_v47  ;;  %v4305_v45 = vld [vmem:[#allocation31 + $0x34] sm:$0xf]  ;;  %v3785_v47 = vld [vmem:[#allocation31 + $0x38] sm:$0xf0] }
 0xa9f   :  { %v1275_v52 = vadd.f32 %v4510_v49, %v1270_v50  ;;  %v3788_v49 = vor.u32 %v4305_v45, %v3785_v47  ;;  %v3775_v50 = vld [vmem:[#allocation31 + $0x20] sm:$0xf] }
 0xaa0   :  { %1717 = vmatpush.bf16.msra.mxu0 %v3796_v42 }
 0xaa1   :  { %v1292_v53 = vpack.c.bf16 %v1275_v52, %v1275_v52  ;;  %v4304_v52 = vld [vmem:[#allocation31 + $0x24] sm:$0xf0] }
 0xaa2   :  { %v3776_v54 = vor.u32 %v4304_v52, %v3775_v50 }
 0xaa3   :  { %1387 = vmatmul.bf16.vlgmr.msrb.gmra.mxu3 %v1292_v53  ;;  %1400 = vmatmul.bf16.vlgmr.msrb.gmra.mxu0 %v1292_v53  ;;  %v4303_v53 = vld [vmem:[#allocation31 + $0x24] sm:$0xf] }
 0xaa4   :  { %1718 = vmatpush.bf16.msra.mxu0 %v3788_v49  ;;  %v3780_v56 = vor.u32 %v4303_v53, %v3777_v55 }
 0xaa8   :  { %1719 = vmatpush.bf16.msra.mxu0 %v3780_v56 }
 0xb20   :  { %v1401_v60 = vpop.f32.mrf.mxu0 }
 0xb21   :  { %v1402_v61 = vadd.f32 %v1401_v60, %v1296_v43  ;;  %v3768_v43 = vor.u32 %v4302_v58, %v3767_v57  ;;  %v3769_v60 = vld [vmem:[#allocation31 + $0x18] sm:$0xf0] }
 0xb23   :  { %v1406_v62 = vmax.f32 %v1402_v61, 0.0  ;;  %v3759_v61 = vld [vmem:[#allocation31] sm:$0xf] }
 0xb25   :  { %v1440_v0 = vpack.c.bf16 %v1406_v62, %v1406_v62  ;;  %v4300_v62 = vld [vmem:[#allocation31 + $0x4] sm:$0xf0] }
 0xb26   :  { %v1388_v1 = vpop.f32.mrf.mxu3 }
 0xb27   :  { %v1389_v2 = vadd.f32 %v1388_v1, %v1295_v63  ;;  %1562 = vmatmul.bf16.vlgmr.msra.gmra.mxu2 %v1440_v0  ;;  %v3772_v63 = vor.u32 %v4301_v59, %v3769_v60  ;;  %v4299_v0 = vld [vmem:[#allocation31 + $0x4] sm:$0xf]  ;;  %v3761_v1 = vld [vmem:[#allocation31 + $0x8] sm:$0xf0] }
 0xb28   :  { %v1403_v3 = vpop.f32.mrf.mxu0 }
 0xb29   :  { %v1405_v4 = vmax.f32 %v1389_v2, 0.0  ;;  %v3760_v2 = vor.u32 %v4300_v62, %v3759_v61  ;;  %1720 = vmatpush.bf16.msra.mxu0 %v3772_v63  ;;  %v3764_v3 = vor.u32 %v4299_v0, %v3761_v1 }
 0xb2b   :  { %v1439_v5 = vpack.c.bf16 %v1405_v4, %v1405_v4 }
 0xb2d   :  { %1549 = vmatmul.bf16.vlgmr.msra.gmra.mxu1 %v1439_v5  ;;  %1721 = vmatpush.bf16.msra.mxu0 %v3764_v3 }
 0xb2e   :  { %v1390_v6 = vpop.f32.mrf.mxu3 }
 0xbaa   :  { %v1550_v8 = vpop.f32.mrf.mxu1  ;;  %v1563_v9 = vpop.f32.mrf.mxu2 }
 0xbab   :  { %v1551_v10 = vadd.f32 %v4511_v7, %v1550_v8 }
 0xbad   :  { %v1564_v11 = vadd.f32 %v1563_v9, %v1551_v10 }
 0xbaf   :  { %v1567_v12 = vadd.f32 %v1564_v11, %v5824_v33  ;;  %v3807_v33 = vld [vmem:[#allocation31 + $0x60] sm:$0xf] }
 0xbb0   :  { %v3808_v26 = vor.u32 %v4312_v24, %v3807_v33 }
 0xbb1   :  { %1568 = vadd.xlane.f32.xlu2 %v1567_v12 }
 0xbb2   :  { %v1552_v51 = vpop.f32.mrf.mxu1  ;;  %v1565_v13 = vpop.f32.mrf.mxu2  ;;  %1702 = vmatpush.bf16.msra.mxu3 %v3808_v26 }
 0xbb3   :  { %v4512_v51 = vld [vmem:[%s6079_s18] ss:$0 sm:$0xff] }
 0xbb6   :  { %1703 = vmatpush.bf16.msra.mxu3 %v3800_v34 }
 0xbba   :  { %1704 = vmatpush.bf16.msra.mxu3 %v3792_v40 }
 0xbbe   :  { %1705 = vmatpush.bf16.msra.mxu3 %v3784_v46 }
 0xbc2   :  { %1706 = vmatpush.bf16.msra.mxu3 %v3776_v54 }
 0xbc6   :  { %1707 = vmatpush.bf16.msra.mxu3 %v3768_v43 }
 0xbca   :  { %1708 = vmatpush.bf16.msra.mxu3 %v3760_v2 }
 0xc24   :  { %v1569_v20 = vpop.xlane.xlu2 %1568 }
 0xc25   :  { %v1570_v21 = vmul.f32 %v1569_v20, %v5765_v48  ;;  %v5357_v20 = vmov 0.0  }
 0xc26   :  { %1729 = vst [vmem:[#allocation5] sm:$0xff] %v5357_v20 }
 0xc27   :  { %v5841_v22 = vsub.f32 %v1567_v12, %v1570_v21  ;;  %1730 = vst [vmem:[#allocation6] sm:$0xff] %v5357_v20  ;;  %v1615_v21 = vld [vmem:[#allocation32] sm:$0x3] }
 0xc28   :  { %v1617_v25 = vperm.slane %v1615_v21, 0 }
 0xc29   :  { %v1572_v23 = vmul.f32 %v5841_v22, %v5841_v22 }
 0xc2b   :  { %1573 = vadd.xlane.f32.xlu0 %v1572_v23  ;;  %v1618_v23 = vperm.slane %v1615_v21, 1 }
 0xc9e   :  { %v1574_v4 = vpop.xlane.xlu0 %1573 }
 0xc9f   :  { %v1575_v5 = vmul.f32 %v1574_v4, %v5765_v48 }
 0xca1   :  { %v1576_v6 = vadd.f32 1e-05, %v1575_v5 }
 0xca3   :  { %4536 = vrsqrt.f32 %v1576_v6  ;;  %vm1583_vm12 = vweird.f32 %v1576_v6 }
 0xca9   :  { %v4537_v7 = vpop.eup %4536 }
 0xcaa   :  { %v1578_v8 = vmul.f32 %v4537_v7, %v1576_v6  ;;  %vm1584_vm11 = vweird.f32 %v4537_v7 }
 0xcab   :  { %vm1585_vm13 = vmor %vm1583_vm12, %vm1584_vm11 }
 0xcac   :  { %v1579_v9 = vmul.f32 %v4537_v7, %v1578_v8 }
 0xcae   :  { %v1580_v10 = vmul.f32 0.5, %v1579_v9 }
 0xcb0   :  { %v1581_v11 = vsub.f32 1.5, %v1580_v10 }
 0xcb2   :  { %v1582_v12 = vmul.f32 %v4537_v7, %v1581_v11 }
 0xcb4   :  { %v1586_v13 = vsel %vm1585_vm13, %v4537_v7, %v1582_v12 }
 0xcb5   :  { %v1587_v14 = vmul.f32 %v1586_v13, %v5841_v22 }
 0xcb7   :  { %v1592_v16 = vmul.f32 %v4512_v51, %v1587_v14 }
 0xcb9   :  { %v1597_v17 = vadd.f32 %v4513_v15, %v1592_v16 }
 0xcbb   :  { %v1614_v18 = vpack.c.bf16 %v1597_v17, %v1597_v17 }
 0xcbd   :  { %1709 = vmatmul.bf16.vlgmr.msra.gmra.mxu3 %v1614_v18  ;;  %1722 = vmatmul.bf16.vlgmr.msra.gmra.mxu0 %v1614_v18 }
 0xd3a   :  { %v1723_v33 = vpop.f32.mrf.mxu0 }
 0xd3b   :  { %v1724_v24 = vadd.f32 %v1723_v33, %v1618_v23 }
 0xd3d   :  { %1728 = vst [vmem:[#allocation4] sm:$0xff] %v1724_v24 }
 0xd40   :  { %v1710_v26 = vpop.f32.mrf.mxu3 }
 0xd41   :  { %v1711_v22 = vadd.f32 %v1710_v26, %v1617_v25 }
 0xd42   :  { %v1725_v27 = vpop.f32.mrf.mxu0 }
 0xd43   :  { %1727 = vst [vmem:[#allocation3] sm:$0xff] %v1711_v22 }
 0xd48   :  { %v1712_v28 = vpop.f32.mrf.mxu3 }
 0xd49 LB: > { %v1769_v29 = vld [vmem:[#allocation10 + $0x78] sm:$0xff]  ;;  %v1768_v31 = vld [vmem:[#allocation10 + $0x70] sm:$0xff]  ;;  %v5358_v34 = vmov 0   ;;  %s5858_s22 = scalar_lea.vmem %s5587_s17, %s5275_s26  ;;  %v1767_v37 = vld [vmem:[#allocation10 + $0x68] sm:$0xff]  ;;  %s6082_s9 = sld [smem:[#allocation67_spill]]  ;;  %v1742_v2 = vlaneseq  ;;  %v5359_v6 = vmov 1.0   ;;  %s5275_s26 = sphi %s5851_s26, %s1739_s26  }
 0xd4a   : > { %v1785_v30 = vld [vmem:[#allocation10 + $0xf8] sm:$0xff]  ;;  %4538 = vset.pattern.permute.xlu0 %v5358_v34  ;;  %1786 = vmatpush.msra.mxu0 %v1769_v29  ;;  %v1784_v35 = vld [vmem:[#allocation10 + $0xf0] sm:$0xff]  ;;  %v1783_v38 = vld [vmem:[#allocation10 + $0xe8] sm:$0xff]  ;;  %vm1830_vm1 = vcmask 1040384   ;;  %s6083_s1 = sld [smem:[#allocation81_spill]]  ;;  %s2067_s19 = scalar_lea.vmem [#allocation6], %s5275_s26 }
 0xd4b   : > { %1806 = vmatpush.msra.mxu1 %v1785_v30  ;;  %v1741_v36 = vld [vmem:[%s5858_s22] sm:$0x1]  ;;  %v1766_v39 = vld [vmem:[#allocation10 + $0x60] sm:$0xff]  ;;  %v1764_v32 = vld [vmem:[#allocation10 + $0x50] sm:$0xff]  ;;  %v5861_v3 = vand.u32 127, %v1742_v2  ;;  %s2065_s6 = scalar_lea.vmem [#allocation5], %s5275_s26 }
 0xd4c   : > { %1787 = vmatpush.msra.mxu0 %v1768_v31  ;;  %1746 = vperm.xlu0 %4538, %v1741_v36   ;;  %v1782_v40 = vld [vmem:[#allocation10 + $0xe0] sm:$0xff]  ;;  %v1765_v41 = vld [vmem:[#allocation10 + $0x58] sm:$0xff]  ;;  %v1780_v44 = vld [vmem:[#allocation10 + $0xd0] sm:$0xff]  ;;  %s5360_s21 = smov 96   ;;  %s5361_s16 = smov 64   ;;  %vm2102_vm10 = vcmask 57344  }
 0xd4d   : > { %1807 = vmatpush.msra.mxu1 %v1784_v35  ;;  %v1781_v42 = vld [vmem:[#allocation10 + $0xd8] sm:$0xff]  ;;  %v1763_v45 = vld [vmem:[#allocation10 + $0x48] sm:$0xff]  ;;  %v1762_v47 = vld [vmem:[#allocation10 + $0x40] sm:$0xff]  ;;  %v5864_v4 = vadd.s32 128, %v5861_v3  ;;  %s5363_s11 = smov 32   ;;  %p4233_p0 = scmp.lt.s32.totalorder %s5275_s26, 1 }
 0xd4e   : > { %1788 = vmatpush.msra.mxu0 %v1767_v37  ;;  %v1779_v46 = vld [vmem:[#allocation10 + $0xc8] sm:$0xff]  ;;  %v1778_v49 = vld [vmem:[#allocation10 + $0xc0] sm:$0xff]  ;;  %v1761_v50 = vld [vmem:[#allocation10 + $0x38] sm:$0xff] }
 0xd4f   : > { %1808 = vmatpush.msra.mxu1 %v1783_v38  ;;  %v1777_v52 = vld [vmem:[#allocation10 + $0xb8] sm:$0xff]  ;;  %v1760_v53 = vld [vmem:[#allocation10 + $0x30] sm:$0xff]  ;;  %v1759_v55 = vld [vmem:[#allocation10 + $0x28] sm:$0xff]  ;;  %s1827_s20 = scalar_lea.vmem %s6082_s9, %s5275_s26 }
 0xd50   : > { %1789 = vmatpush.msra.mxu0 %v1766_v39  ;;  %v1776_v54 = vld [vmem:[#allocation10 + $0xb0] sm:$0xff]  ;;  %v1775_v56 = vld [vmem:[#allocation10 + $0xa8] sm:$0xff]  ;;  %v1758_v57 = vld [vmem:[#allocation10 + $0x20] sm:$0xff] }
 0xd51   : > { %1809 = vmatpush.msra.mxu1 %v1782_v40  ;;  %v1774_v58 = vld [vmem:[#allocation10 + $0xa0] sm:$0xff]  ;;  %v1757_v59 = vld [vmem:[#allocation10 + $0x18] sm:$0xff]  ;;  %v1756_v60 = vld [vmem:[#allocation10 + $0x10] sm:$0xff] }
 0xd52   : > { %1790 = vmatpush.msra.mxu0 %v1765_v41  ;;  %v1773_v43 = vld [vmem:[#allocation10 + $0x98] sm:$0xff]  ;;  %v1772_v61 = vld [vmem:[#allocation10 + $0x90] sm:$0xff]  ;;  %v1755_v62 = vld [vmem:[#allocation10 + $0x8] sm:$0xff] }
 0xd53   : > { %1810 = vmatpush.msra.mxu1 %v1781_v42  ;;  %v1771_v63 = vld [vmem:[#allocation10 + $0x88] sm:$0xff]  ;;  %v1754_v0 = vld [vmem:[#allocation10] sm:$0xff]  ;;  %v1828_v10 = vld [vmem:[%s1827_s20] sm:$0x1] }
 0xd54   : > { %1791 = vmatpush.msra.mxu0 %v1764_v32  ;;  %v1770_v1 = vld [vmem:[#allocation10 + $0x80] sm:$0xff]  ;;  %v3911_v13 = vld [vmem:[#allocation20 + $0xa8] sm:$0xf]  ;;  %v4337_v14 = vld [vmem:[#allocation20 + $0xb0] sm:$0xf0] }
 0xd55   : > { %1811 = vmatpush.msra.mxu1 %v1780_v44  ;;  %v4336_v15 = vld [vmem:[#allocation20 + $0xac] sm:$0xf]  ;;  %v3912_v16 = vor.u32 %v4337_v14, %v3911_v13  ;;  %v3913_v17 = vld [vmem:[#allocation20 + $0xb4] sm:$0xf0]  ;;  %v3919_v18 = vld [vmem:[#allocation20 + $0xb0] sm:$0xf] }
 0xd56   : > { %1792 = vmatpush.msra.mxu0 %v1763_v45  ;;  %v4338_v19 = vld [vmem:[#allocation20 + $0xb8] sm:$0xf0]  ;;  %v3916_v20 = vor.u32 %v4336_v15, %v3913_v17  ;;  %v3899_v22 = vld [vmem:[#allocation20 + $0x90] sm:$0xf]  ;;  %v4333_v28 = vld [vmem:[#allocation20 + $0x94] sm:$0xf] }
 0xd57   : > { %1812 = vmatpush.msra.mxu1 %v1779_v46  ;;  %v3920_v21 = vor.u32 %v4338_v19, %v3919_v18  ;;  %2026 = vmatpush.bf16.msra.mxu2 %v3912_v16  ;;  %v4334_v27 = vld [vmem:[#allocation20 + $0x98] sm:$0xf0]  ;;  %v3901_v30 = vld [vmem:[#allocation20 + $0x9c] sm:$0xf0]  ;;  %v3907_v31 = vld [vmem:[#allocation20 + $0x98] sm:$0xf] }
 0xd58   : > { %1793 = vmatpush.msra.mxu0 %v1762_v47  ;;  %2039 = vmatpush.bf16.msra.mxu3 %v3916_v20  ;;  %v3900_v29 = vor.u32 %v4334_v27, %v3899_v22  ;;  %v4335_v34 = vld [vmem:[#allocation20 + $0xa0] sm:$0xf0]  ;;  %v3904_v35 = vor.u32 %v4333_v28, %v3901_v30  ;;  %v3887_v36 = vld [vmem:[#allocation20 + $0x78] sm:$0xf]  ;;  %v4330_v39 = vld [vmem:[#allocation20 + $0x7c] sm:$0xf] }
 0xd59   : > { %1813 = vmatpush.msra.mxu1 %v1778_v49  ;;  %v3908_v37 = vor.u32 %v4335_v34, %v3907_v31  ;;  %v4331_v38 = vld [vmem:[#allocation20 + $0x80] sm:$0xf0]  ;;  %v3889_v41 = vld [vmem:[#allocation20 + $0x84] sm:$0xf0]  ;;  %v3895_v42 = vld [vmem:[#allocation20 + $0x80] sm:$0xf] }
 0xd5a   : > { %1794 = vmatpush.msra.mxu0 %v1761_v50  ;;  %v3888_v40 = vor.u32 %v4331_v38, %v3887_v36  ;;  %v4332_v32 = vld [vmem:[#allocation20 + $0x88] sm:$0xf0]  ;;  %v3892_v44 = vor.u32 %v4330_v39, %v3889_v41  ;;  %v3875_v46 = vld [vmem:[#allocation20 + $0x60] sm:$0xf]  ;;  %v4327_v49 = vld [vmem:[#allocation20 + $0x64] sm:$0xf] }
 0xd5b   : > { %1814 = vmatpush.msra.mxu1 %v1777_v52  ;;  %2027 = vmatpush.bf16.msra.mxu2 %v3900_v29  ;;  %v3896_v45 = vor.u32 %v4332_v32, %v3895_v42  ;;  %v4328_v47 = vld [vmem:[#allocation20 + $0x68] sm:$0xf0]  ;;  %v3877_v52 = vld [vmem:[#allocation20 + $0x6c] sm:$0xf0]  ;;  %v4322_v2 = vld [vmem:[#allocation20 + $0x38] sm:$0xf0] }
 0xd5c   : > { %1795 = vmatpush.msra.mxu0 %v1760_v53  ;;  %2040 = vmatpush.bf16.msra.mxu3 %v3904_v35  ;;  %v3876_v50 = vor.u32 %v4328_v47, %v3875_v46  ;;  %v3883_v53 = vld [vmem:[#allocation20 + $0x68] sm:$0xf]  ;;  %v4319_v13 = vld [vmem:[#allocation20 + $0x20] sm:$0xf0]  ;;  %v4318_v14 = vld [vmem:[#allocation20 + $0x1c] sm:$0xf] }
 0xd5d   : > { %1815 = vmatpush.msra.mxu1 %v1776_v54  ;;  %v4329_v54 = vld [vmem:[#allocation20 + $0x70] sm:$0xf0]  ;;  %v3841_v16 = vld [vmem:[#allocation20 + $0x24] sm:$0xf0]  ;;  %v3847_v17 = vld [vmem:[#allocation20 + $0x20] sm:$0xf] }
 0xd5e   : > { %1796 = vmatpush.msra.mxu0 %v1759_v55  ;;  %v3880_v55 = vor.u32 %v4327_v49, %v3877_v52  ;;  %v4320_v18 = vld [vmem:[#allocation20 + $0x28] sm:$0xf0]  ;;  %v3844_v19 = vor.u32 %v4318_v14, %v3841_v16  ;;  %v3835_v22 = vld [vmem:[#allocation20 + $0x8] sm:$0xf]  ;;  %v4317_v27 = vld [vmem:[#allocation20 + $0x10] sm:$0xf0] }
 0xd5f   : > { %1816 = vmatpush.msra.mxu1 %v1775_v56  ;;  %2028 = vmatpush.bf16.msra.mxu2 %v3888_v40  ;;  %v3884_v56 = vor.u32 %v4329_v54, %v3883_v53  ;;  %v3848_v20 = vor.u32 %v4320_v18, %v3847_v17  ;;  %v3836_v29 = vor.u32 %v4317_v27, %v3835_v22  ;;  %v1853_v42 = vld [vmem:[#allocation17] sm:$0x1]  ;;  %v1890_v49 = vld [vmem:[%s6083_s1] sm:$0x7] }
 0xd60   : > { %1797 = vmatpush.msra.mxu0 %v1758_v57  ;;  %2041 = vmatpush.bf16.msra.mxu3 %v3892_v44  ;;  %v3863_v57 = vld [vmem:[#allocation20 + $0x48] sm:$0xf]  ;;  %v1855_v44 = vld [vmem:[#allocation19] sm:$0x1]  ;;  %v2020_v54 = vperm.slane %v1890_v49, 0 }
 0xd61   : > { %1817 = vmatpush.msra.mxu1 %v1774_v58  ;;  %v4325_v58 = vld [vmem:[#allocation20 + $0x50] sm:$0xf0] }
 0xd62   : > { %1798 = vmatpush.msra.mxu0 %v1757_v59  ;;  %v4324_v59 = vld [vmem:[#allocation20 + $0x4c] sm:$0xf] }
 0xd63   : > { %1818 = vmatpush.msra.mxu1 %v1773_v43  ;;  %2029 = vmatpush.bf16.msra.mxu2 %v3876_v50  ;;  %v3864_v43 = vor.u32 %v4325_v58, %v3863_v57  ;;  %v2022_v50 = vperm.slane %v1890_v49, 2 }
 0xd64   : > { %1799 = vmatpush.msra.mxu0 %v1756_v60  ;;  %2042 = vmatpush.bf16.msra.mxu3 %v3880_v55  ;;  %v3865_v60 = vld [vmem:[#allocation20 + $0x54] sm:$0xf0]  ;;  %v2021_v55 = vperm.slane %v1890_v49, 1 }
 0xd65   : > { %1819 = vmatpush.msra.mxu1 %v1772_v61  ;;  %v3871_v61 = vld [vmem:[#allocation20 + $0x50] sm:$0xf] }
 0xd66   : > { %1800 = vmatpush.msra.mxu0 %v1755_v62  ;;  %v4326_v62 = vld [vmem:[#allocation20 + $0x58] sm:$0xf0] }
 0xd67   : > { %1820 = vmatpush.msra.mxu1 %v1771_v63  ;;  %v3868_v63 = vor.u32 %v4324_v59, %v3865_v60  ;;  %2030 = vmatpush.bf16.msra.mxu2 %v3864_v43 }
 0xd68   : > { %1801 = vmatpush.msra.mxu0 %v1754_v0  ;;  %v3872_v0 = vor.u32 %v4326_v62, %v3871_v61 }
 0xd69   : > { %1821 = vmatpush.msra.mxu1 %v1770_v1  ;;  %2043 = vmatpush.bf16.msra.mxu3 %v3868_v63  ;;  %v3851_v1 = vld [vmem:[#allocation20 + $0x30] sm:$0xf] }
 0xd6a   : > { %2052 = vmatpush.bf16.msrb.mxu0 %v3920_v21  ;;  %v3827_v21 = vld [vmem:[#allocation20] sm:$0xf] }
 0xd6e   : > { %2053 = vmatpush.bf16.msrb.mxu0 %v3908_v37 }
 0xd72   : > { %2054 = vmatpush.bf16.msrb.mxu0 %v3896_v45 }
 0xd76   : > { %2055 = vmatpush.bf16.msrb.mxu0 %v3884_v56 }
 0xd7a   : > { %2056 = vmatpush.bf16.msrb.mxu0 %v3872_v0 }
 0xdbe   : > { %v1747_v5 = vpop.permute.xlu0 %1746 }
 0xdbf   : > { %vm1748_vm15 = vcmp.eq.s32.totalorder %v5861_v3, %v1747_v5  ;;  %vm1749_vm0 = vcmp.eq.s32.totalorder %v5864_v4, %v1747_v5  ;;  %v4321_v5 = vld [vmem:[#allocation20 + $0x34] sm:$0xf] }
 0xdc0   : > { %3823 = vmatmul.msk.f32.vlgmr.msra.gmra.mxu0 %vm1748_vm15, %v5359_v6  ;;  %3824 = vmatmul.msk.f32.vlgmr.msra.gmra.mxu1 %vm1749_vm0, %v5359_v6  ;;  %v3852_v6 = vor.u32 %v4322_v2, %v3851_v1  ;;  %v2069_v2 = vstv %s5275_s26 }
 0xdc1   : > { %vm2070_vm9 = vcmp.le.s32.totalorder %v5861_v3, %v2069_v2 }
 0xdc2   : > { %2031 = vmatpush.bf16.msra.mxu2 %v3852_v6  ;;  %v5362_v6 = vmov -1e+09  }
 0xe3d   : > { %v1803_v7 = vpop.f32.mrf.mxu0  ;;  %v1823_v8 = vpop.f32.mrf.mxu1 }
 0xe3e   : > { %v1824_v9 = vadd.f32 %v1823_v8, %v1803_v7  ;;  %v3853_v7 = vld [vmem:[#allocation20 + $0x3c] sm:$0xf0]  ;;  %v3859_v8 = vld [vmem:[#allocation20 + $0x38] sm:$0xf] }
 0xe40   : > { %v1826_v11 = vmul.f32 11.313708, %v1824_v9  ;;  %v4323_v9 = vld [vmem:[#allocation20 + $0x40] sm:$0xf0] }
 0xe42   : > { %v5870_v12 = vadd.f32 %v1828_v10, %v1826_v11  ;;  %v3856_v10 = vor.u32 %v4321_v5, %v3853_v7  ;;  %v3860_v11 = vor.u32 %v4323_v9, %v3859_v8  ;;  %v2071_v7 = vsel %vm2070_vm9, 0.0, %v5362_v6  ;;  %v4345_v6 = vld [vmem:[#allocation22 + $0x30] sm:$0xff] }
 0xe44   : > { %v1831_v51 = vsel %vm1830_vm1, %v5870_v12, 0.0  ;;  %2044 = vmatpush.bf16.msra.mxu3 %v3856_v10  ;;  %2057 = vmatpush.bf16.msrb.mxu0 %v3860_v11 }
 0xe45   : > { %1832 = vadd.xlane.f32.xlu0 %v1831_v51  ;;  %v3839_v51 = vld [vmem:[#allocation20 + $0x18] sm:$0xf] }
 0xe46   : > { %v3840_v15 = vor.u32 %v4319_v13, %v3839_v51 }
 0xe48   : > { %2032 = vmatpush.bf16.msra.mxu2 %v3840_v15  ;;  %2045 = vmatpush.bf16.msra.mxu3 %v3844_v19 }
 0xe49   : > { %2058 = vmatpush.bf16.msrb.mxu0 %v3848_v20 }
 0xe4d   : > { %2059 = vmatpush.bf16.msrb.mxu0 %v3836_v29 }
 0xeb8   : > { %v1833_v23 = vpop.xlane.xlu0 %1832 }
 0xeb9   : > { %v1834_v33 = vmul.f32 %v1833_v23, %v5765_v48  ;;  %v4316_v23 = vld [vmem:[#allocation20 + $0x8] sm:$0xf0] }
 0xebb   : > { %v5876_v24 = vsub.f32 %v5870_v12, %v1834_v33  ;;  %v4315_v33 = vld [vmem:[#allocation20 + $0x4] sm:$0xf] }
 0xebd   : > { %v1836_v25 = vmul.f32 %v5876_v24, %v5876_v24 }
 0xebf   : > { %v1837_v26 = vsel %vm1830_vm1, %v1836_v25, 0.0  ;;  %v3828_v25 = vor.u32 %v4316_v23, %v3827_v21 }
 0xec0   : > { %1838 = vadd.xlane.f32.xlu1 %v1837_v26  ;;  %v3829_v26 = vld [vmem:[#allocation20 + $0xc] sm:$0xf0] }
 0xec1   : > { %v3832_v28 = vor.u32 %v4315_v33, %v3829_v26  ;;  %2033 = vmatpush.bf16.msra.mxu2 %v3828_v25 }
 0xec3   : > { %2046 = vmatpush.bf16.msra.mxu3 %v3832_v28 }
 0xf33   : > { %v1839_v30 = vpop.xlane.xlu1 %1838 }
 0xf34   : > { %v1840_v31 = vmul.f32 %v1839_v30, %v5765_v48 }
 0xf36   : > { %v1841_v34 = vadd.f32 1e-05, %v1840_v31 }
 0xf38   : > { %4539 = vrsqrt.f32 %v1841_v34  ;;  %vm1848_vm3 = vweird.f32 %v1841_v34 }
 0xf3e   : > { %v4540_v35 = vpop.eup %4539 }
 0xf3f   : > { %v1843_v37 = vmul.f32 %v4540_v35, %v1841_v34  ;;  %vm1849_vm2 = vweird.f32 %v4540_v35 }
 0xf40   : > { %vm1850_vm8 = vmor %vm1848_vm3, %vm1849_vm2 }
 0xf41   : > { %v1844_v36 = vmul.f32 %v4540_v35, %v1843_v37 }
 0xf43   : > { %v1845_v38 = vmul.f32 0.5, %v1844_v36 }
 0xf45   : > { %v1846_v39 = vsub.f32 1.5, %v1845_v38 }
 0xf47   : > { %v1847_v40 = vmul.f32 %v4540_v35, %v1846_v39 }
 0xf49   : > { %v1851_v41 = vsel %vm1850_vm8, %v4540_v35, %v1847_v40 }
 0xf4a   : > { %v1852_v32 = vmul.f32 %v1851_v41, %v5876_v24 }
 0xf4c   : > { %v1854_v45 = vmul.f32 %v1853_v42, %v1852_v32 }
 0xf4e   : > { %v1856_v46 = vadd.f32 %v1855_v44, %v1854_v45 }
 0xf50   : > { %v1889_v47 = vpack.c.bf16 %v1856_v46, %v1856_v46 }
 0xf52   : > { %2034 = vmatmul.bf16.vlgmr.msra.gmra.mxu2 %v1889_v47  ;;  %2047 = vmatmul.bf16.vlgmr.msra.gmra.mxu3 %v1889_v47 }
 0xf53   : > { %2060 = vmatmul.bf16.vlgmr.msrb.gmra.mxu0 %v1889_v47 }
 0xfd0   : > { %v2061_v52 = vpop.f32.mrf.mxu0 }
 0xfd1   : > { %v2062_v53 = vadd.f32 %v2061_v52, %v2022_v50 }
 0xfd3   : > { %2068 = vst [vmem:[%s2067_s19] sm:$0x1] %v2062_v53 }
 0xfd5   : > { %v2035_v56 = vpop.f32.mrf.mxu2  ;;  %v2048_v57 = vpop.f32.mrf.mxu3 }
 0xfd6   : > { %v5885_v58 = vadd.f32 %v2035_v56, %v2020_v54  ;;  %v2049_v24 = vadd.f32 %v2048_v57, %v2021_v55 }
 0xfd8   : > { %2066 = vst [vmem:[%s2065_s6] sm:$0x1] %v2049_v24  ;;  %v2063_v59 = vpop.f32.mrf.mxu0  ;;  %2137 = vrot.lane.b32.xlu2 %v5885_v58, %s5360_s21 }
 0xfda   : > { %v5890_v43 = vld [vmem:[#allocation6] sm:$0xff] }
 0xfdb   : > { %2132 = vmatpush.msrb.mxu1 %v5890_v43 }
 0xfdd   : > { %v2037_v60 = vpop.f32.mrf.mxu2  ;;  %v2050_v61 = vpop.f32.mrf.mxu3 }
 0xfdf   : > { %v2072_v62 = vld [vmem:[#allocation5] sm:$0xff] }
 0xfe0   : > { %2207 = vrot.lane.b32.xlu0 %v2072_v62, %s5361_s16  ;;  %2139 = vrot.lane.b32.xlu1 %v2072_v62, %s5360_s21 }
 0xfe1   : > { %3921 = vmatpush.xpose.msk.msra.mxu0 %vm884_vm4, %v2072_v62 }
 0xfe4   : > { %3922 = vmatmul.msk.f32.vlgmr.msra.gmra.mxu0 %vm884_vm4, %v5885_v58 }
0x1032   : > { %v2138_v1 = vpop.permute.xlu2 %2137 }
0x1052   : > { %v2208_v63 = vpop.permute.xlu0 %2207  ;;  %v2140_v0 = vpop.permute.xlu1 %2139 }
0x1053   : > { %3924 = vmatpush.xpose.msk.msrb.mxu2 %vm884_vm4, %v2140_v0  ;;  %3927 = vmatpush.xpose.msk.msra.mxu1 %vm884_vm4, %v2208_v63 }
0x1056   : > { %3925 = vmatmul.msk.f32.vlgmr.msrb.gmra.mxu2 %vm884_vm4, %v2138_v1 }
0x1061   : > { %v2097_v5 = vpop.f32.mrf.mxu0 }
0x1062   : > { %v2100_v8 = vmul.f32 0.17677669, %v2097_v5  ;;  %v4346_v5 = vld [vmem:[#allocation22 + $0x38] sm:$0xff] }
0x1064   : > { %v2101_v9 = vadd.f32 %v2100_v8, %v2071_v7  ;;  %v4343_v8 = vld [vmem:[#allocation22 + $0x20] sm:$0xff] }
0x1066   : > { %v2103_v10 = vsel %vm2102_vm10, %v2101_v9, -inf }
0x1067   : > { %2104 = vmax.xlane.f32.xlu2 %v2103_v10  ;;  %v4341_v10 = vld [vmem:[#allocation22 + $0x10] sm:$0xff] }
0x107f   : > { %2179 = vrot.lane.b32.xlu2 %v5890_v43, %s5360_s21 }
0x10d9   : > { %v2162_v11 = vpop.f32.mrf.mxu2 }
0x10da   : > { %v2165_v51 = vmul.f32 0.17677669, %v2162_v11  ;;  %v2105_v13 = vpop.xlane.xlu2 %2104  ;;  %v4340_v11 = vld [vmem:[#allocation22 + $0x8] sm:$0xff] }
0x10db   : > { %v2106_v14 = vsub.f32 %v2101_v9, %v2105_v13  ;;  %v4342_v9 = vld [vmem:[#allocation22 + $0x18] sm:$0xff] }
0x10dc   : > { %v2166_v15 = vadd.f32 %v2165_v51, %v2071_v7  ;;  %v4339_v51 = vld [vmem:[#allocation22] sm:$0xff] }
0x10dd   : > { %v2107_v16 = vmul.f32 1.442695, %v2106_v14 }
0x10de   : > { %v2167_v17 = vsel %vm2102_vm10, %v2166_v15, -inf }
0x10df   : > { %4541 = vpow2.f32 %v2107_v16  ;;  %2168 = vmax.xlane.f32.xlu1 %v2167_v17 }
0x10e2   : > { %v2180_v18 = vpop.permute.xlu2 %2179 }
0x10e3   : > { %2200 = vmatpush.msrb.mxu3 %v2180_v18 }
0x10e5   : > { %v4542_v19 = vpop.eup %4541 }
0x10e6   : > { %v2109_v20 = vsel %vm2102_vm10, %v4542_v19, 0.0 }
0x10e7   : > { %2110 = vadd.xlane.f32.xlu2 %v2109_v20  ;;  %v2371_v20 = vld [vmem:[#allocation23] sm:$0x1] }
0x10f8   : > { %2274 = vrot.lane.b32.xlu1 %v2072_v62, %s5363_s11 }
0x10ff   : > { %2272 = vrot.lane.b32.xlu2 %v5885_v58, %s5363_s11 }
0x1152   : > { %v2169_v21 = vpop.xlane.xlu1 %2168 }
0x1153   : > { %v2170_v23 = vsub.f32 %v2166_v15, %v2169_v21 }
0x1155   : > { %v2171_v33 = vmul.f32 1.442695, %v2170_v23 }
0x1157   : > { %4543 = vpow2.f32 %v2171_v33 }
0x115a   : > { %v2111_v25 = vpop.xlane.xlu2 %2110 }
0x115b   : > { %4545 = vrcp.f32 %v2111_v25 }
0x115d   : > { %v4544_v26 = vpop.eup %4543 }
0x115e   : > { %v2173_v22 = vsel %vm2102_vm10, %v4544_v26, 0.0 }
0x115f   : > { %2174 = vadd.xlane.f32.xlu0 %v2173_v22  ;;  %v4354_v22 = vld [vmem:[#allocation28 + $0x38] sm:$0xff] }
0x1161   : > { %v4546_v27 = vpop.eup %4545 }
0x1162   : > { %v2113_v28 = vmul.f32 %v4546_v27, %v4542_v19  ;;  %v2273_v35 = vpop.permute.xlu2 %2272 }
0x1164   : > { %3923 = vmatmul.msk.f32.vlgmr.msrb.gmra.mxu1 %vm912_vm5, %v2113_v28 }
0x116a   : > { %v2275_v29 = vpop.permute.xlu1 %2274 }
0x116b   : > { %3930 = vmatpush.xpose.msk.msra.mxu3 %vm884_vm4, %v2275_v29 }
0x1173   : > { %2205 = vrot.lane.b32.xlu0 %v5885_v58, %s5361_s16 }
0x11d2   : > { %v2175_v30 = vpop.xlane.xlu0 %2174 }
0x11d3   : > { %4547 = vrcp.f32 %v2175_v30 }
0x11d9   : > { %v4548_v31 = vpop.eup %4547 }
0x11da   : > { %v2177_v34 = vmul.f32 %v4548_v31, %v4544_v26 }
0x11dc   : > { %3926 = vmatmul.msk.f32.vlgmr.msrb.gmra.mxu3 %vm912_vm5, %v2177_v34  ;;  %v4353_v34 = vld [vmem:[#allocation28 + $0x30] sm:$0xff] }
0x11dd   : > { %2526 = vmatpush.bf16.msrb.mxu3 %v4354_v22 }
0x11e1   : > { %v5919_v36 = vpop.f32.mrf.mxu1  ;;  %2527 = vmatpush.bf16.msrb.mxu3 %v4353_v34 }
0x11e4   : > { %3931 = vmatmul.msk.f32.vlgmr.msra.gmra.mxu3 %vm884_vm4, %v2273_v35  ;;  %v4351_v35 = vld [vmem:[#allocation28 + $0x20] sm:$0xff] }
0x11e5   : > { %v2206_v37 = vpop.permute.xlu0 %2205 }
0x11e6   : > { %3928 = vmatmul.msk.f32.vlgmr.msra.gmra.mxu1 %vm884_vm4, %v2206_v37  ;;  %v4350_v37 = vld [vmem:[#allocation28 + $0x18] sm:$0xff] }
0x125f   : > { %v2202_v38 = vpop.f32.mrf.mxu3 }
0x1263   : > { %v2230_v39 = vpop.f32.mrf.mxu1 }
0x1264   : > { %v2233_v40 = vmul.f32 0.17677669, %v2230_v39  ;;  %v4347_v39 = vld [vmem:[#allocation28] sm:$0xff] }
0x1266   : > { %v2234_v41 = vadd.f32 %v2233_v40, %v2071_v7  ;;  %v2539_v40 = vld [vmem:[#allocation3] sm:$0xff] }
0x1267   : > { %v2297_v42 = vpop.f32.mrf.mxu3 }
0x1268   : > { %v2300_v32 = vmul.f32 0.17677669, %v2297_v42  ;;  %v2235_v44 = vsel %vm2102_vm10, %v2234_v41, -inf }
0x1269   : > { %2236 = vmax.xlane.f32.xlu0 %v2235_v44 }
0x126a   : > { %v2301_v45 = vadd.f32 %v2300_v32, %v2071_v7  ;;  %v4344_v7 = vld [vmem:[#allocation22 + $0x28] sm:$0xff] }
0x126c   : > { %v2302_v46 = vsel %vm2102_vm10, %v2301_v45, -inf }
0x126d   : > { %2303 = vmax.xlane.f32.xlu2 %v2302_v46 }
0x1285   : > { %2246 = vrot.lane.b32.xlu2 %v5890_v43, %s5361_s16 }
0x12dc   : > { %v2237_v47 = vpop.xlane.xlu0 %2236 }
0x12dd   : > { %v2238_v49 = vsub.f32 %v2234_v41, %v2237_v47 }
0x12df   : > { %v2239_v50 = vmul.f32 1.442695, %v2238_v49 }
0x12e0   : > { %v2304_v52 = vpop.xlane.xlu2 %2303 }
0x12e1   : > { %4549 = vpow2.f32 %v2239_v50  ;;  %v2305_v53 = vsub.f32 %v2301_v45, %v2304_v52 }
0x12e3   : > { %v2306_v54 = vmul.f32 1.442695, %v2305_v53  ;;  %v2456_v53 = vld [vmem:[#allocation25] sm:$0x1] }
0x12e5   : > { %4551 = vpow2.f32 %v2306_v54 }
0x12e7   : > { %v4550_v55 = vpop.eup %4549 }
0x12e8   : > { %v2247_v56 = vpop.permute.xlu2 %2246  ;;  %v2241_v57 = vsel %vm2102_vm10, %v4550_v55, 0.0 }
0x12e9   : > { %2242 = vadd.xlane.f32.xlu1 %v2241_v57  ;;  %2267 = vmatpush.msra.mxu2 %v2247_v56 }
0x12eb   : > { %v4552_v58 = vpop.eup %4551  ;;  %2420 = vmatpush.bf16.msrb.mxu2 %v4346_v5 }
0x12ec   : > { %v2308_v24 = vsel %vm2102_vm10, %v4552_v58, 0.0 }
0x12ed   : > { %2309 = vadd.xlane.f32.xlu0 %v2308_v24  ;;  %v2477_v24 = vld [vmem:[#allocation29] sm:$0x1] }
0x12ef   : > { %2421 = vmatpush.bf16.msrb.mxu2 %v4345_v6 }
0x12f3   : > { %2422 = vmatpush.bf16.msrb.mxu2 %v4344_v7 }
0x12f7   : > { %2423 = vmatpush.bf16.msrb.mxu2 %v4343_v8  ;;  %v2540_v8 = vld [vmem:[#allocation4] sm:$0xff] }
0x12f8   : > { %2597 = vmatpush.msrb.mxu0 %v2540_v8 }
0x12fb   : > { %2424 = vmatpush.bf16.msrb.mxu2 %v4342_v9 }
0x12ff   : > { %2425 = vmatpush.bf16.msrb.mxu2 %v4341_v10 }
0x1301   : > { %2313 = vrot.lane.b32.xlu0 %v5890_v43, %s5363_s11 }
0x1302   : > { %2340 = vrot.lane.b32.xlu1 %v2202_v38, %s5363_s11  ;;  %v4348_v38 = vld [vmem:[#allocation28 + $0x8] sm:$0xff] }
0x1303   : > { %2426 = vmatpush.bf16.msrb.mxu2 %v4340_v11 }
0x1307   : > { %2427 = vmatpush.bf16.msrb.mxu2 %v4339_v51 }
0x130a   : > { %2604 = vrot.lane.b32.xlu1 %v2539_v40, %s5360_s21 }
0x1312   : > { %2671 = vrot.lane.b32.xlu1 %v2539_v40, %s5361_s16 }
0x135c   : > { %v2243_v59 = vpop.xlane.xlu1 %2242 }
0x135d   : > { %4553 = vrcp.f32 %v2243_v59 }
0x1360   : > { %v2310_v62 = vpop.xlane.xlu0 %2309 }
0x1361   : > { %4555 = vrcp.f32 %v2310_v62 }
0x1363   : > { %v4554_v60 = vpop.eup %4553 }
0x1364   : > { %v2245_v61 = vmul.f32 %v4554_v60, %v4550_v55  ;;  %v2458_v55 = vld [vmem:[#allocation26] sm:$0x1] }
0x1366   : > { %3929 = vmatmul.msk.f32.vlgmr.msra.gmra.mxu2 %vm912_vm5, %v2245_v61 }
0x1367   : > { %v4556_v63 = vpop.eup %4555 }
0x1368   : > { %v2312_v1 = vmul.f32 %v4556_v63, %v4552_v58 }
0x1373   : > { %v2314_v0 = vpop.permute.xlu0 %2313 }
0x1374   : > { %2334 = vmatpush.msrb.mxu1 %v2314_v0  ;;  %v2341_v13 = vpop.permute.xlu1 %2340 }
0x1375   : > { %3932 = vmatmul.msk.f32.vlgmr.msrb.gmra.mxu1 %vm912_vm5, %v2312_v1  ;;  %v2351_v15 = vsel %vm884_vm4, %v5919_v36, %v2341_v13  ;;  %v4349_v36 = vld [vmem:[#allocation28 + $0x10] sm:$0xff] }
0x1376   : > { %3997 = vmatpush.xpose.msk.msra.mxu1 %vm884_vm4, %v2539_v40 }
0x137c   : > { %v2605_v62 = vpop.permute.xlu1 %2604 }
0x137d   : > { %4000 = vmatpush.xpose.msk.msrb.mxu1 %vm884_vm4, %v2605_v62  ;;  %v4360_v62 = vld [vmem:[#allocation34 + $0x28] sm:$0xff] }
0x1384   : > { %v2672_v63 = vpop.permute.xlu1 %2671 }
0x13e9   : > { %v2269_v2 = vpop.f32.mrf.mxu2 }
0x13ea   : > { %2344 = vrot.lane.b32.xlu2 %v2269_v2, %s5361_s16 }
0x13f2   : > { %v2336_v43 = vpop.f32.mrf.mxu1 }
0x13f3   : > { %2348 = vrot.lane.b32.xlu0 %v2336_v43, %s5360_s21 }
0x1444   : > { %v2345_v14 = vpop.permute.xlu2 %2344 }
0x1445   : > { %v2352_v16 = vsel %vm1159_vm6, %v2351_v15, %v2345_v14 }
0x1465   : > { %v2349_v17 = vpop.permute.xlu0 %2348 }
0x1466   : > { %v2353_v18 = vsel %vm1161_vm7, %v2352_v16, %v2349_v17 }
0x1467   : > { %v2370_v19 = vpack.c.bf16 %v2353_v18, %v2353_v18 }
0x1469   : > { %2428 = vmatmul.bf16.vlgmr.msrb.gmra.mxu2 %v2370_v19 }
0x14ec   : > { %v2429_v21 = vpop.f32.mrf.mxu2 }
0x14ed   : > { %v2430_v23 = vadd.f32 %v2429_v21, %v2371_v20 }
0x14ef   : > { %v5939_v33 = vadd.f32 %v2430_v23, %v5870_v12  ;;  %v4352_v12 = vld [vmem:[#allocation28 + $0x28] sm:$0xff] }
0x14f0   : > { %2528 = vmatpush.bf16.msrb.mxu3 %v4352_v12 }
0x14f1   : > { %v2434_v25 = vsel %vm1830_vm1, %v5939_v33, 0.0 }
0x14f2   : > { %2435 = vadd.xlane.f32.xlu2 %v2434_v25 }
0x14f4   : > { %v2431_v26 = vpop.f32.mrf.mxu2  ;;  %2529 = vmatpush.bf16.msrb.mxu3 %v4351_v35 }
0x14f8   : > { %2530 = vmatpush.bf16.msrb.mxu3 %v4350_v37 }
0x14fc   : > { %2531 = vmatpush.bf16.msrb.mxu3 %v4349_v36 }
0x1500   : > { %2532 = vmatpush.bf16.msrb.mxu3 %v4348_v38 }
0x1504   : > { %2533 = vmatpush.bf16.msrb.mxu3 %v4347_v39 }
0x1565   : > { %v2436_v27 = vpop.xlane.xlu2 %2435 }
0x1566   : > { %v2437_v28 = vmul.f32 %v2436_v27, %v5765_v48 }
0x1568   : > { %v2438_v29 = vsub.f32 %v5939_v33, %v2437_v28 }
0x156a   : > { %v2439_v30 = vmul.f32 %v2438_v29, %v2438_v29 }
0x156c   : > { %v2440_v31 = vsel %vm1830_vm1, %v2439_v30, 0.0 }
0x156d   : > { %2441 = vadd.xlane.f32.xlu0 %v2440_v31 }
0x15e0   : > { %v2442_v41 = vpop.xlane.xlu0 %2441 }
0x15e1   : > { %v2443_v42 = vmul.f32 %v2442_v41, %v5765_v48 }
0x15e3   : > { %v2444_v32 = vadd.f32 1e-05, %v2443_v42 }
0x15e5   : > { %4557 = vrsqrt.f32 %v2444_v32  ;;  %vm2451_vm12 = vweird.f32 %v2444_v32 }
0x15eb   : > { %v4558_v44 = vpop.eup %4557 }
0x15ec   : > { %v2446_v45 = vmul.f32 %v4558_v44, %v2444_v32  ;;  %vm2452_vm11 = vweird.f32 %v4558_v44 }
0x15ed   : > { %vm2453_vm13 = vmor %vm2451_vm12, %vm2452_vm11 }
0x15ee   : > { %v2447_v46 = vmul.f32 %v4558_v44, %v2446_v45 }
0x15f0   : > { %v2448_v47 = vmul.f32 0.5, %v2447_v46 }
0x15f2   : > { %v2449_v49 = vsub.f32 1.5, %v2448_v47 }
0x15f4   : > { %v2450_v50 = vmul.f32 %v4558_v44, %v2449_v49 }
0x15f6   : > { %v2454_v52 = vsel %vm2453_vm13, %v4558_v44, %v2450_v50 }
0x15f7   : > { %v2455_v54 = vmul.f32 %v2454_v52, %v2438_v29 }
0x15f9   : > { %v2457_v56 = vmul.f32 %v2456_v53, %v2455_v54 }
0x15fb   : > { %v2459_v57 = vadd.f32 %v2458_v55, %v2457_v56 }
0x15fd   : > { %v2476_v58 = vpack.c.bf16 %v2459_v57, %v2459_v57 }
0x15ff   : > { %2534 = vmatmul.bf16.vlgmr.msrb.gmra.mxu3 %v2476_v58 }
0x1682   : > { %v2535_v59 = vpop.f32.mrf.mxu3 }
0x1683   : > { %v2536_v60 = vadd.f32 %v2535_v59, %v2477_v24 }
0x1685   : > { %2735 = vrot.lane.b32.xlu2 %v2536_v60, %s5363_s11  ;;  %2602 = vrot.lane.b32.xlu1 %v2536_v60, %s5360_s21 }
0x1686   : > { %3998 = vmatmul.msk.f32.vlgmr.msra.gmra.mxu1 %vm884_vm4, %v2536_v60 }
0x1687   : > { %4003 = vmatpush.xpose.msk.msra.mxu1 %vm884_vm4, %v2672_v63  ;;  %v4359_v63 = vld [vmem:[#allocation34 + $0x20] sm:$0xff] }
0x168a   : > { %v2537_v61 = vpop.f32.mrf.mxu3 }
0x168b   : > { %v4361_v61 = vld [vmem:[#allocation34 + $0x30] sm:$0xff] }
0x168d   : > { %2669 = vrot.lane.b32.xlu1 %v2536_v60, %s5361_s16  ;;  %v4362_v60 = vld [vmem:[#allocation34 + $0x38] sm:$0xff] }
0x168e   : > { %2882 = vmatpush.bf16.msra.mxu2 %v4362_v60 }
0x1692   : > { %2883 = vmatpush.bf16.msra.mxu2 %v4361_v61  ;;  %v4051_v61 = vld [vmem:[#allocation40 + $0x10] sm:$0xf] }
0x1695   : > { %2737 = vrot.lane.b32.xlu1 %v2539_v40, %s5363_s11 }
0x1696   : > { %2884 = vmatpush.bf16.msra.mxu2 %v4360_v62  ;;  %v4366_v62 = vld [vmem:[#allocation40 + $0x14] sm:$0xf0] }
0x169a   : > { %2885 = vmatpush.bf16.msra.mxu2 %v4359_v63  ;;  %v4365_v63 = vld [vmem:[#allocation40 + $0x14] sm:$0xf] }
0x16df   : > { %v2736_v7 = vpop.permute.xlu2 %2735 }
0x16f7   : > { %v2603_v0 = vpop.permute.xlu1 %2602 }
0x16f8   : > { %4001 = vmatmul.msk.f32.vlgmr.msrb.gmra.mxu1 %vm884_vm4, %v2603_v0  ;;  %v4358_v0 = vld [vmem:[#allocation34 + $0x18] sm:$0xff] }
0x16f9   : > { %2886 = vmatpush.bf16.msra.mxu2 %v4358_v0  ;;  %v4052_v0 = vor.u32 %v4366_v62, %v4051_v61 }
0x16ff   : > { %v2670_v1 = vpop.permute.xlu1 %2669 }
0x1700   : > { %4004 = vmatmul.msk.f32.vlgmr.msra.gmra.mxu1 %vm884_vm4, %v2670_v1  ;;  %v4357_v1 = vld [vmem:[#allocation34 + $0x10] sm:$0xff] }
0x1701   : > { %2887 = vmatpush.bf16.msra.mxu2 %v4357_v1  ;;  %v4053_v1 = vld [vmem:[#allocation40 + $0x18] sm:$0xf0] }
0x1703   : > { %v2564_v2 = vpop.f32.mrf.mxu1 }
0x1704   : > { %v2567_v43 = vmul.f32 0.17677669, %v2564_v2  ;;  %v4356_v2 = vld [vmem:[#allocation34 + $0x8] sm:$0xff] }
0x1705   : > { %2888 = vmatpush.bf16.msra.mxu2 %v4356_v2  ;;  %v4043_v2 = vld [vmem:[#allocation40] sm:$0xf] }
0x1706   : > { %v2568_v5 = vsel %vm2102_vm10, %v2567_v43, -inf }
0x1707   : > { %2569 = vmax.xlane.f32.xlu0 %v2568_v5  ;;  %v2738_v6 = vpop.permute.xlu1 %2737 }
0x1708   : > { %4006 = vmatpush.xpose.msk.msrb.mxu1 %vm884_vm4, %v2738_v6 }
0x170b   : > { %4007 = vmatmul.msk.f32.vlgmr.msrb.gmra.mxu1 %vm884_vm4, %v2736_v7 }
0x1775   : > { %v2627_v9 = vpop.f32.mrf.mxu1 }
0x1776   : > { %v2630_v10 = vmul.f32 0.17677669, %v2627_v9 }
0x1778   : > { %v2631_v11 = vsel %vm2102_vm10, %v2630_v10, -inf }
0x1779   : > { %2632 = vmax.xlane.f32.xlu1 %v2631_v11 }
0x177a   : > { %v2570_v51 = vpop.xlane.xlu0 %2569 }
0x177b   : > { %v2571_v13 = vsub.f32 %v2567_v43, %v2570_v51  ;;  %v4355_v43 = vld [vmem:[#allocation34] sm:$0xff] }
0x177c   : > { %2889 = vmatpush.bf16.msra.mxu2 %v4355_v43  ;;  %v2833_v51 = vld [vmem:[#allocation35] sm:$0x1]  ;;  %v4364_v43 = vld [vmem:[#allocation40 + $0x4] sm:$0xf0] }
0x177d   : > { %v2572_v14 = vmul.f32 1.442695, %v2571_v13  ;;  %v2694_v15 = vpop.f32.mrf.mxu1 }
0x177e   : > { %v2697_v16 = vmul.f32 0.17677669, %v2694_v15 }
0x177f   : > { %4559 = vpow2.f32 %v2572_v14 }
0x1780   : > { %v2698_v17 = vsel %vm2102_vm10, %v2697_v16, -inf }
0x1781   : > { %2699 = vmax.xlane.f32.xlu0 %v2698_v17 }
0x1785   : > { %v4560_v18 = vpop.eup %4559 }
0x1786   : > { %v2574_v19 = vsel %vm2102_vm10, %v4560_v18, 0.0 }
0x1787   : > { %2575 = vadd.xlane.f32.xlu2 %v2574_v19  ;;  %v4378_v19 = vld [vmem:[#allocation40 + $0x74] sm:$0xf0] }
0x1788   : > { %v2760_v20 = vpop.f32.mrf.mxu1 }
0x1789   : > { %v2763_v21 = vmul.f32 0.17677669, %v2760_v20  ;;  %v4377_v20 = vld [vmem:[#allocation40 + $0x74] sm:$0xf] }
0x178b   : > { %v2764_v23 = vsel %vm2102_vm10, %v2763_v21, -inf }
0x178c   : > { %2765 = vmax.xlane.f32.xlu0 %v2764_v23  ;;  %v4101_v23 = vld [vmem:[#allocation40 + $0x78] sm:$0xf0] }
0x17a0   : > { %2643 = vrot.lane.b32.xlu0 %v2540_v8, %s5360_s21 }
0x17ec   : > { %v2633_v25 = vpop.xlane.xlu1 %2632 }
0x17ed   : > { %v2634_v26 = vsub.f32 %v2630_v10, %v2633_v25  ;;  %v4104_v25 = vor.u32 %v4377_v20, %v4101_v23  ;;  %v4391_v20 = vld [vmem:[#allocation43 + $0x60] sm:$0xff] }
0x17ef   : > { %v2635_v22 = vmul.f32 1.442695, %v2634_v26  ;;  %3038 = vmatpush.bf16.msra.mxu1 %v4104_v25 }
0x17f1   : > { %4561 = vpow2.f32 %v2635_v22 }
0x17f4   : > { %v2700_v27 = vpop.xlane.xlu0 %2699 }
0x17f5   : > { %v2701_v28 = vsub.f32 %v2697_v16, %v2700_v27 }
0x17f7   : > { %v4562_v29 = vpop.eup %4561  ;;  %v2702_v30 = vmul.f32 1.442695, %v2701_v28 }
0x17f8   : > { %v2637_v31 = vsel %vm2102_vm10, %v4562_v29, 0.0 }
0x17f9   : > { %4563 = vpow2.f32 %v2702_v30  ;;  %2638 = vadd.xlane.f32.xlu0 %v2637_v31  ;;  %v4376_v30 = vld [vmem:[#allocation40 + $0x64] sm:$0xf0]  ;;  %v4375_v31 = vld [vmem:[#allocation40 + $0x64] sm:$0xf] }
0x17fa   : > { %v2576_v34 = vpop.xlane.xlu2 %2575 }
0x17fb   : > { %4565 = vrcp.f32 %v2576_v34 }
0x17ff   : > { %v4564_v12 = vpop.eup %4563  ;;  %v2766_v35 = vpop.xlane.xlu0 %2765 }
0x1800   : > { %v2767_v37 = vsub.f32 %v2763_v21, %v2766_v35  ;;  %v2704_v36 = vsel %vm2102_vm10, %v4564_v12, 0.0 }
0x1801   : > { %v4566_v38 = vpop.eup %4565  ;;  %2705 = vadd.xlane.f32.xlu0 %v2704_v36  ;;  %v4374_v36 = vld [vmem:[#allocation40 + $0x54] sm:$0xf0] }
0x1802   : > { %v2768_v39 = vmul.f32 1.442695, %v2767_v37  ;;  %v2578_v40 = vmul.f32 %v4566_v38, %v4560_v18  ;;  %v4099_v18 = vld [vmem:[#allocation40 + $0x70] sm:$0xf]  ;;  %v4373_v38 = vld [vmem:[#allocation40 + $0x54] sm:$0xf] }
0x1803   : > { %v4100_v21 = vor.u32 %v4378_v19, %v4099_v18  ;;  %v4083_v37 = vld [vmem:[#allocation40 + $0x50] sm:$0xf] }
0x1804   : > { %4567 = vpow2.f32 %v2768_v39  ;;  %3999 = vmatmul.msk.f32.vlgmr.msrb.gmra.mxu0 %vm912_vm5, %v2578_v40  ;;  %v4084_v39 = vor.u32 %v4374_v36, %v4083_v37  ;;  %v4085_v40 = vld [vmem:[#allocation40 + $0x58] sm:$0xf0]  ;;  %v4392_v18 = vld [vmem:[#allocation43 + $0x68] sm:$0xff] }
0x1805   : > { %3025 = vmatpush.bf16.msra.mxu3 %v4100_v21  ;;  %v4384_v19 = vld [vmem:[#allocation43 + $0x28] sm:$0xff]  ;;  %v4383_v21 = vld [vmem:[#allocation43 + $0x20] sm:$0xff]  ;;  %v2920_v37 = vld [vmem:[#allocation38] sm:$0x1] }
0x180a   : > { %v4568_v41 = vpop.eup %4567 }
0x180b   : > { %v2770_v42 = vsel %vm2102_vm10, %v4568_v41, 0.0 }
0x180c   : > { %2771 = vadd.xlane.f32.xlu1 %v2770_v42  ;;  %v4075_v42 = vld [vmem:[#allocation40 + $0x40] sm:$0xf] }
0x1812   : > { %v2644_v32 = vpop.permute.xlu0 %2643 }
0x1813   : > { %2664 = vmatpush.msra.mxu0 %v2644_v32  ;;  %v4372_v32 = vld [vmem:[#allocation40 + $0x44] sm:$0xf0] }
0x1815   : > { %2775 = vrot.lane.b32.xlu0 %v2540_v8, %s5363_s11 }
0x1825   : > { %2709 = vrot.lane.b32.xlu1 %v2540_v8, %s5361_s16 }
0x186c   : > { %v2639_v44 = vpop.xlane.xlu0 %2638 }
0x186d   : > { %4569 = vrcp.f32 %v2639_v44  ;;  %v4371_v44 = vld [vmem:[#allocation40 + $0x44] sm:$0xf] }
0x1873   : > { %v4570_v45 = vpop.eup %4569 }
0x1874   : > { %v2641_v46 = vmul.f32 %v4570_v45, %v4562_v29  ;;  %v2706_v47 = vpop.xlane.xlu0 %2705  ;;  %v4091_v29 = vld [vmem:[#allocation40 + $0x60] sm:$0xf]  ;;  %v4076_v45 = vor.u32 %v4372_v32, %v4075_v42  ;;  %v4380_v32 = vld [vmem:[#allocation43 + $0x8] sm:$0xff] }
0x1875   : > { %4571 = vrcp.f32 %v2706_v47  ;;  %v4092_v34 = vor.u32 %v4376_v30, %v4091_v29  ;;  %v4389_v29 = vld [vmem:[#allocation43 + $0x50] sm:$0xff]  ;;  %v4387_v42 = vld [vmem:[#allocation43 + $0x40] sm:$0xff] }
0x1876   : > { %4002 = vmatmul.msk.f32.vlgmr.msra.gmra.mxu0 %vm912_vm5, %v2641_v46  ;;  %v4077_v46 = vld [vmem:[#allocation40 + $0x48] sm:$0xf0] }
0x1877   : > { %3026 = vmatpush.bf16.msra.mxu3 %v4092_v34  ;;  %v4080_v47 = vor.u32 %v4371_v44, %v4077_v46  ;;  %v4379_v44 = vld [vmem:[#allocation43] sm:$0xff] }
0x187b   : > { %v4572_v50 = vpop.eup %4571  ;;  %3027 = vmatpush.bf16.msra.mxu3 %v4084_v39 }
0x187c   : > { %v2708_v53 = vmul.f32 %v4572_v50, %v4564_v12  ;;  %v4093_v12 = vld [vmem:[#allocation40 + $0x68] sm:$0xf0]  ;;  %v4370_v50 = vld [vmem:[#allocation40 + $0x34] sm:$0xf0] }
0x187d   : > { %v4096_v35 = vor.u32 %v4375_v31, %v4093_v12  ;;  %v2918_v12 = vld [vmem:[#allocation37] sm:$0x1] }
0x187f   : > { %v2772_v49 = vpop.xlane.xlu1 %2771  ;;  %3039 = vmatpush.bf16.msra.mxu1 %v4096_v35  ;;  %3028 = vmatpush.bf16.msra.mxu3 %v4076_v45  ;;  %v2939_v45 = vld [vmem:[#allocation41] sm:$0x3] }
0x1880   : > { %4573 = vrcp.f32 %v2772_v49  ;;  %v4067_v49 = vld [vmem:[#allocation40 + $0x30] sm:$0xf]  ;;  %v3022_v46 = vperm.slane %v2939_v45, 1 }
0x1881   : > { %v2599_v57 = vpop.f32.mrf.mxu0 }
0x1886   : > { %v4574_v55 = vpop.eup %4573 }
0x1887   : > { %v2776_v54 = vpop.permute.xlu0 %2775  ;;  %v2774_v56 = vmul.f32 %v4574_v55, %v4568_v41  ;;  %v4088_v41 = vor.u32 %v4373_v38, %v4085_v40  ;;  %v4388_v40 = vld [vmem:[#allocation43 + $0x48] sm:$0xff] }
0x1889   : > { %3040 = vmatpush.bf16.msra.mxu1 %v4088_v41  ;;  %v4381_v41 = vld [vmem:[#allocation43 + $0x10] sm:$0xff] }
0x188d   : > { %3041 = vmatpush.bf16.msra.mxu1 %v4080_v47 }
0x1897   : > { %v2710_v52 = vpop.permute.xlu1 %2709 }
0x1898   : > { %2730 = vmatpush.msrb.mxu0 %v2710_v52  ;;  %v4369_v52 = vld [vmem:[#allocation40 + $0x34] sm:$0xf] }
0x1899   : > { %4005 = vmatmul.msk.f32.vlgmr.msrb.gmra.mxu0 %vm912_vm5, %v2708_v53  ;;  %v4068_v53 = vor.u32 %v4370_v50, %v4067_v49  ;;  %v3021_v50 = vperm.slane %v2939_v45, 0  ;;  %v4189_v45 = vld [vmem:[#allocation49 + $0x28] sm:$0xf0] }
0x189a   : > { %2796 = vmatpush.msra.mxu0 %v2776_v54  ;;  %v4069_v54 = vld [vmem:[#allocation40 + $0x38] sm:$0xf0] }
0x189b   : > { %v4072_v55 = vor.u32 %v4369_v52, %v4069_v54  ;;  %3029 = vmatpush.bf16.msra.mxu3 %v4068_v53 }
0x189d   : > { %3042 = vmatpush.bf16.msra.mxu1 %v4072_v55 }
0x18a1   : > { %4008 = vmatmul.msk.f32.vlgmr.msra.gmra.mxu0 %vm912_vm5, %v2774_v56  ;;  %v4059_v56 = vld [vmem:[#allocation40 + $0x20] sm:$0xf] }
0x18f3   : > { %v2666_v58 = vpop.f32.mrf.mxu0 }
0x18f4   : > { %2802 = vrot.lane.b32.xlu2 %v2666_v58, %s5363_s11  ;;  %v4367_v58 = vld [vmem:[#allocation40 + $0x24] sm:$0xf] }
0x1916   : > { %v2732_v24 = vpop.f32.mrf.mxu0 }
0x1917   : > { %2806 = vrot.lane.b32.xlu0 %v2732_v24, %s5361_s16 }
0x191e   : > { %v2798_v59 = vpop.f32.mrf.mxu0 }
0x191f   : > { %2810 = vrot.lane.b32.xlu0 %v2798_v59, %s5360_s21  ;;  %v4061_v59 = vld [vmem:[#allocation40 + $0x28] sm:$0xf0] }
0x1920   : > { %v4064_v60 = vor.u32 %v4367_v58, %v4061_v59 }
0x1922   : > { %3043 = vmatpush.bf16.msra.mxu1 %v4064_v60 }
0x194e   : > { %v2803_v6 = vpop.permute.xlu2 %2802 }
0x194f   : > { %v2813_v7 = vsel %vm884_vm4, %v2599_v57, %v2803_v6  ;;  %v4368_v57 = vld [vmem:[#allocation40 + $0x24] sm:$0xf0]  ;;  %v4363_v6 = vld [vmem:[#allocation40 + $0x4] sm:$0xf] }
0x1950   : > { %v4060_v24 = vor.u32 %v4368_v57, %v4059_v56 }
0x1952   : > { %3030 = vmatpush.bf16.msra.mxu3 %v4060_v24  ;;  %v3087_v24 = vld [vmem:[#allocation44] sm:$0x1] }
0x1956   : > { %3031 = vmatpush.bf16.msra.mxu3 %v4052_v0 }
0x1989   : > { %v2807_v5 = vpop.permute.xlu0 %2806 }
0x198a   : > { %v2814_v8 = vsel %vm1159_vm6, %v2813_v7, %v2807_v5  ;;  %v4056_v5 = vor.u32 %v4365_v63, %v4053_v1  ;;  %v4045_v7 = vld [vmem:[#allocation40 + $0x8] sm:$0xf0] }
0x198c   : > { %3044 = vmatpush.bf16.msra.mxu1 %v4056_v5  ;;  %v4410_v5 = vld [vmem:[#allocation49 + $0x74] sm:$0xf0] }
0x1991   : > { %v2811_v9 = vpop.permute.xlu0 %2810 }
0x1992   : > { %v2815_v10 = vsel %vm1161_vm7, %v2814_v8, %v2811_v9  ;;  %v4044_v8 = vor.u32 %v4364_v43, %v4043_v2  ;;  %v4048_v9 = vor.u32 %v4363_v6, %v4045_v7  ;;  %v4227_v43 = vld [vmem:[#allocation49 + $0x70] sm:$0xf]  ;;  %v4409_v6 = vld [vmem:[#allocation49 + $0x74] sm:$0xf] }
0x1993   : > { %v2832_v11 = vpack.c.bf16 %v2815_v10, %v2815_v10  ;;  %v4394_v10 = vld [vmem:[#allocation43 + $0x78] sm:$0xff]  ;;  %v4228_v7 = vor.u32 %v4410_v5, %v4227_v43 }
0x1994   : > { %3032 = vmatpush.bf16.msra.mxu3 %v4044_v8  ;;  %3045 = vmatpush.bf16.msra.mxu1 %v4048_v9  ;;  %v4229_v8 = vld [vmem:[#allocation49 + $0x78] sm:$0xf0] }
0x1995   : > { %2890 = vmatmul.bf16.vlgmr.msra.gmra.mxu2 %v2832_v11  ;;  %v4386_v11 = vld [vmem:[#allocation43 + $0x38] sm:$0xff]  ;;  %v4232_v9 = vor.u32 %v4409_v6, %v4229_v8  ;;  %v3233_v6 = vld [vmem:[#allocation46] sm:$0x1]  ;;  %v3235_v8 = vld [vmem:[#allocation47] sm:$0x1] }
0x1996   : > { %3197 = vmatpush.bf16.msrb.mxu2 %v4394_v10  ;;  %3184 = vmatpush.bf16.msrb.mxu0 %v4386_v11 }
0x1998   : > { %3340 = vmatpush.bf16.msrb.mxu3 %v4228_v7  ;;  %3353 = vmatpush.bf16.msrb.mxu1 %v4232_v9 }
0x1a18   : > { %v2891_v13 = vpop.f32.mrf.mxu2 }
0x1a19   : > { %v2892_v14 = vadd.f32 %v2891_v13, %v2833_v51 }
0x1a1b   : > { %v5983_v15 = vadd.f32 %v2892_v14, %v5939_v33  ;;  %v4393_v14 = vld [vmem:[#allocation43 + $0x70] sm:$0xff] }
0x1a1c   : > { %3198 = vmatpush.bf16.msrb.mxu2 %v4393_v14  ;;  %v4219_v14 = vld [vmem:[#allocation49 + $0x60] sm:$0xf] }
0x1a1d   : > { %v2896_v16 = vsel %vm1830_vm1, %v5983_v15, 0.0 }
0x1a1e   : > { %2897 = vadd.xlane.f32.xlu1 %v2896_v16  ;;  %v4385_v16 = vld [vmem:[#allocation43 + $0x30] sm:$0xff] }
0x1a1f   : > { %3185 = vmatpush.bf16.msrb.mxu0 %v4385_v16  ;;  %v4408_v16 = vld [vmem:[#allocation49 + $0x64] sm:$0xf0] }
0x1a20   : > { %v2893_v17 = vpop.f32.mrf.mxu2  ;;  %3199 = vmatpush.bf16.msrb.mxu2 %v4392_v18  ;;  %v4220_v18 = vor.u32 %v4408_v16, %v4219_v14 }
0x1a22   : > { %3341 = vmatpush.bf16.msrb.mxu3 %v4220_v18 }
0x1a23   : > { %3186 = vmatpush.bf16.msrb.mxu0 %v4384_v19  ;;  %v4221_v19 = vld [vmem:[#allocation49 + $0x68] sm:$0xf0] }
0x1a24   : > { %3200 = vmatpush.bf16.msrb.mxu2 %v4391_v20 }
0x1a27   : > { %3187 = vmatpush.bf16.msrb.mxu0 %v4383_v21  ;;  %v4211_v21 = vld [vmem:[#allocation49 + $0x50] sm:$0xf] }
0x1a91   : > { %v2898_v26 = vpop.xlane.xlu1 %2897 }
0x1a92   : > { %v2899_v22 = vmul.f32 %v2898_v26, %v5765_v48  ;;  %v4390_v26 = vld [vmem:[#allocation43 + $0x58] sm:$0xff] }
0x1a93   : > { %3201 = vmatpush.bf16.msrb.mxu2 %v4390_v26 }
0x1a94   : > { %v5989_v27 = vsub.f32 %v5983_v15, %v2899_v22  ;;  %v4382_v22 = vld [vmem:[#allocation43 + $0x18] sm:$0xff] }
0x1a95   : > { %3188 = vmatpush.bf16.msrb.mxu0 %v4382_v22  ;;  %v4213_v22 = vld [vmem:[#allocation49 + $0x58] sm:$0xf0] }
0x1a96   : > { %v2901_v33 = vmul.f32 %v5989_v27, %v5989_v27 }
0x1a97   : > { %3202 = vmatpush.bf16.msrb.mxu2 %v4389_v29  ;;  %v4404_v29 = vld [vmem:[#allocation49 + $0x44] sm:$0xf0] }
0x1a98   : > { %v2902_v28 = vsel %vm1830_vm1, %v2901_v33, 0.0 }
0x1a99   : > { %2903 = vadd.xlane.f32.xlu0 %v2902_v28  ;;  %3189 = vmatpush.bf16.msrb.mxu0 %v4381_v41  ;;  %v4187_v41 = vld [vmem:[#allocation49 + $0x20] sm:$0xf] }
0x1a9b   : > { %3203 = vmatpush.bf16.msrb.mxu2 %v4388_v40 }
0x1a9d   : > { %3190 = vmatpush.bf16.msrb.mxu0 %v4380_v32  ;;  %v4399_v32 = vld [vmem:[#allocation49 + $0x24] sm:$0xf] }
0x1a9f   : > { %3204 = vmatpush.bf16.msrb.mxu2 %v4387_v42  ;;  %v4400_v42 = vld [vmem:[#allocation49 + $0x24] sm:$0xf0] }
0x1aa1   : > { %3191 = vmatpush.bf16.msrb.mxu0 %v4379_v44  ;;  %v4188_v44 = vor.u32 %v4400_v42, %v4187_v41 }
0x1b0c   : > { %v2904_v51 = vpop.xlane.xlu0 %2903 }
0x1b0d   : > { %v2905_v13 = vmul.f32 %v2904_v51, %v5765_v48 }
0x1b0f   : > { %v2906_v17 = vadd.f32 1e-05, %v2905_v13 }
0x1b11   : > { %4575 = vrsqrt.f32 %v2906_v17  ;;  %vm2913_vm15 = vweird.f32 %v2906_v17 }
0x1b17   : > { %v4576_v23 = vpop.eup %4575 }
0x1b18   : > { %v2908_v25 = vmul.f32 %v4576_v23, %v2906_v17  ;;  %vm2914_vm14 = vweird.f32 %v4576_v23  ;;  %v4407_v17 = vld [vmem:[#allocation49 + $0x64] sm:$0xf] }
0x1b19   : > { %vm2915_vm0 = vmor %vm2913_vm15, %vm2914_vm14  ;;  %v4224_v20 = vor.u32 %v4407_v17, %v4221_v19 }
0x1b1a   : > { %v2909_v33 = vmul.f32 %v4576_v23, %v2908_v25  ;;  %v4405_v25 = vld [vmem:[#allocation49 + $0x54] sm:$0xf] }
0x1b1b   : > { %3354 = vmatpush.bf16.msrb.mxu1 %v4224_v20 }
0x1b1c   : > { %v2910_v28 = vmul.f32 0.5, %v2909_v33  ;;  %v4216_v33 = vor.u32 %v4405_v25, %v4213_v22 }
0x1b1e   : > { %v2911_v30 = vsub.f32 1.5, %v2910_v28  ;;  %v4203_v28 = vld [vmem:[#allocation49 + $0x40] sm:$0xf] }
0x1b1f   : > { %3355 = vmatpush.bf16.msrb.mxu1 %v4216_v33 }
0x1b20   : > { %v2912_v31 = vmul.f32 %v4576_v23, %v2911_v30  ;;  %v4403_v30 = vld [vmem:[#allocation49 + $0x44] sm:$0xf] }
0x1b22   : > { %v2916_v34 = vsel %vm2915_vm0, %v4576_v23, %v2912_v31  ;;  %v4406_v23 = vld [vmem:[#allocation49 + $0x54] sm:$0xf0]  ;;  %v4204_v31 = vor.u32 %v4404_v29, %v4203_v28 }
0x1b23   : > { %v2917_v35 = vmul.f32 %v2916_v34, %v5989_v27  ;;  %v4212_v26 = vor.u32 %v4406_v23, %v4211_v21  ;;  %v4205_v34 = vld [vmem:[#allocation49 + $0x48] sm:$0xf0] }
0x1b25   : > { %v2919_v36 = vmul.f32 %v2918_v12, %v2917_v35  ;;  %3342 = vmatpush.bf16.msrb.mxu3 %v4212_v26  ;;  %v4208_v12 = vor.u32 %v4403_v30, %v4205_v34  ;;  %v4195_v35 = vld [vmem:[#allocation49 + $0x30] sm:$0xf] }
0x1b27   : > { %v2921_v38 = vadd.f32 %v2920_v37, %v2919_v36  ;;  %3356 = vmatpush.bf16.msrb.mxu1 %v4208_v12  ;;  %v4402_v37 = vld [vmem:[#allocation49 + $0x34] sm:$0xf0]  ;;  %v4401_v36 = vld [vmem:[#allocation49 + $0x34] sm:$0xf] }
0x1b29   : > { %v2938_v39 = vpack.c.bf16 %v2921_v38, %v2921_v38  ;;  %3343 = vmatpush.bf16.msrb.mxu3 %v4204_v31  ;;  %v4196_v38 = vor.u32 %v4402_v37, %v4195_v35 }
0x1b2b   : > { %3033 = vmatmul.bf16.vlgmr.msra.gmra.mxu3 %v2938_v39  ;;  %3046 = vmatmul.bf16.vlgmr.msra.gmra.mxu1 %v2938_v39  ;;  %v4197_v39 = vld [vmem:[#allocation49 + $0x38] sm:$0xf0] }
0x1b2c   : > { %v4200_v40 = vor.u32 %v4401_v36, %v4197_v39 }
0x1b2d   : > { %3344 = vmatpush.bf16.msrb.mxu3 %v4196_v38 }
0x1b2e   : > { %3357 = vmatpush.bf16.msrb.mxu1 %v4200_v40 }
0x1b31   : > { %3345 = vmatpush.bf16.msrb.mxu3 %v4188_v44 }
0x1ba8   : > { %v3047_v47 = vpop.f32.mrf.mxu1 }
0x1ba9   : > { %v3048_v27 = vadd.f32 %v3047_v47, %v3022_v46  ;;  %v4192_v46 = vor.u32 %v4399_v32, %v4189_v45  ;;  %v4179_v47 = vld [vmem:[#allocation49 + $0x10] sm:$0xf] }
0x1bab   : > { %v3052_v49 = vmax.f32 %v3048_v27, 0.0  ;;  %3358 = vmatpush.bf16.msrb.mxu1 %v4192_v46  ;;  %v4398_v27 = vld [vmem:[#allocation49 + $0x14] sm:$0xf0] }
0x1bad   : > { %v3086_v52 = vpack.c.bf16 %v3052_v49, %v3052_v49  ;;  %v4397_v49 = vld [vmem:[#allocation49 + $0x14] sm:$0xf] }
0x1bae   : > { %v3034_v53 = vpop.f32.mrf.mxu3 }
0x1baf   : > { %v3035_v54 = vadd.f32 %v3034_v53, %v3021_v50  ;;  %3205 = vmatmul.bf16.vlgmr.msrb.gmra.mxu2 %v3086_v52  ;;  %v4180_v50 = vor.u32 %v4398_v27, %v4179_v47  ;;  %v4181_v52 = vld [vmem:[#allocation49 + $0x18] sm:$0xf0]  ;;  %v4171_v53 = vld [vmem:[#allocation49] sm:$0xf] }
0x1bb0   : > { %v3049_v55 = vpop.f32.mrf.mxu1 }
0x1bb1   : > { %v3051_v56 = vmax.f32 %v3035_v54, 0.0  ;;  %v4396_v54 = vld [vmem:[#allocation49 + $0x4] sm:$0xf0]  ;;  %v4184_v55 = vor.u32 %v4397_v49, %v4181_v52  ;;  %3346 = vmatpush.bf16.msrb.mxu3 %v4180_v50 }
0x1bb3   : > { %v3085_v57 = vpack.c.bf16 %v3051_v56, %v3051_v56  ;;  %v4395_v56 = vld [vmem:[#allocation49 + $0x4] sm:$0xf]  ;;  %3359 = vmatpush.bf16.msrb.mxu1 %v4184_v55 }
0x1bb5   : > { %3192 = vmatmul.bf16.vlgmr.msrb.gmra.mxu0 %v3085_v57  ;;  %v4173_v57 = vld [vmem:[#allocation49 + $0x8] sm:$0xf0] }
0x1bb6   : > { %v3036_v58 = vpop.f32.mrf.mxu3 }
0x1bb7   : > { %v4172_v58 = vor.u32 %v4396_v54, %v4171_v53 }
0x1bb9   : > { %3347 = vmatpush.bf16.msrb.mxu3 %v4172_v58 }
0x1c32   : > { %v3193_v59 = vpop.f32.mrf.mxu0  ;;  %v3206_v60 = vpop.f32.mrf.mxu2 }
0x1c33   : > { %v3194_v61 = vadd.f32 %v3193_v59, %v3087_v24  ;;  %v4176_v24 = vor.u32 %v4395_v56, %v4173_v57 }
0x1c35   : > { %v3207_v62 = vadd.f32 %v3206_v60, %v3194_v61  ;;  %3360 = vmatpush.bf16.msrb.mxu1 %v4176_v24 }
0x1c37   : > { %v3210_v63 = vadd.f32 %v3207_v62, %v5983_v15 }
0x1c39   : > { %v3211_v0 = vsel %vm1830_vm1, %v3210_v63, 0.0 }
0x1c3a   : > { %v3195_v1 = vpop.f32.mrf.mxu0  ;;  %v3208_v2 = vpop.f32.mrf.mxu2  ;;  %3212 = vadd.xlane.f32.xlu2 %v3211_v0 }
0x1cad   : > { %v3213_v10 = vpop.xlane.xlu2 %3212 }
0x1cae   : > { %v3214_v11 = vmul.f32 %v3213_v10, %v5765_v48 }
0x1cb0   : > { %v5999_v51 = vsub.f32 %v3210_v63, %v3214_v11 }
0x1cb2   : > { %v3216_v15 = vmul.f32 %v5999_v51, %v5999_v51 }
0x1cb4   : > { %v3217_v13 = vsel %vm1830_vm1, %v3216_v15, 0.0  ;;  %v3254_v15 = vld [vmem:[%s5582_s14] sm:$0x3] }
0x1cb5   : > { %3218 = vadd.xlane.f32.xlu1 %v3217_v13  ;;  %v3337_v14 = vperm.slane %v3254_v15, 1  ;;  %v3336_v16 = vperm.slane %v3254_v15, 0 }
0x1d28   : > { %v3219_v59 = vpop.xlane.xlu1 %3218 }
0x1d29   : > { %v3220_v60 = vmul.f32 %v3219_v59, %v5765_v48 }
0x1d2b   : > { %v3221_v61 = vadd.f32 1e-05, %v3220_v60 }
0x1d2d   : > { %4577 = vrsqrt.f32 %v3221_v61  ;;  %vm3228_vm3 = vweird.f32 %v3221_v61 }
0x1d33   : > { %v4578_v62 = vpop.eup %4577 }
0x1d34   : > { %v3223_v63 = vmul.f32 %v4578_v62, %v3221_v61  ;;  %vm3229_vm2 = vweird.f32 %v4578_v62 }
0x1d35   : > { %vm3230_vm8 = vmor %vm3228_vm3, %vm3229_vm2 }
0x1d36   : > { %v3224_v0 = vmul.f32 %v4578_v62, %v3223_v63 }
0x1d38   : > { %v3225_v1 = vmul.f32 0.5, %v3224_v0 }
0x1d3a   : > { %v3226_v2 = vsub.f32 1.5, %v3225_v1 }
0x1d3c   : > { %v3227_v43 = vmul.f32 %v4578_v62, %v3226_v2 }
0x1d3e   : > { %v3231_v5 = vsel %vm3230_vm8, %v4578_v62, %v3227_v43 }
0x1d3f   : > { %v3232_v7 = vmul.f32 %v3231_v5, %v5999_v51 }
0x1d41   : > { %v3234_v9 = vmul.f32 %v3233_v6, %v3232_v7 }
0x1d43   : > { %v3236_v10 = vadd.f32 %v3235_v8, %v3234_v9 }
0x1d45   : > { %v3253_v11 = vpack.c.bf16 %v3236_v10, %v3236_v10 }
0x1d47   : > { %3348 = vmatmul.bf16.vlgmr.msrb.gmra.mxu3 %v3253_v11  ;;  %3361 = vmatmul.bf16.vlgmr.msrb.gmra.mxu1 %v3253_v11 }
0x1dc4   : > { %v3362_v13 = vpop.f32.mrf.mxu1 }
0x1dc5   : > { %v3363_v17 = vadd.f32 %v3362_v13, %v3337_v14 }
0x1dc7   : > { %v3367_v23 = vsel %vm1830_vm1, %v3363_v17, -inf }
0x1dca   : > { %v3349_v18 = vpop.f32.mrf.mxu3 }
0x1dcb   : > { %v3350_v19 = vadd.f32 %v3349_v18, %v3336_v16 }
0x1dcc   : > { %v3364_v20 = vpop.f32.mrf.mxu1 }
0x1dcd   : > { %v3366_v21 = vsel %vm1830_vm1, %v3350_v19, -inf }
0x1dce   : > { %v3368_v25 = vmax.f32 %v3366_v21, %v3367_v23 }
0x1dd0   : > { %3369 = vmax.xlane.f32.xlu0 %v3368_v25 }
0x1dd2   : > { %v3351_v51 = vpop.f32.mrf.mxu3 }
0x1e43   : > { %v3370_v26 = vpop.xlane.xlu0 %3369 }
0x1e44   : > { %vm3371_vm9 = vcmp.eq.f32.partialorder %v3350_v19, %v3370_v26  ;;  %vm3372_vm10 = vcmp.eq.f32.partialorder %v3363_v17, %v3370_v26 }
0x1e45   : > { %v3373_v22 = vsel %vm3371_vm9, %v5861_v3, 256  ;;  %v3374_v33 = vsel %vm3372_vm10, %v5864_v4, 256 }
0x1e46   : > { %v3375_v28 = vsel %vm1830_vm1, %v3373_v22, 2147483647  ;;  %v3376_v29 = vsel %vm1830_vm1, %v3374_v33, 2147483647 }
0x1e47   : > { %vm3377_vm11 = vcmp.lt.s32.totalorder %v3375_v28, %v3376_v29 }
0x1e48   : > { %v3378_v30 = vsel %vm3377_vm11, %v3375_v28, %v3376_v29 }
0x1e49   : > { %v3380_v31 = vshra.s32 %v3378_v30, 16  ;;  %v3379_v12 = vand.u32 65535, %v3378_v30 }
0x1e4b   : > { %v3382_v34 = vcvt.s32.f32 %v3380_v31  ;;  %v3381_v37 = vcvt.s32.f32 %v3379_v12 }
0x1e4d   : > { %3383 = vmin.xlane.f32.xlu1 %v3382_v34 }
0x1ec0   : > { %v3384_v35 = vpop.xlane.xlu1 %3383 }
0x1ec1   : > { %vm3385_vm12 = vcmp.eq.f32.partialorder %v3382_v34, %v3384_v35  ;;  %v3390_v38 = vcvt.f32.s32 %v3384_v35 }
0x1ec2   : > { %v3386_v36 = vsel %vm3385_vm12, %v3381_v37, inf }
0x1ec3   : > { %3387 = vmin.xlane.f32.xlu2 %v3386_v36  ;;  %v3391_v3 = vshll.u32 %v3390_v38, 16 }
0x1f35   : > { %3396 = sbr.rel (%p4233_p0) target bundleno = 7996 (0x1f3c), region = 296 }
0x1f36   : > { %v3388_v39 = vpop.xlane.xlu2 %3387 }
0x1f37   : > { %v3389_v40 = vcvt.f32.s32 %v3388_v39 }
0x1f39   : > { %v3392_v4 = vadd.s32 %v3391_v3, %v3389_v40 }
0x1f3a   : > { %vm3399_vm1 = vcmask 0  }
0x1f3b   : > { %4234 = vst.msk [vmem:[%s5858_s22 + $0x1] sm:$0x1] %vm3399_vm1, %v3392_v4 }
0x1f3c PF: > { %s1739_s26 = sadd.s32 1, %s5275_s26  }
0x1f3d   : > { %p1736_p1 = scmp.ge.s32.totalorder %s1739_s26, 7  }
0x1f3f   :  { %1738 = sbr.rel (!%p1736_p1) target bundleno = 3401 (0xd49), region = 371 }
0x1f44   :  { %3405 = vsyncpa [#allocation8], 1 }
0x1f45   :  { %3406 = vsyncpa [#allocation12], 1 }
0x1f46   :  { %3407 = vsyncpa [#allocation15], 1 }
0x1f47   :  { %3408 = vsyncpa [#allocation18], 1 }
0x1f48   :  { %3409 = vsyncpa [#allocation21], 1 }
0x1f49   :  { %3410 = vsyncpa [#allocation24], 1 }
0x1f4a   :  { %3411 = vsyncpa [#allocation27], 1 }
0x1f4b   :  { %3412 = vsyncpa [#allocation30], 1 }
0x1f4c   :  { %3413 = vsyncpa [#allocation33], 1 }
0x1f4d   :  { %3414 = vsyncpa [#allocation36], 1 }
0x1f4e   :  { %3415 = vsyncpa [#allocation39], 1 }
0x1f4f   :  { %3416 = vsyncpa [#allocation42], 1 }
0x1f50   :  { %3417 = vsyncpa [#allocation45], 1 }
0x1f51   :  { %3418 = vsyncpa [#allocation48], 1 }
0x1f52   :  { %3419 = vsyncpa [#allocation9], 1 }

</bundles_post_ra>
